<compile_context>
chip_gen: v7x
topology: tpu7x:2x2x1
jax: 0.10.0
libtpu: 0.0.40
codegen_flags: <defaults>
</compile_context>

<pallas_src>
import functools

import jax
import jax.numpy as jnp
from jax import lax
from jax.experimental import pallas as pl
from jax.experimental.pallas import tpu as pltpu

# ----- small synthetic configuration (real model: vocab=49488, D=768, S=77, H=12, 12 layers) -----
VOCAB = 128
EMBED = 64
SEQ = 16
HEADS = 4
N_LAYERS = 2
DHEAD = EMBED // HEADS
EPS = 1e-5           # nn.LayerNorm default
GELU_COEF = 1.782    # matches the reference module: x * sigmoid(1.782 * x)
NEG_INF = -1e30      # large finite negative for the causal mask (safe in low precision)


# ------------------------------------------------------------------ kernels

def clip_embedding_kernel(tok_ref, table_hbm, pos_ref, o_ref, rows, sems):
    """token_embedding(x) + positional_embedding.

    tok_ref   : SMEM (B, S) int32  -- scalar-prefetched token ids
    table_hbm : HBM  (V, D) f32    -- stays in HBM; only S rows are DMA-gathered per batch elem
    pos_ref   : VMEM (S, D) f32
    o_ref     : VMEM (1, S, D) f32
    rows      : VMEM (S, D) f32 scratch (gather destination)
    sems      : DMA semaphores, one per gathered row
    """
    b = pl.program_id(0)
    n_rows = rows.shape[0]

    def row_copy(s):
        return pltpu.make_async_copy(
            table_hbm.at[pl.ds(tok_ref[b, s], 1), :],   # one embedding row from HBM
            rows.at[pl.ds(s, 1), :],
            sems.at[s])

    @pl.loop(0, n_rows)
    def _issue(s):                 # issue all row gathers (overlapped DMAs)
        row_copy(s).start()

    @pl.loop(0, n_rows)
    def _wait(s):                  # then wait for all of them
        row_copy(s).wait()

    o_ref[0] = rows[...] + pos_ref[...]


def _layernorm(v, gamma, beta):
    mu = jnp.mean(v, axis=-1, keepdims=True)
    var = jnp.mean((v - mu) ** 2, axis=-1, keepdims=True)
    return (v - mu) * lax.rsqrt(var + EPS) * gamma + beta


def clip_layer_kernel(x_ref,
                      ln1_g_ref, ln1_b_ref,
                      wqkv_ref, bqkv_ref, wo_ref, bo_ref,
                      ln2_g_ref, ln2_b_ref,
                      w1_ref, b1_ref, w2_ref, b2_ref,
                      fin_g_ref, fin_b_ref,
                      o_ref, *, apply_final_ln):
    """One fused transformer encoder layer over the whole (B, S, D) slab.

    LN1 -> causal MHA (batched heads) -> residual -> LN2 -> quick-GELU MLP -> residual
    (+ optional fused final LayerNorm on the last layer).
    Weights are bf16; matmuls accumulate in f32; LN / softmax stay f32.
    """
    B, S, D = x_ref.shape
    H = HEADS
    DH = D // H
    R = B * S                              # all batch rows feed each matmul together
    S_PAD = ((S + 127) // 128) * 128       # lane-dense key length for the softmax tiles

    x = x_ref[...].reshape(R, D)           # (R, D) f32

    # ---------------- attention block ----------------
    residue = x
    h = _layernorm(x, ln1_g_ref[...], ln1_b_ref[...])
    qkv = jnp.dot(h.astype(jnp.bfloat16), wqkv_ref[...],
                  preferred_element_type=jnp.float32) + bqkv_ref[...]      # (R, 3D) f32

    scale = 1.0 / (float(DH) ** 0.5)
    q = qkv[:, 0 * D:1 * D] * scale        # fold 1/sqrt(d_head) into q (cheaper than on scores)
    k = qkv[:, 1 * D:2 * D]
    v = qkv[:, 2 * D:3 * D]

    def split_heads(t):                    # (R, D) -> (H*B, S, DH), head-major batch dim
        t3 = t.reshape(B, S, D)
        return jnp.concatenate(
            [t3[:, :, hh * DH:(hh + 1) * DH] for hh in range(H)], axis=0)

    qh = split_heads(q).astype(jnp.bfloat16)           # (H*B, S, DH)
    kh = split_heads(k).astype(jnp.bfloat16)
    vh = split_heads(v).astype(jnp.bfloat16)

    pad = S_PAD - S
    if pad:                                            # zero-pad keys/values -> dense lanes
        z = jnp.zeros((H * B, pad, DH), jnp.bfloat16)
        kh = jnp.concatenate([kh, z], axis=1)          # (H*B, S_PAD, DH)
        vh = jnp.concatenate([vh, z], axis=1)

    sc = jnp.einsum("bqd,bkd->bqk", qh, kh,
                    preferred_element_type=jnp.float32)                # (H*B, S, S_PAD) f32

    row = lax.broadcasted_iota(jnp.int32, (S, S_PAD), 0)
    col = lax.broadcasted_iota(jnp.int32, (S, S_PAD), 1)
    keep = (col <= row)[None, :, :]        # causal mask; padded key columns are masked too
    sc = jnp.where(keep, sc, NEG_INF)
    sc = sc - jnp.max(sc, axis=-1, keepdims=True)
    p = jnp.exp(sc)
    p = p * pl.reciprocal(jnp.sum(p, axis=-1, keepdims=True), approx=True)

    ctx = jnp.einsum("bqk,bkd->bqd", p.astype(jnp.bfloat16), vh,
                     preferred_element_type=jnp.float32)               # (H*B, S, DH) f32

    attn = jnp.concatenate(
        [ctx[hh * B:(hh + 1) * B] for hh in range(H)], axis=-1)        # (B, S, D)
    attn = attn.reshape(R, D)
    attn = jnp.dot(attn.astype(jnp.bfloat16), wo_ref[...],
                   preferred_element_type=jnp.float32) + bo_ref[...]

    x = attn + residue

    # ---------------- feed-forward block (quick-GELU) ----------------
    residue = x
    h = _layernorm(x, ln2_g_ref[...], ln2_b_ref[...])
    h = jnp.dot(h.astype(jnp.bfloat16), w1_ref[...],
                preferred_element_type=jnp.float32) + b1_ref[...]
    h = h * jax.nn.sigmoid(GELU_COEF * h)                              # EUP transcendental
    h = jnp.dot(h.astype(jnp.bfloat16), w2_ref[...],
                preferred_element_type=jnp.float32) + b2_ref[...]
    x = residue + h

    if apply_final_ln:                     # fused final LayerNorm (last layer only)
        x = _layernorm(x, fin_g_ref[...], fin_b_ref[...])

    o_ref[...] = x.reshape(B, S, D)


# ------------------------------------------------------------------ wrappers

def run_embedding(tokens, table, pos):
    B, S = tokens.shape
    V, D = table.shape
    return pl.pallas_call(
        clip_embedding_kernel,
        out_shape=jax.ShapeDtypeStruct((B, S, D), jnp.float32),
        grid_spec=pltpu.PrefetchScalarGridSpec(
            num_scalar_prefetch=1,                        # tokens -> SMEM
            grid=(B,),
            in_specs=[
                pl.BlockSpec(memory_space=pl.ANY),        # embedding table stays in HBM
                pl.BlockSpec((S, D), lambda b, tok: (0, 0)),
            ],
            out_specs=pl.BlockSpec((1, S, D), lambda b, tok: (b, 0, 0)),
            scratch_shapes=[pltpu.VMEM((S, D), jnp.float32),
                            pltpu.SemaphoreType.DMA((S,))],
        ),
        compiler_params=pltpu.CompilerParams(
            dimension_semantics=("arbitrary",)),
    )(tokens, table, pos)


def run_clip_layer(x, p, final_g, final_b, *, apply_final_ln):
    B, S, D = x.shape

    def full(shape):
        rank = len(shape)
        return pl.BlockSpec(shape, lambda i, _r=rank: (0,) * _r)

    kernel = functools.partial(clip_layer_kernel, apply_final_ln=apply_final_ln)

    return pl.pallas_call(
        kernel,
        out_shape=jax.ShapeDtypeStruct((B, S, D), jnp.float32),
        grid=(1,),                         # one step: weights read once, matmuls see B*S rows
        in_specs=[
            full((B, S, D)),                        # activations
            full((1, D)), full((1, D)),             # layer_norm1 gamma / beta
            full((D, 3 * D)), full((1, 3 * D)),     # attn in_proj (q,k,v)  [bf16 weight]
            full((D, D)), full((1, D)),             # attn out_proj         [bf16 weight]
            full((1, D)), full((1, D)),             # layer_norm2 gamma / beta
            full((D, 4 * D)), full((1, 4 * D)),     # linear1               [bf16 weight]
            full((4 * D, D)), full((1, D)),         # linear2               [bf16 weight]
            full((1, D)), full((1, D)),             # final layernorm (used on last layer only)
        ],
        out_specs=full((B, S, D)),
        compiler_params=pltpu.CompilerParams(
            dimension_semantics=("arbitrary",),
            vmem_limit_bytes=48 * 1024 * 1024),     # safe on v5e/v6e (128 MiB) and v7x (64 MiB)
    )(x,
      p["ln1_g"], p["ln1_b"],
      p["w_qkv"], p["b_qkv"], p["w_o"], p["b_o"],
      p["ln2_g"], p["ln2_b"],
      p["w_1"], p["b_1"], p["w_2"], p["b_2"],
      final_g, final_b)


# ------------------------------------------------------------------ parameter init

def init_params(key):
    keys = iter(jax.random.split(key, 2 + 8 * N_LAYERS))
    scale = 0.02

    def w(shape):   # weights stored bf16 (matmul operands), f32 accumulation in-kernel
        return (scale * jax.random.normal(next(keys), shape, jnp.float32)).astype(jnp.bfloat16)

    def b(shape):   # biases / LN params stay f32
        return scale * jax.random.normal(next(keys), shape, jnp.float32)

    params = {
        "tok_table": scale * jax.random.normal(next(keys), (VOCAB, EMBED), jnp.float32),
        # module inits positional_embedding to zeros; small deterministic noise kept here
        "pos": scale * jax.random.normal(next(keys), (SEQ, EMBED), jnp.float32),
        "final_g": jnp.ones((1, EMBED), jnp.float32),
        "final_b": jnp.zeros((1, EMBED), jnp.float32),
        "layers": [],
    }
    for _ in range(N_LAYERS):
        params["layers"].append({
            "ln1_g": jnp.ones((1, EMBED), jnp.float32),
            "ln1_b": jnp.zeros((1, EMBED), jnp.float32),
            "w_qkv": w((EMBED, 3 * EMBED)),
            "b_qkv": b((1, 3 * EMBED)),
            "w_o":   w((EMBED, EMBED)),
            "b_o":   b((1, EMBED)),
            "ln2_g": jnp.ones((1, EMBED), jnp.float32),
            "ln2_b": jnp.zeros((1, EMBED), jnp.float32),
            "w_1":   w((EMBED, 4 * EMBED)),
            "b_1":   b((1, 4 * EMBED)),
            "w_2":   w((4 * EMBED, EMBED)),
            "b_2":   b((1, EMBED)),
        })
    return params


@jax.jit
def clip_forward(tokens, params):
    tokens = tokens.astype(jnp.int32)                 # x.type(torch.long) equivalent
    state = run_embedding(tokens, params["tok_table"], params["pos"])
    n_layers = len(params["layers"])
    for i, layer_params in enumerate(params["layers"]):
        state = run_clip_layer(state, layer_params,
                               params["final_g"], params["final_b"],
                               apply_final_ln=(i == n_layers - 1))  # final LN fused here
    return state


# ------------------------------------------------------------------ main

if __name__ == "__main__":
    key = jax.random.PRNGKey(0)
    k_tok, k_par = jax.random.split(key)

    B = 2
    tokens = jax.random.randint(k_tok, (B, SEQ), 0, VOCAB, dtype=jnp.int32)
    params = init_params(k_par)

    out = clip_forward(tokens, params)
    jax.block_until_ready(out)
    assert out.shape == (B, SEQ, EMBED) and out.dtype == jnp.float32
    print("KERNEL_OK")
</pallas_src>

<mosaic_0001>
module attributes {stable_mosaic.version = 11 : i64} {
  func.func @clip_embedding_kernel(%arg0: i32, %arg1: memref<2x16xi32, #tpu.memory_space<smem>>, %arg2: memref<128x64xf32, #tpu.memory_space<any>>, %arg3: memref<16x64xf32, #tpu.memory_space<vmem>>, %arg4: memref<1x16x64xf32, #tpu.memory_space<vmem>>, %arg5: memref<16x64xf32, #tpu.memory_space<vmem>>, %arg6: memref<16x!tpu.dma_semaphore, #tpu.memory_space<semaphore_mem>>) attributes {dimension_semantics = [#tpu.dimension_semantics<arbitrary>], iteration_bounds = array<i64: 2>, scalar_prefetch = 1 : i64, scratch_operands = 2 : i64, tpu.core_type = #tpu.core_type<tc>, window_params = [{}, {pipeline_mode = #tpu.pipeline_mode<synchronous>, transform_indices = @transform_1, window_bounds = array<i64: 16, 64>}, {transform_indices = @transform_2, window_bounds = array<i64: 1, 16, 64>}]} {
    %c0_i32 = arith.constant 0 : i32
    %c16_i32 = arith.constant 16 : i32
    %0 = arith.addi %c0_i32, %c16_i32 : i32
    %c1_i32 = arith.constant 1 : i32
    scf.for %arg7 = %c0_i32 to %0 step %c1_i32  : i32 {
      %c1_i32_11 = arith.constant 1 : i32
      %8 = arith.muli %arg7, %c1_i32_11 : i32
      %c0_i32_12 = arith.constant 0 : i32
      %9 = arith.addi %c0_i32_12, %8 : i32
      %10 = arith.index_cast %arg0 : i32 to index
      %11 = arith.index_cast %9 : i32 to index
      %12 = memref.load %arg1[%10, %11] : memref<2x16xi32, #tpu.memory_space<smem>>
      %c0_i32_13 = arith.constant 0 : i32
      %13 = tpu.memref_slice %arg2[%12, %c0_i32_13] : memref<128x64xf32, #tpu.memory_space<any>> -> memref<1x64xf32, #tpu.memory_space<any>>
      %c0_i32_14 = arith.constant 0 : i32
      %14 = tpu.memref_slice %arg5[%9, %c0_i32_14] : memref<16x64xf32, #tpu.memory_space<vmem>> -> memref<1x64xf32, #tpu.memory_space<vmem>>
      %15 = tpu.memref_slice %arg6[%9] : memref<16x!tpu.dma_semaphore, #tpu.memory_space<semaphore_mem>> -> memref<1x!tpu.dma_semaphore, #tpu.memory_space<semaphore_mem>>
      %16 = tpu.memref_squeeze %15 : memref<1x!tpu.dma_semaphore, #tpu.memory_space<semaphore_mem>> -> memref<!tpu.dma_semaphore, #tpu.memory_space<semaphore_mem>>
      tpu.enqueue_dma source(%13 : memref<1x64xf32, #tpu.memory_space<any>>) target(%14 : memref<1x64xf32, #tpu.memory_space<vmem>>) target_semaphore(%16 : memref<!tpu.dma_semaphore, #tpu.memory_space<semaphore_mem>>)
    }
    %c16_i32_0 = arith.constant 16 : i32
    %c0_i32_1 = arith.constant 0 : i32
    %c16_i32_2 = arith.constant 16 : i32
    %1 = arith.addi %c0_i32_1, %c16_i32_2 : i32
    %c1_i32_3 = arith.constant 1 : i32
    scf.for %arg7 = %c0_i32_1 to %1 step %c1_i32_3  : i32 {
      %c1_i32_11 = arith.constant 1 : i32
      %8 = arith.muli %arg7, %c1_i32_11 : i32
      %c0_i32_12 = arith.constant 0 : i32
      %9 = arith.addi %c0_i32_12, %8 : i32
      %10 = arith.index_cast %arg0 : i32 to index
      %11 = arith.index_cast %9 : i32 to index
      %12 = memref.load %arg1[%10, %11] : memref<2x16xi32, #tpu.memory_space<smem>>
      %c0_i32_13 = arith.constant 0 : i32
      %13 = tpu.memref_slice %arg2[%12, %c0_i32_13] : memref<128x64xf32, #tpu.memory_space<any>> -> memref<1x64xf32, #tpu.memory_space<any>>
      %c0_i32_14 = arith.constant 0 : i32
      %14 = tpu.memref_slice %arg5[%9, %c0_i32_14] : memref<16x64xf32, #tpu.memory_space<vmem>> -> memref<1x64xf32, #tpu.memory_space<vmem>>
      %15 = tpu.memref_slice %arg6[%9] : memref<16x!tpu.dma_semaphore, #tpu.memory_space<semaphore_mem>> -> memref<1x!tpu.dma_semaphore, #tpu.memory_space<semaphore_mem>>
      %16 = tpu.memref_squeeze %15 : memref<1x!tpu.dma_semaphore, #tpu.memory_space<semaphore_mem>> -> memref<!tpu.dma_semaphore, #tpu.memory_space<semaphore_mem>>
      tpu.wait_dma2 semaphore(%16 : memref<!tpu.dma_semaphore, #tpu.memory_space<semaphore_mem>>) src(%13 : memref<1x64xf32, #tpu.memory_space<any>>) dst(%14 : memref<1x64xf32, #tpu.memory_space<vmem>>)
    }
    %c16_i32_4 = arith.constant 16 : i32
    %c0 = arith.constant 0 : index
    %c0_5 = arith.constant 0 : index
    %2 = vector.load %arg5[%c0, %c0_5] : memref<16x64xf32, #tpu.memory_space<vmem>>, vector<16x64xf32>
    %c0_6 = arith.constant 0 : index
    %c0_7 = arith.constant 0 : index
    %3 = vector.load %arg3[%c0_6, %c0_7] : memref<16x64xf32, #tpu.memory_space<vmem>>, vector<16x64xf32>
    %4 = arith.addf %2, %3 : vector<16x64xf32>
    %c0_8 = arith.constant 0 : index
    %c0_9 = arith.constant 0 : index
    %c0_10 = arith.constant 0 : index
    %5 = vector.load %arg4[%c0_8, %c0_9, %c0_10] : memref<1x16x64xf32, #tpu.memory_space<vmem>>, vector<1x16x64xf32>
    %6 = vector.shape_cast %5 : vector<1x16x64xf32> to vector<16x64xf32>
    %7 = vector.shape_cast %4 : vector<16x64xf32> to vector<1x16x64xf32>
    tpu.vector_store %arg4[%c0_8, %c0_9, %c0_10], %7 {strides = array<i32>} : memref<1x16x64xf32, #tpu.memory_space<vmem>>, vector<1x16x64xf32>,
    return
  }
  func.func @transform_1(%arg0: i32, %arg1: memref<2x16xi32, #tpu.memory_space<smem>>) -> (i32, i32) {
    %c0_i32 = arith.constant 0 : i32
    %c0_i32_0 = arith.constant 0 : i32
    %c0_i32_1 = arith.constant 0 : i32
    return %c0_i32, %c0_i32_0 : i32, i32
  }
  func.func @transform_2(%arg0: i32, %arg1: memref<2x16xi32, #tpu.memory_space<smem>>) -> (i32, i32, i32) {
    %c0_i32 = arith.constant 0 : i32
    %c0_i32_0 = arith.constant 0 : i32
    %c0_i32_1 = arith.constant 0 : i32
    return %arg0, %c0_i32, %c0_i32_0 : i32, i32, i32
  }
}

module attributes {stable_mosaic.version = 11 : i64} {
  func.func @clip_layer_kernel(%arg0: i32, %arg1: memref<2x16x64xf32, #tpu.memory_space<vmem>>, %arg2: memref<1x64xf32, #tpu.memory_space<vmem>>, %arg3: memref<1x64xf32, #tpu.memory_space<vmem>>, %arg4: memref<64x192xbf16, #tpu.memory_space<vmem>>, %arg5: memref<1x192xf32, #tpu.memory_space<vmem>>, %arg6: memref<64x64xbf16, #tpu.memory_space<vmem>>, %arg7: memref<1x64xf32, #tpu.memory_space<vmem>>, %arg8: memref<1x64xf32, #tpu.memory_space<vmem>>, %arg9: memref<1x64xf32, #tpu.memory_space<vmem>>, %arg10: memref<64x256xbf16, #tpu.memory_space<vmem>>, %arg11: memref<1x256xf32, #tpu.memory_space<vmem>>, %arg12: memref<256x64xbf16, #tpu.memory_space<vmem>>, %arg13: memref<1x64xf32, #tpu.memory_space<vmem>>, %arg14: memref<1x64xf32, #tpu.memory_space<vmem>>, %arg15: memref<1x64xf32, #tpu.memory_space<vmem>>, %arg16: memref<2x16x64xf32, #tpu.memory_space<vmem>>) attributes {dimension_semantics = [#tpu.dimension_semantics<arbitrary>], iteration_bounds = array<i64: 1>, scalar_prefetch = 0 : i64, scratch_operands = 0 : i64, tpu.core_type = #tpu.core_type<tc>, window_params = [{pipeline_mode = #tpu.pipeline_mode<synchronous>, transform_indices = @transform_0, window_bounds = array<i64: 2, 16, 64>}, {pipeline_mode = #tpu.pipeline_mode<synchronous>, transform_indices = @transform_1, window_bounds = array<i64: 1, 64>}, {pipeline_mode = #tpu.pipeline_mode<synchronous>, transform_indices = @transform_2, window_bounds = array<i64: 1, 64>}, {pipeline_mode = #tpu.pipeline_mode<synchronous>, transform_indices = @transform_3, window_bounds = array<i64: 64, 192>}, {pipeline_mode = #tpu.pipeline_mode<synchronous>, transform_indices = @transform_4, window_bounds = array<i64: 1, 192>}, {pipeline_mode = #tpu.pipeline_mode<synchronous>, transform_indices = @transform_5, window_bounds = array<i64: 64, 64>}, {pipeline_mode = #tpu.pipeline_mode<synchronous>, transform_indices = @transform_6, window_bounds = array<i64: 1, 64>}, {pipeline_mode = #tpu.pipeline_mode<synchronous>, transform_indices = @transform_7, window_bounds = array<i64: 1, 64>}, {pipeline_mode = #tpu.pipeline_mode<synchronous>, transform_indices = @transform_8, window_bounds = array<i64: 1, 64>}, {pipeline_mode = #tpu.pipeline_mode<synchronous>, transform_indices = @transform_9, window_bounds = array<i64: 64, 256>}, {pipeline_mode = #tpu.pipeline_mode<synchronous>, transform_indices = @transform_10, window_bounds = array<i64: 1, 256>}, {pipeline_mode = #tpu.pipeline_mode<synchronous>, transform_indices = @transform_11, window_bounds = array<i64: 256, 64>}, {pipeline_mode = #tpu.pipeline_mode<synchronous>, transform_indices = @transform_12, window_bounds = array<i64: 1, 64>}, {pipeline_mode = #tpu.pipeline_mode<synchronous>, transform_indices = @transform_13, window_bounds = array<i64: 1, 64>}, {pipeline_mode = #tpu.pipeline_mode<synchronous>, transform_indices = @transform_14, window_bounds = array<i64: 1, 64>}, {pipeline_mode = #tpu.pipeline_mode<synchronous>, transform_indices = @transform_15, window_bounds = array<i64: 2, 16, 64>}]} {
    %c0 = arith.constant 0 : index
    %c0_0 = arith.constant 0 : index
    %c0_1 = arith.constant 0 : index
    %0 = vector.load %arg1[%c0, %c0_0, %c0_1] : memref<2x16x64xf32, #tpu.memory_space<vmem>>, vector<2x16x64xf32>
    %1 = vector.shape_cast %0 : vector<2x16x64xf32> to vector<32x64xf32>
    %c0_2 = arith.constant 0 : index
    %c0_3 = arith.constant 0 : index
    %2 = vector.load %arg2[%c0_2, %c0_3] : memref<1x64xf32, #tpu.memory_space<vmem>>, vector<1x64xf32>
    %c0_4 = arith.constant 0 : index
    %c0_5 = arith.constant 0 : index
    %3 = vector.load %arg3[%c0_4, %c0_5] : memref<1x64xf32, #tpu.memory_space<vmem>>, vector<1x64xf32>
    %cst = arith.constant dense<0.000000e+00> : vector<32xf32>
    %4 = vector.multi_reduction <add>, %1, %cst [1] : vector<32x64xf32> to vector<32xf32>
    %5 = vector.shape_cast %4 : vector<32xf32> to vector<32x1xf32>
    %cst_6 = arith.constant 6.400000e+01 : f32
    %6 = vector.broadcast %cst_6 : f32 to vector<32x1xf32>
    %7 = arith.divf %5, %6 : vector<32x1xf32>
    %8 = vector.broadcast %7 : vector<32x1xf32> to vector<32x64xf32>
    %9 = arith.subf %1, %8 : vector<32x64xf32>
    %10 = arith.mulf %9, %9 : vector<32x64xf32>
    %cst_7 = arith.constant dense<0.000000e+00> : vector<32xf32>
    %11 = vector.multi_reduction <add>, %10, %cst_7 [1] : vector<32x64xf32> to vector<32xf32>
    %12 = vector.shape_cast %11 : vector<32xf32> to vector<32x1xf32>
    %cst_8 = arith.constant 6.400000e+01 : f32
    %13 = vector.broadcast %cst_8 : f32 to vector<32x1xf32>
    %14 = arith.divf %12, %13 : vector<32x1xf32>
    %15 = vector.broadcast %7 : vector<32x1xf32> to vector<32x64xf32>
    %16 = arith.subf %1, %15 : vector<32x64xf32>
    %cst_9 = arith.constant 9.99999974E-6 : f32
    %17 = vector.broadcast %cst_9 : f32 to vector<32x1xf32>
    %18 = arith.addf %14, %17 : vector<32x1xf32>
    %19 = math.rsqrt %18 : vector<32x1xf32>
    %20 = vector.broadcast %19 : vector<32x1xf32> to vector<32x64xf32>
    %21 = arith.mulf %16, %20 : vector<32x64xf32>
    %22 = vector.broadcast %2 : vector<1x64xf32> to vector<32x64xf32>
    %23 = arith.mulf %21, %22 : vector<32x64xf32>
    %24 = vector.broadcast %3 : vector<1x64xf32> to vector<32x64xf32>
    %25 = arith.addf %23, %24 : vector<32x64xf32>
    %26 = arith.truncf %25 : vector<32x64xf32> to vector<32x64xbf16>
    %c0_10 = arith.constant 0 : index
    %c0_11 = arith.constant 0 : index
    %27 = vector.load %arg4[%c0_10, %c0_11] : memref<64x192xbf16, #tpu.memory_space<vmem>>, vector<64x192xbf16>
    %cst_12 = arith.constant dense<0.000000e+00> : vector<32x192xf32>
    %28 = tpu.matmul %26, %27, %cst_12 {dimension_numbers = #tpu.dot_dimension_numbers<[1], [0], [0], [1], [0, 0, 1, 1], [], []>} : vector<32x64xbf16>, vector<64x192xbf16>, vector<32x192xf32> -> vector<32x192xf32>
    %c0_13 = arith.constant 0 : index
    %c0_14 = arith.constant 0 : index
    %29 = vector.load %arg5[%c0_13, %c0_14] : memref<1x192xf32, #tpu.memory_space<vmem>>, vector<1x192xf32>
    %30 = vector.broadcast %29 : vector<1x192xf32> to vector<32x192xf32>
    %31 = arith.addf %28, %30 : vector<32x192xf32>
    %32 = vector.extract_strided_slice %31 {offsets = [0, 0], sizes = [32, 64], strides = [1, 1]} : vector<32x192xf32> to vector<32x64xf32>
    %cst_15 = arith.constant 2.500000e-01 : f32
    %33 = vector.broadcast %cst_15 : f32 to vector<32x64xf32>
    %34 = arith.mulf %32, %33 : vector<32x64xf32>
    %35 = vector.extract_strided_slice %31 {offsets = [0, 64], sizes = [32, 64], strides = [1, 1]} : vector<32x192xf32> to vector<32x64xf32>
    %36 = vector.extract_strided_slice %31 {offsets = [0, 128], sizes = [32, 64], strides = [1, 1]} : vector<32x192xf32> to vector<32x64xf32>
    %37 = vector.shape_cast %34 : vector<32x64xf32> to vector<2x16x64xf32>
    %38 = vector.extract_strided_slice %37 {offsets = [0, 0, 0], sizes = [2, 16, 16], strides = [1, 1, 1]} : vector<2x16x64xf32> to vector<2x16x16xf32>
    %39 = vector.extract_strided_slice %37 {offsets = [0, 0, 16], sizes = [2, 16, 16], strides = [1, 1, 1]} : vector<2x16x64xf32> to vector<2x16x16xf32>
    %40 = vector.extract_strided_slice %37 {offsets = [0, 0, 32], sizes = [2, 16, 16], strides = [1, 1, 1]} : vector<2x16x64xf32> to vector<2x16x16xf32>
    %41 = vector.extract_strided_slice %37 {offsets = [0, 0, 48], sizes = [2, 16, 16], strides = [1, 1, 1]} : vector<2x16x64xf32> to vector<2x16x16xf32>
    %42 = tpu.concatenate %38, %39, %40, %41 in 0 : vector<2x16x16xf32>, vector<2x16x16xf32>, vector<2x16x16xf32>, vector<2x16x16xf32> -> vector<8x16x16xf32>
    %43 = arith.truncf %42 : vector<8x16x16xf32> to vector<8x16x16xbf16>
    %44 = vector.shape_cast %35 : vector<32x64xf32> to vector<2x16x64xf32>
    %45 = vector.extract_strided_slice %44 {offsets = [0, 0, 0], sizes = [2, 16, 16], strides = [1, 1, 1]} : vector<2x16x64xf32> to vector<2x16x16xf32>
    %46 = vector.extract_strided_slice %44 {offsets = [0, 0, 16], sizes = [2, 16, 16], strides = [1, 1, 1]} : vector<2x16x64xf32> to vector<2x16x16xf32>
    %47 = vector.extract_strided_slice %44 {offsets = [0, 0, 32], sizes = [2, 16, 16], strides = [1, 1, 1]} : vector<2x16x64xf32> to vector<2x16x16xf32>
    %48 = vector.extract_strided_slice %44 {offsets = [0, 0, 48], sizes = [2, 16, 16], strides = [1, 1, 1]} : vector<2x16x64xf32> to vector<2x16x16xf32>
    %49 = tpu.concatenate %45, %46, %47, %48 in 0 : vector<2x16x16xf32>, vector<2x16x16xf32>, vector<2x16x16xf32>, vector<2x16x16xf32> -> vector<8x16x16xf32>
    %50 = arith.truncf %49 : vector<8x16x16xf32> to vector<8x16x16xbf16>
    %51 = vector.shape_cast %36 : vector<32x64xf32> to vector<2x16x64xf32>
    %52 = vector.extract_strided_slice %51 {offsets = [0, 0, 0], sizes = [2, 16, 16], strides = [1, 1, 1]} : vector<2x16x64xf32> to vector<2x16x16xf32>
    %53 = vector.extract_strided_slice %51 {offsets = [0, 0, 16], sizes = [2, 16, 16], strides = [1, 1, 1]} : vector<2x16x64xf32> to vector<2x16x16xf32>
    %54 = vector.extract_strided_slice %51 {offsets = [0, 0, 32], sizes = [2, 16, 16], strides = [1, 1, 1]} : vector<2x16x64xf32> to vector<2x16x16xf32>
    %55 = vector.extract_strided_slice %51 {offsets = [0, 0, 48], sizes = [2, 16, 16], strides = [1, 1, 1]} : vector<2x16x64xf32> to vector<2x16x16xf32>
    %56 = tpu.concatenate %52, %53, %54, %55 in 0 : vector<2x16x16xf32>, vector<2x16x16xf32>, vector<2x16x16xf32>, vector<2x16x16xf32> -> vector<8x16x16xf32>
    %57 = arith.truncf %56 : vector<8x16x16xf32> to vector<8x16x16xbf16>
    %cst_16 = arith.constant 0.000000e+00 : bf16
    %58 = vector.broadcast %cst_16 : bf16 to vector<8x112x16xbf16>
    %59 = tpu.concatenate %50, %58 in 1 : vector<8x16x16xbf16>, vector<8x112x16xbf16> -> vector<8x128x16xbf16>
    %60 = tpu.concatenate %57, %58 in 1 : vector<8x16x16xbf16>, vector<8x112x16xbf16> -> vector<8x128x16xbf16>
    "tpu.trace_start"() <{level = 10 : i32, message = "bqd,bkd->bqk"}> : () -> ()
    %cst_17 = arith.constant dense<0.000000e+00> : vector<8x16x128xf32>
    %61 = tpu.matmul %43, %59, %cst_17 {dimension_numbers = #tpu.dot_dimension_numbers<[2], [2], [1], [1], [0, 0, 0, 1, 1, 1], [0], [0]>} : vector<8x16x16xbf16>, vector<8x128x16xbf16>, vector<8x16x128xf32> -> vector<8x16x128xf32>
    "tpu.trace_stop"() : () -> ()
    %62 = tpu.iota {dimensions = array<i32: 0>} : vector<16x128xi32>
    %63 = tpu.iota {dimensions = array<i32: 1>} : vector<16x128xi32>
    %64 = arith.cmpi sle, %63, %62 : vector<16x128xi32>
    %65 = vector.shape_cast %64 : vector<16x128xi1> to vector<1x16x128xi1>
    %cst_18 = arith.constant -1.000000e+30 : f32
    %66 = vector.shape_cast %65 : vector<1x16x128xi1> to vector<1x16x128xi1>
    %67 = vector.broadcast %66 : vector<1x16x128xi1> to vector<8x16x128xi1>
    %68 = vector.broadcast %cst_18 : f32 to vector<8x16x128xf32>
    %69 = arith.select %67, %61, %68 : vector<8x16x128xi1>, vector<8x16x128xf32>
    %cst_19 = arith.constant dense<0xFF800000> : vector<8x16xf32>
    %70 = vector.multi_reduction <maximumf>, %69, %cst_19 [2] : vector<8x16x128xf32> to vector<8x16xf32>
    %71 = vector.shape_cast %70 : vector<8x16xf32> to vector<8x16x1xf32>
    %72 = vector.broadcast %71 : vector<8x16x1xf32> to vector<8x16x128xf32>
    %73 = arith.subf %69, %72 : vector<8x16x128xf32>
    %74 = math.exp %73 : vector<8x16x128xf32>
    %cst_20 = arith.constant dense<0.000000e+00> : vector<8x16xf32>
    %75 = vector.multi_reduction <add>, %74, %cst_20 [2] : vector<8x16x128xf32> to vector<8x16xf32>
    %76 = vector.shape_cast %75 : vector<8x16xf32> to vector<8x16x1xf32>
    %77 = tpu.reciprocal %76 {approx = true} : vector<8x16x1xf32> -> vector<8x16x1xf32>
    %78 = vector.broadcast %77 : vector<8x16x1xf32> to vector<8x16x128xf32>
    %79 = arith.mulf %74, %78 : vector<8x16x128xf32>
    %80 = arith.truncf %79 : vector<8x16x128xf32> to vector<8x16x128xbf16>
    "tpu.trace_start"() <{level = 10 : i32, message = "bqk,bkd->bqd"}> : () -> ()
    %cst_21 = arith.constant dense<0.000000e+00> : vector<8x16x16xf32>
    %81 = tpu.matmul %80, %60, %cst_21 {dimension_numbers = #tpu.dot_dimension_numbers<[2], [1], [1], [2], [0, 0, 0, 1, 1, 2], [0], [0]>} : vector<8x16x128xbf16>, vector<8x128x16xbf16>, vector<8x16x16xf32> -> vector<8x16x16xf32>
    "tpu.trace_stop"() : () -> ()
    %82 = vector.extract_strided_slice %81 {offsets = [0, 0, 0], sizes = [2, 16, 16], strides = [1, 1, 1]} : vector<8x16x16xf32> to vector<2x16x16xf32>
    %83 = vector.extract_strided_slice %81 {offsets = [2, 0, 0], sizes = [2, 16, 16], strides = [1, 1, 1]} : vector<8x16x16xf32> to vector<2x16x16xf32>
    %84 = vector.extract_strided_slice %81 {offsets = [4, 0, 0], sizes = [2, 16, 16], strides = [1, 1, 1]} : vector<8x16x16xf32> to vector<2x16x16xf32>
    %85 = vector.extract_strided_slice %81 {offsets = [6, 0, 0], sizes = [2, 16, 16], strides = [1, 1, 1]} : vector<8x16x16xf32> to vector<2x16x16xf32>
    %86 = tpu.concatenate %82, %83, %84, %85 in 2 : vector<2x16x16xf32>, vector<2x16x16xf32>, vector<2x16x16xf32>, vector<2x16x16xf32> -> vector<2x16x64xf32>
    %87 = vector.shape_cast %86 : vector<2x16x64xf32> to vector<32x64xf32>
    %88 = arith.truncf %87 : vector<32x64xf32> to vector<32x64xbf16>
    %c0_22 = arith.constant 0 : index
    %c0_23 = arith.constant 0 : index
    %89 = vector.load %arg6[%c0_22, %c0_23] : memref<64x64xbf16, #tpu.memory_space<vmem>>, vector<64x64xbf16>
    %cst_24 = arith.constant dense<0.000000e+00> : vector<32x64xf32>
    %90 = tpu.matmul %88, %89, %cst_24 {dimension_numbers = #tpu.dot_dimension_numbers<[1], [0], [0], [1], [0, 0, 1, 1], [], []>} : vector<32x64xbf16>, vector<64x64xbf16>, vector<32x64xf32> -> vector<32x64xf32>
    %c0_25 = arith.constant 0 : index
    %c0_26 = arith.constant 0 : index
    %91 = vector.load %arg7[%c0_25, %c0_26] : memref<1x64xf32, #tpu.memory_space<vmem>>, vector<1x64xf32>
    %92 = vector.broadcast %91 : vector<1x64xf32> to vector<32x64xf32>
    %93 = arith.addf %90, %92 : vector<32x64xf32>
    %94 = arith.addf %93, %1 : vector<32x64xf32>
    %c0_27 = arith.constant 0 : index
    %c0_28 = arith.constant 0 : index
    %95 = vector.load %arg8[%c0_27, %c0_28] : memref<1x64xf32, #tpu.memory_space<vmem>>, vector<1x64xf32>
    %c0_29 = arith.constant 0 : index
    %c0_30 = arith.constant 0 : index
    %96 = vector.load %arg9[%c0_29, %c0_30] : memref<1x64xf32, #tpu.memory_space<vmem>>, vector<1x64xf32>
    %cst_31 = arith.constant dense<0.000000e+00> : vector<32xf32>
    %97 = vector.multi_reduction <add>, %94, %cst_31 [1] : vector<32x64xf32> to vector<32xf32>
    %98 = vector.shape_cast %97 : vector<32xf32> to vector<32x1xf32>
    %cst_32 = arith.constant 6.400000e+01 : f32
    %99 = vector.broadcast %cst_32 : f32 to vector<32x1xf32>
    %100 = arith.divf %98, %99 : vector<32x1xf32>
    %101 = vector.broadcast %100 : vector<32x1xf32> to vector<32x64xf32>
    %102 = arith.subf %94, %101 : vector<32x64xf32>
    %103 = arith.mulf %102, %102 : vector<32x64xf32>
    %cst_33 = arith.constant dense<0.000000e+00> : vector<32xf32>
    %104 = vector.multi_reduction <add>, %103, %cst_33 [1] : vector<32x64xf32> to vector<32xf32>
    %105 = vector.shape_cast %104 : vector<32xf32> to vector<32x1xf32>
    %cst_34 = arith.constant 6.400000e+01 : f32
    %106 = vector.broadcast %cst_34 : f32 to vector<32x1xf32>
    %107 = arith.divf %105, %106 : vector<32x1xf32>
    %108 = vector.broadcast %100 : vector<32x1xf32> to vector<32x64xf32>
    %109 = arith.subf %94, %108 : vector<32x64xf32>
    %cst_35 = arith.constant 9.99999974E-6 : f32
    %110 = vector.broadcast %cst_35 : f32 to vector<32x1xf32>
    %111 = arith.addf %107, %110 : vector<32x1xf32>
    %112 = math.rsqrt %111 : vector<32x1xf32>
    %113 = vector.broadcast %112 : vector<32x1xf32> to vector<32x64xf32>
    %114 = arith.mulf %109, %113 : vector<32x64xf32>
    %115 = vector.broadcast %95 : vector<1x64xf32> to vector<32x64xf32>
    %116 = arith.mulf %114, %115 : vector<32x64xf32>
    %117 = vector.broadcast %96 : vector<1x64xf32> to vector<32x64xf32>
    %118 = arith.addf %116, %117 : vector<32x64xf32>
    %119 = arith.truncf %118 : vector<32x64xf32> to vector<32x64xbf16>
    %c0_36 = arith.constant 0 : index
    %c0_37 = arith.constant 0 : index
    %120 = vector.load %arg10[%c0_36, %c0_37] : memref<64x256xbf16, #tpu.memory_space<vmem>>, vector<64x256xbf16>
    %cst_38 = arith.constant dense<0.000000e+00> : vector<32x256xf32>
    %121 = tpu.matmul %119, %120, %cst_38 {dimension_numbers = #tpu.dot_dimension_numbers<[1], [0], [0], [1], [0, 0, 1, 1], [], []>} : vector<32x64xbf16>, vector<64x256xbf16>, vector<32x256xf32> -> vector<32x256xf32>
    %c0_39 = arith.constant 0 : index
    %c0_40 = arith.constant 0 : index
    %122 = vector.load %arg11[%c0_39, %c0_40] : memref<1x256xf32, #tpu.memory_space<vmem>>, vector<1x256xf32>
    %123 = vector.broadcast %122 : vector<1x256xf32> to vector<32x256xf32>
    %124 = arith.addf %121, %123 : vector<32x256xf32>
    %cst_41 = arith.constant 1.782000e+00 : f32
    %125 = vector.broadcast %cst_41 : f32 to vector<32x256xf32>
    %126 = arith.mulf %125, %124 : vector<32x256xf32>
    %127 = arith.negf %126 : vector<32x256xf32>
    %128 = math.exp %127 : vector<32x256xf32>
    %cst_42 = arith.constant 1.000000e+00 : f32
    %129 = vector.broadcast %cst_42 : f32 to vector<32x256xf32>
    %130 = arith.addf %129, %128 : vector<32x256xf32>
    %131 = arith.divf %129, %130 : vector<32x256xf32>
    %132 = arith.mulf %124, %131 : vector<32x256xf32>
    %133 = arith.truncf %132 : vector<32x256xf32> to vector<32x256xbf16>
    %c0_43 = arith.constant 0 : index
    %c0_44 = arith.constant 0 : index
    %134 = vector.load %arg12[%c0_43, %c0_44] : memref<256x64xbf16, #tpu.memory_space<vmem>>, vector<256x64xbf16>
    %cst_45 = arith.constant dense<0.000000e+00> : vector<32x64xf32>
    %135 = tpu.matmul %133, %134, %cst_45 {dimension_numbers = #tpu.dot_dimension_numbers<[1], [0], [0], [1], [0, 0, 1, 1], [], []>} : vector<32x256xbf16>, vector<256x64xbf16>, vector<32x64xf32> -> vector<32x64xf32>
    %c0_46 = arith.constant 0 : index
    %c0_47 = arith.constant 0 : index
    %136 = vector.load %arg13[%c0_46, %c0_47] : memref<1x64xf32, #tpu.memory_space<vmem>>, vector<1x64xf32>
    %137 = vector.broadcast %136 : vector<1x64xf32> to vector<32x64xf32>
    %138 = arith.addf %135, %137 : vector<32x64xf32>
    %139 = arith.addf %94, %138 : vector<32x64xf32>
    %140 = vector.shape_cast %139 : vector<32x64xf32> to vector<2x16x64xf32>
    %c0_48 = arith.constant 0 : index
    %c0_49 = arith.constant 0 : index
    %c0_50 = arith.constant 0 : index
    %141 = vector.load %arg16[%c0_48, %c0_49, %c0_50] : memref<2x16x64xf32, #tpu.memory_space<vmem>>, vector<2x16x64xf32>
    tpu.vector_store %arg16[%c0_48, %c0_49, %c0_50], %140 {strides = array<i32>} : memref<2x16x64xf32, #tpu.memory_space<vmem>>, vector<2x16x64xf32>,
    return
  }
  func.func @transform_0(%arg0: i32) -> (i32, i32, i32) {
    %c0_i32 = arith.constant 0 : i32
    %c0_i32_0 = arith.constant 0 : i32
    %c0_i32_1 = arith.constant 0 : i32
    %c0_i32_2 = arith.constant 0 : i32
    return %c0_i32, %c0_i32_0, %c0_i32_1 : i32, i32, i32
  }
  func.func @transform_1(%arg0: i32) -> (i32, i32) {
    %c0_i32 = arith.constant 0 : i32
    %c0_i32_0 = arith.constant 0 : i32
    %c0_i32_1 = arith.constant 0 : i32
    return %c0_i32, %c0_i32_0 : i32, i32
  }
  func.func @transform_2(%arg0: i32) -> (i32, i32) {
    %c0_i32 = arith.constant 0 : i32
    %c0_i32_0 = arith.constant 0 : i32
    %c0_i32_1 = arith.constant 0 : i32
    return %c0_i32, %c0_i32_0 : i32, i32
  }
  func.func @transform_3(%arg0: i32) -> (i32, i32) {
    %c0_i32 = arith.constant 0 : i32
    %c0_i32_0 = arith.constant 0 : i32
    %c0_i32_1 = arith.constant 0 : i32
    return %c0_i32, %c0_i32_0 : i32, i32
  }
  func.func @transform_4(%arg0: i32) -> (i32, i32) {
    %c0_i32 = arith.constant 0 : i32
    %c0_i32_0 = arith.constant 0 : i32
    %c0_i32_1 = arith.constant 0 : i32
    return %c0_i32, %c0_i32_0 : i32, i32
  }
  func.func @transform_5(%arg0: i32) -> (i32, i32) {
    %c0_i32 = arith.constant 0 : i32
    %c0_i32_0 = arith.constant 0 : i32
    %c0_i32_1 = arith.constant 0 : i32
    return %c0_i32, %c0_i32_0 : i32, i32
  }
  func.func @transform_6(%arg0: i32) -> (i32, i32) {
    %c0_i32 = arith.constant 0 : i32
    %c0_i32_0 = arith.constant 0 : i32
    %c0_i32_1 = arith.constant 0 : i32
    return %c0_i32, %c0_i32_0 : i32, i32
  }
  func.func @transform_7(%arg0: i32) -> (i32, i32) {
    %c0_i32 = arith.constant 0 : i32
    %c0_i32_0 = arith.constant 0 : i32
    %c0_i32_1 = arith.constant 0 : i32
    return %c0_i32, %c0_i32_0 : i32, i32
  }
  func.func @transform_8(%arg0: i32) -> (i32, i32) {
    %c0_i32 = arith.constant 0 : i32
    %c0_i32_0 = arith.constant 0 : i32
    %c0_i32_1 = arith.constant 0 : i32
    return %c0_i32, %c0_i32_0 : i32, i32
  }
  func.func @transform_9(%arg0: i32) -> (i32, i32) {
    %c0_i32 = arith.constant 0 : i32
    %c0_i32_0 = arith.constant 0 : i32
    %c0_i32_1 = arith.constant 0 : i32
    return %c0_i32, %c0_i32_0 : i32, i32
  }
  func.func @transform_10(%arg0: i32) -> (i32, i32) {
    %c0_i32 = arith.constant 0 : i32
    %c0_i32_0 = arith.constant 0 : i32
    %c0_i32_1 = arith.constant 0 : i32
    return %c0_i32, %c0_i32_0 : i32, i32
  }
  func.func @transform_11(%arg0: i32) -> (i32, i32) {
    %c0_i32 = arith.constant 0 : i32
    %c0_i32_0 = arith.constant 0 : i32
    %c0_i32_1 = arith.constant 0 : i32
    return %c0_i32, %c0_i32_0 : i32, i32
  }
  func.func @transform_12(%arg0: i32) -> (i32, i32) {
    %c0_i32 = arith.constant 0 : i32
    %c0_i32_0 = arith.constant 0 : i32
    %c0_i32_1 = arith.constant 0 : i32
    return %c0_i32, %c0_i32_0 : i32, i32
  }
  func.func @transform_13(%arg0: i32) -> (i32, i32) {
    %c0_i32 = arith.constant 0 : i32
    %c0_i32_0 = arith.constant 0 : i32
    %c0_i32_1 = arith.constant 0 : i32
    return %c0_i32, %c0_i32_0 : i32, i32
  }
  func.func @transform_14(%arg0: i32) -> (i32, i32) {
    %c0_i32 = arith.constant 0 : i32
    %c0_i32_0 = arith.constant 0 : i32
    %c0_i32_1 = arith.constant 0 : i32
    return %c0_i32, %c0_i32_0 : i32, i32
  }
  func.func @transform_15(%arg0: i32) -> (i32, i32, i32) {
    %c0_i32 = arith.constant 0 : i32
    %c0_i32_0 = arith.constant 0 : i32
    %c0_i32_1 = arith.constant 0 : i32
    %c0_i32_2 = arith.constant 0 : i32
    return %c0_i32, %c0_i32_0, %c0_i32_1 : i32, i32, i32
  }
}

module attributes {stable_mosaic.version = 11 : i64} {
  func.func @clip_layer_kernel(%arg0: i32, %arg1: memref<2x16x64xf32, #tpu.memory_space<vmem>>, %arg2: memref<1x64xf32, #tpu.memory_space<vmem>>, %arg3: memref<1x64xf32, #tpu.memory_space<vmem>>, %arg4: memref<64x192xbf16, #tpu.memory_space<vmem>>, %arg5: memref<1x192xf32, #tpu.memory_space<vmem>>, %arg6: memref<64x64xbf16, #tpu.memory_space<vmem>>, %arg7: memref<1x64xf32, #tpu.memory_space<vmem>>, %arg8: memref<1x64xf32, #tpu.memory_space<vmem>>, %arg9: memref<1x64xf32, #tpu.memory_space<vmem>>, %arg10: memref<64x256xbf16, #tpu.memory_space<vmem>>, %arg11: memref<1x256xf32, #tpu.memory_space<vmem>>, %arg12: memref<256x64xbf16, #tpu.memory_space<vmem>>, %arg13: memref<1x64xf32, #tpu.memory_space<vmem>>, %arg14: memref<1x64xf32, #tpu.memory_space<vmem>>, %arg15: memref<1x64xf32, #tpu.memory_space<vmem>>, %arg16: memref<2x16x64xf32, #tpu.memory_space<vmem>>) attributes {dimension_semantics = [#tpu.dimension_semantics<arbitrary>], iteration_bounds = array<i64: 1>, scalar_prefetch = 0 : i64, scratch_operands = 0 : i64, tpu.core_type = #tpu.core_type<tc>, window_params = [{pipeline_mode = #tpu.pipeline_mode<synchronous>, transform_indices = @transform_0, window_bounds = array<i64: 2, 16, 64>}, {pipeline_mode = #tpu.pipeline_mode<synchronous>, transform_indices = @transform_1, window_bounds = array<i64: 1, 64>}, {pipeline_mode = #tpu.pipeline_mode<synchronous>, transform_indices = @transform_2, window_bounds = array<i64: 1, 64>}, {pipeline_mode = #tpu.pipeline_mode<synchronous>, transform_indices = @transform_3, window_bounds = array<i64: 64, 192>}, {pipeline_mode = #tpu.pipeline_mode<synchronous>, transform_indices = @transform_4, window_bounds = array<i64: 1, 192>}, {pipeline_mode = #tpu.pipeline_mode<synchronous>, transform_indices = @transform_5, window_bounds = array<i64: 64, 64>}, {pipeline_mode = #tpu.pipeline_mode<synchronous>, transform_indices = @transform_6, window_bounds = array<i64: 1, 64>}, {pipeline_mode = #tpu.pipeline_mode<synchronous>, transform_indices = @transform_7, window_bounds = array<i64: 1, 64>}, {pipeline_mode = #tpu.pipeline_mode<synchronous>, transform_indices = @transform_8, window_bounds = array<i64: 1, 64>}, {pipeline_mode = #tpu.pipeline_mode<synchronous>, transform_indices = @transform_9, window_bounds = array<i64: 64, 256>}, {pipeline_mode = #tpu.pipeline_mode<synchronous>, transform_indices = @transform_10, window_bounds = array<i64: 1, 256>}, {pipeline_mode = #tpu.pipeline_mode<synchronous>, transform_indices = @transform_11, window_bounds = array<i64: 256, 64>}, {pipeline_mode = #tpu.pipeline_mode<synchronous>, transform_indices = @transform_12, window_bounds = array<i64: 1, 64>}, {pipeline_mode = #tpu.pipeline_mode<synchronous>, transform_indices = @transform_13, window_bounds = array<i64: 1, 64>}, {pipeline_mode = #tpu.pipeline_mode<synchronous>, transform_indices = @transform_14, window_bounds = array<i64: 1, 64>}, {pipeline_mode = #tpu.pipeline_mode<synchronous>, transform_indices = @transform_15, window_bounds = array<i64: 2, 16, 64>}]} {
    %c0 = arith.constant 0 : index
    %c0_0 = arith.constant 0 : index
    %c0_1 = arith.constant 0 : index
    %0 = vector.load %arg1[%c0, %c0_0, %c0_1] : memref<2x16x64xf32, #tpu.memory_space<vmem>>, vector<2x16x64xf32>
    %1 = vector.shape_cast %0 : vector<2x16x64xf32> to vector<32x64xf32>
    %c0_2 = arith.constant 0 : index
    %c0_3 = arith.constant 0 : index
    %2 = vector.load %arg2[%c0_2, %c0_3] : memref<1x64xf32, #tpu.memory_space<vmem>>, vector<1x64xf32>
    %c0_4 = arith.constant 0 : index
    %c0_5 = arith.constant 0 : index
    %3 = vector.load %arg3[%c0_4, %c0_5] : memref<1x64xf32, #tpu.memory_space<vmem>>, vector<1x64xf32>
    %cst = arith.constant dense<0.000000e+00> : vector<32xf32>
    %4 = vector.multi_reduction <add>, %1, %cst [1] : vector<32x64xf32> to vector<32xf32>
    %5 = vector.shape_cast %4 : vector<32xf32> to vector<32x1xf32>
    %cst_6 = arith.constant 6.400000e+01 : f32
    %6 = vector.broadcast %cst_6 : f32 to vector<32x1xf32>
    %7 = arith.divf %5, %6 : vector<32x1xf32>
    %8 = vector.broadcast %7 : vector<32x1xf32> to vector<32x64xf32>
    %9 = arith.subf %1, %8 : vector<32x64xf32>
    %10 = arith.mulf %9, %9 : vector<32x64xf32>
    %cst_7 = arith.constant dense<0.000000e+00> : vector<32xf32>
    %11 = vector.multi_reduction <add>, %10, %cst_7 [1] : vector<32x64xf32> to vector<32xf32>
    %12 = vector.shape_cast %11 : vector<32xf32> to vector<32x1xf32>
    %cst_8 = arith.constant 6.400000e+01 : f32
    %13 = vector.broadcast %cst_8 : f32 to vector<32x1xf32>
    %14 = arith.divf %12, %13 : vector<32x1xf32>
    %15 = vector.broadcast %7 : vector<32x1xf32> to vector<32x64xf32>
    %16 = arith.subf %1, %15 : vector<32x64xf32>
    %cst_9 = arith.constant 9.99999974E-6 : f32
    %17 = vector.broadcast %cst_9 : f32 to vector<32x1xf32>
    %18 = arith.addf %14, %17 : vector<32x1xf32>
    %19 = math.rsqrt %18 : vector<32x1xf32>
    %20 = vector.broadcast %19 : vector<32x1xf32> to vector<32x64xf32>
    %21 = arith.mulf %16, %20 : vector<32x64xf32>
    %22 = vector.broadcast %2 : vector<1x64xf32> to vector<32x64xf32>
    %23 = arith.mulf %21, %22 : vector<32x64xf32>
    %24 = vector.broadcast %3 : vector<1x64xf32> to vector<32x64xf32>
    %25 = arith.addf %23, %24 : vector<32x64xf32>
    %26 = arith.truncf %25 : vector<32x64xf32> to vector<32x64xbf16>
    %c0_10 = arith.constant 0 : index
    %c0_11 = arith.constant 0 : index
    %27 = vector.load %arg4[%c0_10, %c0_11] : memref<64x192xbf16, #tpu.memory_space<vmem>>, vector<64x192xbf16>
    %cst_12 = arith.constant dense<0.000000e+00> : vector<32x192xf32>
    %28 = tpu.matmul %26, %27, %cst_12 {dimension_numbers = #tpu.dot_dimension_numbers<[1], [0], [0], [1], [0, 0, 1, 1], [], []>} : vector<32x64xbf16>, vector<64x192xbf16>, vector<32x192xf32> -> vector<32x192xf32>
    %c0_13 = arith.constant 0 : index
    %c0_14 = arith.constant 0 : index
    %29 = vector.load %arg5[%c0_13, %c0_14] : memref<1x192xf32, #tpu.memory_space<vmem>>, vector<1x192xf32>
    %30 = vector.broadcast %29 : vector<1x192xf32> to vector<32x192xf32>
    %31 = arith.addf %28, %30 : vector<32x192xf32>
    %32 = vector.extract_strided_slice %31 {offsets = [0, 0], sizes = [32, 64], strides = [1, 1]} : vector<32x192xf32> to vector<32x64xf32>
    %cst_15 = arith.constant 2.500000e-01 : f32
    %33 = vector.broadcast %cst_15 : f32 to vector<32x64xf32>
    %34 = arith.mulf %32, %33 : vector<32x64xf32>
    %35 = vector.extract_strided_slice %31 {offsets = [0, 64], sizes = [32, 64], strides = [1, 1]} : vector<32x192xf32> to vector<32x64xf32>
    %36 = vector.extract_strided_slice %31 {offsets = [0, 128], sizes = [32, 64], strides = [1, 1]} : vector<32x192xf32> to vector<32x64xf32>
    %37 = vector.shape_cast %34 : vector<32x64xf32> to vector<2x16x64xf32>
    %38 = vector.extract_strided_slice %37 {offsets = [0, 0, 0], sizes = [2, 16, 16], strides = [1, 1, 1]} : vector<2x16x64xf32> to vector<2x16x16xf32>
    %39 = vector.extract_strided_slice %37 {offsets = [0, 0, 16], sizes = [2, 16, 16], strides = [1, 1, 1]} : vector<2x16x64xf32> to vector<2x16x16xf32>
    %40 = vector.extract_strided_slice %37 {offsets = [0, 0, 32], sizes = [2, 16, 16], strides = [1, 1, 1]} : vector<2x16x64xf32> to vector<2x16x16xf32>
    %41 = vector.extract_strided_slice %37 {offsets = [0, 0, 48], sizes = [2, 16, 16], strides = [1, 1, 1]} : vector<2x16x64xf32> to vector<2x16x16xf32>
    %42 = tpu.concatenate %38, %39, %40, %41 in 0 : vector<2x16x16xf32>, vector<2x16x16xf32>, vector<2x16x16xf32>, vector<2x16x16xf32> -> vector<8x16x16xf32>
    %43 = arith.truncf %42 : vector<8x16x16xf32> to vector<8x16x16xbf16>
    %44 = vector.shape_cast %35 : vector<32x64xf32> to vector<2x16x64xf32>
    %45 = vector.extract_strided_slice %44 {offsets = [0, 0, 0], sizes = [2, 16, 16], strides = [1, 1, 1]} : vector<2x16x64xf32> to vector<2x16x16xf32>
    %46 = vector.extract_strided_slice %44 {offsets = [0, 0, 16], sizes = [2, 16, 16], strides = [1, 1, 1]} : vector<2x16x64xf32> to vector<2x16x16xf32>
    %47 = vector.extract_strided_slice %44 {offsets = [0, 0, 32], sizes = [2, 16, 16], strides = [1, 1, 1]} : vector<2x16x64xf32> to vector<2x16x16xf32>
    %48 = vector.extract_strided_slice %44 {offsets = [0, 0, 48], sizes = [2, 16, 16], strides = [1, 1, 1]} : vector<2x16x64xf32> to vector<2x16x16xf32>
    %49 = tpu.concatenate %45, %46, %47, %48 in 0 : vector<2x16x16xf32>, vector<2x16x16xf32>, vector<2x16x16xf32>, vector<2x16x16xf32> -> vector<8x16x16xf32>
    %50 = arith.truncf %49 : vector<8x16x16xf32> to vector<8x16x16xbf16>
    %51 = vector.shape_cast %36 : vector<32x64xf32> to vector<2x16x64xf32>
    %52 = vector.extract_strided_slice %51 {offsets = [0, 0, 0], sizes = [2, 16, 16], strides = [1, 1, 1]} : vector<2x16x64xf32> to vector<2x16x16xf32>
    %53 = vector.extract_strided_slice %51 {offsets = [0, 0, 16], sizes = [2, 16, 16], strides = [1, 1, 1]} : vector<2x16x64xf32> to vector<2x16x16xf32>
    %54 = vector.extract_strided_slice %51 {offsets = [0, 0, 32], sizes = [2, 16, 16], strides = [1, 1, 1]} : vector<2x16x64xf32> to vector<2x16x16xf32>
    %55 = vector.extract_strided_slice %51 {offsets = [0, 0, 48], sizes = [2, 16, 16], strides = [1, 1, 1]} : vector<2x16x64xf32> to vector<2x16x16xf32>
    %56 = tpu.concatenate %52, %53, %54, %55 in 0 : vector<2x16x16xf32>, vector<2x16x16xf32>, vector<2x16x16xf32>, vector<2x16x16xf32> -> vector<8x16x16xf32>
    %57 = arith.truncf %56 : vector<8x16x16xf32> to vector<8x16x16xbf16>
    %cst_16 = arith.constant 0.000000e+00 : bf16
    %58 = vector.broadcast %cst_16 : bf16 to vector<8x112x16xbf16>
    %59 = tpu.concatenate %50, %58 in 1 : vector<8x16x16xbf16>, vector<8x112x16xbf16> -> vector<8x128x16xbf16>
    %60 = tpu.concatenate %57, %58 in 1 : vector<8x16x16xbf16>, vector<8x112x16xbf16> -> vector<8x128x16xbf16>
    "tpu.trace_start"() <{level = 10 : i32, message = "bqd,bkd->bqk"}> : () -> ()
    %cst_17 = arith.constant dense<0.000000e+00> : vector<8x16x128xf32>
    %61 = tpu.matmul %43, %59, %cst_17 {dimension_numbers = #tpu.dot_dimension_numbers<[2], [2], [1], [1], [0, 0, 0, 1, 1, 1], [0], [0]>} : vector<8x16x16xbf16>, vector<8x128x16xbf16>, vector<8x16x128xf32> -> vector<8x16x128xf32>
    "tpu.trace_stop"() : () -> ()
    %62 = tpu.iota {dimensions = array<i32: 0>} : vector<16x128xi32>
    %63 = tpu.iota {dimensions = array<i32: 1>} : vector<16x128xi32>
    %64 = arith.cmpi sle, %63, %62 : vector<16x128xi32>
    %65 = vector.shape_cast %64 : vector<16x128xi1> to vector<1x16x128xi1>
    %cst_18 = arith.constant -1.000000e+30 : f32
    %66 = vector.shape_cast %65 : vector<1x16x128xi1> to vector<1x16x128xi1>
    %67 = vector.broadcast %66 : vector<1x16x128xi1> to vector<8x16x128xi1>
    %68 = vector.broadcast %cst_18 : f32 to vector<8x16x128xf32>
    %69 = arith.select %67, %61, %68 : vector<8x16x128xi1>, vector<8x16x128xf32>
    %cst_19 = arith.constant dense<0xFF800000> : vector<8x16xf32>
    %70 = vector.multi_reduction <maximumf>, %69, %cst_19 [2] : vector<8x16x128xf32> to vector<8x16xf32>
    %71 = vector.shape_cast %70 : vector<8x16xf32> to vector<8x16x1xf32>
    %72 = vector.broadcast %71 : vector<8x16x1xf32> to vector<8x16x128xf32>
    %73 = arith.subf %69, %72 : vector<8x16x128xf32>
    %74 = math.exp %73 : vector<8x16x128xf32>
    %cst_20 = arith.constant dense<0.000000e+00> : vector<8x16xf32>
    %75 = vector.multi_reduction <add>, %74, %cst_20 [2] : vector<8x16x128xf32> to vector<8x16xf32>
    %76 = vector.shape_cast %75 : vector<8x16xf32> to vector<8x16x1xf32>
    %77 = tpu.reciprocal %76 {approx = true} : vector<8x16x1xf32> -> vector<8x16x1xf32>
    %78 = vector.broadcast %77 : vector<8x16x1xf32> to vector<8x16x128xf32>
    %79 = arith.mulf %74, %78 : vector<8x16x128xf32>
    %80 = arith.truncf %79 : vector<8x16x128xf32> to vector<8x16x128xbf16>
    "tpu.trace_start"() <{level = 10 : i32, message = "bqk,bkd->bqd"}> : () -> ()
    %cst_21 = arith.constant dense<0.000000e+00> : vector<8x16x16xf32>
    %81 = tpu.matmul %80, %60, %cst_21 {dimension_numbers = #tpu.dot_dimension_numbers<[2], [1], [1], [2], [0, 0, 0, 1, 1, 2], [0], [0]>} : vector<8x16x128xbf16>, vector<8x128x16xbf16>, vector<8x16x16xf32> -> vector<8x16x16xf32>
    "tpu.trace_stop"() : () -> ()
    %82 = vector.extract_strided_slice %81 {offsets = [0, 0, 0], sizes = [2, 16, 16], strides = [1, 1, 1]} : vector<8x16x16xf32> to vector<2x16x16xf32>
    %83 = vector.extract_strided_slice %81 {offsets = [2, 0, 0], sizes = [2, 16, 16], strides = [1, 1, 1]} : vector<8x16x16xf32> to vector<2x16x16xf32>
    %84 = vector.extract_strided_slice %81 {offsets = [4, 0, 0], sizes = [2, 16, 16], strides = [1, 1, 1]} : vector<8x16x16xf32> to vector<2x16x16xf32>
    %85 = vector.extract_strided_slice %81 {offsets = [6, 0, 0], sizes = [2, 16, 16], strides = [1, 1, 1]} : vector<8x16x16xf32> to vector<2x16x16xf32>
    %86 = tpu.concatenate %82, %83, %84, %85 in 2 : vector<2x16x16xf32>, vector<2x16x16xf32>, vector<2x16x16xf32>, vector<2x16x16xf32> -> vector<2x16x64xf32>
    %87 = vector.shape_cast %86 : vector<2x16x64xf32> to vector<32x64xf32>
    %88 = arith.truncf %87 : vector<32x64xf32> to vector<32x64xbf16>
    %c0_22 = arith.constant 0 : index
    %c0_23 = arith.constant 0 : index
    %89 = vector.load %arg6[%c0_22, %c0_23] : memref<64x64xbf16, #tpu.memory_space<vmem>>, vector<64x64xbf16>
    %cst_24 = arith.constant dense<0.000000e+00> : vector<32x64xf32>
    %90 = tpu.matmul %88, %89, %cst_24 {dimension_numbers = #tpu.dot_dimension_numbers<[1], [0], [0], [1], [0, 0, 1, 1], [], []>} : vector<32x64xbf16>, vector<64x64xbf16>, vector<32x64xf32> -> vector<32x64xf32>
    %c0_25 = arith.constant 0 : index
    %c0_26 = arith.constant 0 : index
    %91 = vector.load %arg7[%c0_25, %c0_26] : memref<1x64xf32, #tpu.memory_space<vmem>>, vector<1x64xf32>
    %92 = vector.broadcast %91 : vector<1x64xf32> to vector<32x64xf32>
    %93 = arith.addf %90, %92 : vector<32x64xf32>
    %94 = arith.addf %93, %1 : vector<32x64xf32>
    %c0_27 = arith.constant 0 : index
    %c0_28 = arith.constant 0 : index
    %95 = vector.load %arg8[%c0_27, %c0_28] : memref<1x64xf32, #tpu.memory_space<vmem>>, vector<1x64xf32>
    %c0_29 = arith.constant 0 : index
    %c0_30 = arith.constant 0 : index
    %96 = vector.load %arg9[%c0_29, %c0_30] : memref<1x64xf32, #tpu.memory_space<vmem>>, vector<1x64xf32>
    %cst_31 = arith.constant dense<0.000000e+00> : vector<32xf32>
    %97 = vector.multi_reduction <add>, %94, %cst_31 [1] : vector<32x64xf32> to vector<32xf32>
    %98 = vector.shape_cast %97 : vector<32xf32> to vector<32x1xf32>
    %cst_32 = arith.constant 6.400000e+01 : f32
    %99 = vector.broadcast %cst_32 : f32 to vector<32x1xf32>
    %100 = arith.divf %98, %99 : vector<32x1xf32>
    %101 = vector.broadcast %100 : vector<32x1xf32> to vector<32x64xf32>
    %102 = arith.subf %94, %101 : vector<32x64xf32>
    %103 = arith.mulf %102, %102 : vector<32x64xf32>
    %cst_33 = arith.constant dense<0.000000e+00> : vector<32xf32>
    %104 = vector.multi_reduction <add>, %103, %cst_33 [1] : vector<32x64xf32> to vector<32xf32>
    %105 = vector.shape_cast %104 : vector<32xf32> to vector<32x1xf32>
    %cst_34 = arith.constant 6.400000e+01 : f32
    %106 = vector.broadcast %cst_34 : f32 to vector<32x1xf32>
    %107 = arith.divf %105, %106 : vector<32x1xf32>
    %108 = vector.broadcast %100 : vector<32x1xf32> to vector<32x64xf32>
    %109 = arith.subf %94, %108 : vector<32x64xf32>
    %cst_35 = arith.constant 9.99999974E-6 : f32
    %110 = vector.broadcast %cst_35 : f32 to vector<32x1xf32>
    %111 = arith.addf %107, %110 : vector<32x1xf32>
    %112 = math.rsqrt %111 : vector<32x1xf32>
    %113 = vector.broadcast %112 : vector<32x1xf32> to vector<32x64xf32>
    %114 = arith.mulf %109, %113 : vector<32x64xf32>
    %115 = vector.broadcast %95 : vector<1x64xf32> to vector<32x64xf32>
    %116 = arith.mulf %114, %115 : vector<32x64xf32>
    %117 = vector.broadcast %96 : vector<1x64xf32> to vector<32x64xf32>
    %118 = arith.addf %116, %117 : vector<32x64xf32>
    %119 = arith.truncf %118 : vector<32x64xf32> to vector<32x64xbf16>
    %c0_36 = arith.constant 0 : index
    %c0_37 = arith.constant 0 : index
    %120 = vector.load %arg10[%c0_36, %c0_37] : memref<64x256xbf16, #tpu.memory_space<vmem>>, vector<64x256xbf16>
    %cst_38 = arith.constant dense<0.000000e+00> : vector<32x256xf32>
    %121 = tpu.matmul %119, %120, %cst_38 {dimension_numbers = #tpu.dot_dimension_numbers<[1], [0], [0], [1], [0, 0, 1, 1], [], []>} : vector<32x64xbf16>, vector<64x256xbf16>, vector<32x256xf32> -> vector<32x256xf32>
    %c0_39 = arith.constant 0 : index
    %c0_40 = arith.constant 0 : index
    %122 = vector.load %arg11[%c0_39, %c0_40] : memref<1x256xf32, #tpu.memory_space<vmem>>, vector<1x256xf32>
    %123 = vector.broadcast %122 : vector<1x256xf32> to vector<32x256xf32>
    %124 = arith.addf %121, %123 : vector<32x256xf32>
    %cst_41 = arith.constant 1.782000e+00 : f32
    %125 = vector.broadcast %cst_41 : f32 to vector<32x256xf32>
    %126 = arith.mulf %125, %124 : vector<32x256xf32>
    %127 = arith.negf %126 : vector<32x256xf32>
    %128 = math.exp %127 : vector<32x256xf32>
    %cst_42 = arith.constant 1.000000e+00 : f32
    %129 = vector.broadcast %cst_42 : f32 to vector<32x256xf32>
    %130 = arith.addf %129, %128 : vector<32x256xf32>
    %131 = arith.divf %129, %130 : vector<32x256xf32>
    %132 = arith.mulf %124, %131 : vector<32x256xf32>
    %133 = arith.truncf %132 : vector<32x256xf32> to vector<32x256xbf16>
    %c0_43 = arith.constant 0 : index
    %c0_44 = arith.constant 0 : index
    %134 = vector.load %arg12[%c0_43, %c0_44] : memref<256x64xbf16, #tpu.memory_space<vmem>>, vector<256x64xbf16>
    %cst_45 = arith.constant dense<0.000000e+00> : vector<32x64xf32>
    %135 = tpu.matmul %133, %134, %cst_45 {dimension_numbers = #tpu.dot_dimension_numbers<[1], [0], [0], [1], [0, 0, 1, 1], [], []>} : vector<32x256xbf16>, vector<256x64xbf16>, vector<32x64xf32> -> vector<32x64xf32>
    %c0_46 = arith.constant 0 : index
    %c0_47 = arith.constant 0 : index
    %136 = vector.load %arg13[%c0_46, %c0_47] : memref<1x64xf32, #tpu.memory_space<vmem>>, vector<1x64xf32>
    %137 = vector.broadcast %136 : vector<1x64xf32> to vector<32x64xf32>
    %138 = arith.addf %135, %137 : vector<32x64xf32>
    %139 = arith.addf %94, %138 : vector<32x64xf32>
    %c0_48 = arith.constant 0 : index
    %c0_49 = arith.constant 0 : index
    %140 = vector.load %arg14[%c0_48, %c0_49] : memref<1x64xf32, #tpu.memory_space<vmem>>, vector<1x64xf32>
    %c0_50 = arith.constant 0 : index
    %c0_51 = arith.constant 0 : index
    %141 = vector.load %arg15[%c0_50, %c0_51] : memref<1x64xf32, #tpu.memory_space<vmem>>, vector<1x64xf32>
    %cst_52 = arith.constant dense<0.000000e+00> : vector<32xf32>
    %142 = vector.multi_reduction <add>, %139, %cst_52 [1] : vector<32x64xf32> to vector<32xf32>
    %143 = vector.shape_cast %142 : vector<32xf32> to vector<32x1xf32>
    %cst_53 = arith.constant 6.400000e+01 : f32
    %144 = vector.broadcast %cst_53 : f32 to vector<32x1xf32>
    %145 = arith.divf %143, %144 : vector<32x1xf32>
    %146 = vector.broadcast %145 : vector<32x1xf32> to vector<32x64xf32>
    %147 = arith.subf %139, %146 : vector<32x64xf32>
    %148 = arith.mulf %147, %147 : vector<32x64xf32>
    %cst_54 = arith.constant dense<0.000000e+00> : vector<32xf32>
    %149 = vector.multi_reduction <add>, %148, %cst_54 [1] : vector<32x64xf32> to vector<32xf32>
    %150 = vector.shape_cast %149 : vector<32xf32> to vector<32x1xf32>
    %cst_55 = arith.constant 6.400000e+01 : f32
    %151 = vector.broadcast %cst_55 : f32 to vector<32x1xf32>
    %152 = arith.divf %150, %151 : vector<32x1xf32>
    %153 = vector.broadcast %145 : vector<32x1xf32> to vector<32x64xf32>
    %154 = arith.subf %139, %153 : vector<32x64xf32>
    %cst_56 = arith.constant 9.99999974E-6 : f32
    %155 = vector.broadcast %cst_56 : f32 to vector<32x1xf32>
    %156 = arith.addf %152, %155 : vector<32x1xf32>
    %157 = math.rsqrt %156 : vector<32x1xf32>
    %158 = vector.broadcast %157 : vector<32x1xf32> to vector<32x64xf32>
    %159 = arith.mulf %154, %158 : vector<32x64xf32>
    %160 = vector.broadcast %140 : vector<1x64xf32> to vector<32x64xf32>
    %161 = arith.mulf %159, %160 : vector<32x64xf32>
    %162 = vector.broadcast %141 : vector<1x64xf32> to vector<32x64xf32>
    %163 = arith.addf %161, %162 : vector<32x64xf32>
    %164 = vector.shape_cast %163 : vector<32x64xf32> to vector<2x16x64xf32>
    %c0_57 = arith.constant 0 : index
    %c0_58 = arith.constant 0 : index
    %c0_59 = arith.constant 0 : index
    %165 = vector.load %arg16[%c0_57, %c0_58, %c0_59] : memref<2x16x64xf32, #tpu.memory_space<vmem>>, vector<2x16x64xf32>
    tpu.vector_store %arg16[%c0_57, %c0_58, %c0_59], %164 {strides = array<i32>} : memref<2x16x64xf32, #tpu.memory_space<vmem>>, vector<2x16x64xf32>,
    return
  }
  func.func @transform_0(%arg0: i32) -> (i32, i32, i32) {
    %c0_i32 = arith.constant 0 : i32
    %c0_i32_0 = arith.constant 0 : i32
    %c0_i32_1 = arith.constant 0 : i32
    %c0_i32_2 = arith.constant 0 : i32
    return %c0_i32, %c0_i32_0, %c0_i32_1 : i32, i32, i32
  }
  func.func @transform_1(%arg0: i32) -> (i32, i32) {
    %c0_i32 = arith.constant 0 : i32
    %c0_i32_0 = arith.constant 0 : i32
    %c0_i32_1 = arith.constant 0 : i32
    return %c0_i32, %c0_i32_0 : i32, i32
  }
  func.func @transform_2(%arg0: i32) -> (i32, i32) {
    %c0_i32 = arith.constant 0 : i32
    %c0_i32_0 = arith.constant 0 : i32
    %c0_i32_1 = arith.constant 0 : i32
    return %c0_i32, %c0_i32_0 : i32, i32
  }
  func.func @transform_3(%arg0: i32) -> (i32, i32) {
    %c0_i32 = arith.constant 0 : i32
    %c0_i32_0 = arith.constant 0 : i32
    %c0_i32_1 = arith.constant 0 : i32
    return %c0_i32, %c0_i32_0 : i32, i32
  }
  func.func @transform_4(%arg0: i32) -> (i32, i32) {
    %c0_i32 = arith.constant 0 : i32
    %c0_i32_0 = arith.constant 0 : i32
    %c0_i32_1 = arith.constant 0 : i32
    return %c0_i32, %c0_i32_0 : i32, i32
  }
  func.func @transform_5(%arg0: i32) -> (i32, i32) {
    %c0_i32 = arith.constant 0 : i32
    %c0_i32_0 = arith.constant 0 : i32
    %c0_i32_1 = arith.constant 0 : i32
    return %c0_i32, %c0_i32_0 : i32, i32
  }
  func.func @transform_6(%arg0: i32) -> (i32, i32) {
    %c0_i32 = arith.constant 0 : i32
    %c0_i32_0 = arith.constant 0 : i32
    %c0_i32_1 = arith.constant 0 : i32
    return %c0_i32, %c0_i32_0 : i32, i32
  }
  func.func @transform_7(%arg0: i32) -> (i32, i32) {
    %c0_i32 = arith.constant 0 : i32
    %c0_i32_0 = arith.constant 0 : i32
    %c0_i32_1 = arith.constant 0 : i32
    return %c0_i32, %c0_i32_0 : i32, i32
  }
  func.func @transform_8(%arg0: i32) -> (i32, i32) {
    %c0_i32 = arith.constant 0 : i32
    %c0_i32_0 = arith.constant 0 : i32
    %c0_i32_1 = arith.constant 0 : i32
    return %c0_i32, %c0_i32_0 : i32, i32
  }
  func.func @transform_9(%arg0: i32) -> (i32, i32) {
    %c0_i32 = arith.constant 0 : i32
    %c0_i32_0 = arith.constant 0 : i32
    %c0_i32_1 = arith.constant 0 : i32
    return %c0_i32, %c0_i32_0 : i32, i32
  }
  func.func @transform_10(%arg0: i32) -> (i32, i32) {
    %c0_i32 = arith.constant 0 : i32
    %c0_i32_0 = arith.constant 0 : i32
    %c0_i32_1 = arith.constant 0 : i32
    return %c0_i32, %c0_i32_0 : i32, i32
  }
  func.func @transform_11(%arg0: i32) -> (i32, i32) {
    %c0_i32 = arith.constant 0 : i32
    %c0_i32_0 = arith.constant 0 : i32
    %c0_i32_1 = arith.constant 0 : i32
    return %c0_i32, %c0_i32_0 : i32, i32
  }
  func.func @transform_12(%arg0: i32) -> (i32, i32) {
    %c0_i32 = arith.constant 0 : i32
    %c0_i32_0 = arith.constant 0 : i32
    %c0_i32_1 = arith.constant 0 : i32
    return %c0_i32, %c0_i32_0 : i32, i32
  }
  func.func @transform_13(%arg0: i32) -> (i32, i32) {
    %c0_i32 = arith.constant 0 : i32
    %c0_i32_0 = arith.constant 0 : i32
    %c0_i32_1 = arith.constant 0 : i32
    return %c0_i32, %c0_i32_0 : i32, i32
  }
  func.func @transform_14(%arg0: i32) -> (i32, i32) {
    %c0_i32 = arith.constant 0 : i32
    %c0_i32_0 = arith.constant 0 : i32
    %c0_i32_1 = arith.constant 0 : i32
    return %c0_i32, %c0_i32_0 : i32, i32
  }
  func.func @transform_15(%arg0: i32) -> (i32, i32, i32) {
    %c0_i32 = arith.constant 0 : i32
    %c0_i32_0 = arith.constant 0 : i32
    %c0_i32_1 = arith.constant 0 : i32
    %c0_i32_2 = arith.constant 0 : i32
    return %c0_i32, %c0_i32_0, %c0_i32_1 : i32, i32, i32
  }
}

</mosaic_0001>

<bundles_post_ra>
// kernel: clip_forward.3
= control target key start
LH: loop header
LB: loop body
LE: loop exit
PB: predicated region body
PF: predicated region fallthrough
CT: control target
= control target key end

     0   :  { %s513_s0 = inlined_call_operand.vmem [shape: s32[2,16], index: 0, kind: input, shape index: {}]   ;;  %s514_s1 = inlined_call_operand.vmem [shape: f32[128,64], index: 1, kind: input, shape index: {}]   ;;  %s515_s2 = inlined_call_operand.vmem [shape: f32[16,64], index: 2, kind: input, shape index: {}]   ;;  %s516_s3 = inlined_call_operand.vmem [shape: f32[2,16,64], index: 3, kind: output, shape index: {}]  }
   0x1   :  { %s8_s14 = sshll.u32 %s513_s0, 4  ;;  %s9_s14 = int_to_ptr.vmem [resolvable:$true] %s8_s14 }
   0x2   :  { %s422_s15 = scalar_lea.vmem %s9_s14, 32  ;;  %p427_p1 = scmp.lt.s32.totalorder %s9_s14, %s9_s14 }
   0x3   :  { %p423_p0 = scmp.ne.s32.totalorder %s9_s14, %s422_s15  ;;  %p428_p2 = scmp.lt.s32.totalorder %s422_s15, %s422_s15 }
   0x5   :  { %p429_p3 = por %p428_p2, %p427_p1 }
   0x7   :  { %p430_p4 = pnand %p429_p3, %p423_p0 }
   0x9   :  { %433 = shalt.err (!%p430_p4)  }
   0xa   :  { %s462_s16 = smov [#allocation5]  }
   0xb   :  { %11 = dma.vmem_to_smem %s9_s14, 32, %s462_s16, [#allocation4] }
   0xc   :  { %446 = dma.done.wait [#allocation4], 32 }
   0xd   :  { %447 = vsyncadd [#allocation4], 4294967264 }
   0xe   :  { %13 = sfence }
   0xf   :  { %s486_s17 = smov 0  }
  0x10 LB: > { %s371_s0 = sadd.s32 4294967295, %s452_s17   ;;  %p374_p5 = scmp.ge.s32.totalorder %s452_s17, 1  ;;  %s452_s17 = sphi %s486_s17, %s19_s17  }
  0x11   : > { %p85_p6 = scmp.lt.s32.totalorder %s452_s17, 3 }
  0x13   : > { %p86_p7 = pnand %p374_p5, %p85_p6 }
  0x14   : > { %p100_p8 = scmp.lt.s32.totalorder (!%p86_p7), %s371_s0, 1  ;;  %s454_s23 = smov (!%p86_p7), 0  }
  0x15   : > { %89 = sbr.rel (%p86_p7) target bundleno = 67 (0x43), region = 24 }
  0x1c   : > { %s101_s18 = scalar_select %p100_p8, %s371_s0, 1 }
  0x1e   : > { %s396_s19 = sshll.u32 %s101_s18, 4 }
  0x1f   : > { %s497_s22 = scalar_lea.vmem %s516_s3, %s396_s19 }
  0x20 LB: >> { %s111_s24 = sshra.s32 %s456_s23, 7  ;;  %s116_s25 = sand.u32 127, %s456_s23  ;;  %s456_s23 = sphi %s454_s23, %s110_s23  }
  0x21   : >> { %s113_s26 = sadd.s32 %s371_s0, %s111_s24  ;;  %s120_s6 = scalar_lea.vmem [#allocation2], %s456_s23 }
  0x22   : >> { %s377_s27 = sshll.u32 %s113_s26, 7  ;;  %s121_s7 = scalar_lea.sflag [#allocation3], %s456_s23 }
  0x23   : >> { %s117_s28 = sadd.s32 %s377_s27, %s116_s25 }
  0x24   : >> { %s118_s29 = sld [smem:[#allocation5 + %s117_s28]] }
  0x2a   : >> { %s119_s5 = scalar_lea.vmem %s514_s1, %s118_s29 }
  0x2b   : >> { %v139_v0 = vld [vmem:[%s119_s5] sm:$0x1] }
  0x2c   : >> { %140 = vst [vmem:[%s120_s6] sm:$0x1] %v139_v0 }
  0x2d   : >> { %165 = vsyncadd %s121_s7, 16  ;;  %s110_s23 = sadd.s32 1, %s456_s23  }
  0x2e   : >> { %p107_p9 = scmp.ge.s32.totalorder %s110_s23, 16  }
  0x2f   : > { %s458_s8 = smov (%p107_p9), 0  }
  0x30   : > { %109 = sbr.rel (!%p107_p9) target bundleno = 32 (0x20), region = 124 }
  0x37 LB: >> { %s180_s9 = scalar_lea.sflag [#allocation3], %s460_s8  ;;  %s460_s8 = sphi %s458_s8, %s171_s8  }
  0x38   : >> { %448 = dma.done.wait %s180_s9, 16 }
  0x39   : >> { %449 = vsyncadd %s180_s9, 4294967280  ;;  %s171_s8 = sadd.s32 1, %s460_s8  }
  0x3a   : >> { %p168_p10 = scmp.ge.s32.totalorder %s171_s8, 16  }
  0x3b   : > { %v184_v1 = vld [vmem:[#allocation2] sm:$0xff] (%p168_p10)  ;;  %vm190_vm0 = vcmask (%p168_p10), 523264   ;;  %v185_v3 = vld [vmem:[#allocation2 + $0x8] sm:$0xff] (%p168_p10) }
  0x3c   : > { %170 = sbr.rel (!%p168_p10) target bundleno = 55 (0x37), region = 135  ;;  %v186_v2 = vld [vmem:[%s515_s2] sm:$0xff] (%p168_p10)  ;;  %v187_v5 = vld [vmem:[%s515_s2 + $0x8] sm:$0xff] (%p168_p10) }
  0x3d   : > { %v188_v4 = vadd.f32 (%p168_p10), %v186_v2, %v184_v1  ;;  %v189_v6 = vadd.f32 (%p168_p10), %v187_v5, %v185_v3 }
  0x3f   : > { %191 = vst.msk [vmem:[%s497_s22] sm:$0xff] (%p168_p10), %vm190_vm0, %v188_v4  ;;  %192 = vst.msk [vmem:[%s497_s22 + $0x8] sm:$0xff] (%p168_p10), %vm190_vm0, %v189_v6 }
  0x43 PF: > { %s19_s17 = sadd.s32 1, %s452_s17  }
  0x44   : > { %p16_p11 = scmp.ge.s32.totalorder %s19_s17, 4  }
  0x46   :  { %18 = sbr.rel (!%p16_p11) target bundleno = 16 (0x10), region = 146 }
  0x4d   :  { %214 = vsyncmov [#allocation3] }
  0x50   :  { %s215_s14 = vpop.sfrf %214 }
  0x51   :  { %p380_p12 = scmp.ne.s32.totalorder %s215_s14, 0 }
  0x53   :  { %219 = shalt.err (%p380_p12)  }
  0x54   :  { %221 = vsyncmov [#allocation3 + $0x1] }
  0x57   :  { %s222_s15 = vpop.sfrf %221 }
  0x58   :  { %p381_p13 = scmp.ne.s32.totalorder %s222_s15, 0 }
  0x5a   :  { %226 = shalt.err (%p381_p13)  }
  0x5b   :  { %228 = vsyncmov [#allocation3 + $0x2] }
  0x5e   :  { %s229_s16 = vpop.sfrf %228 }
  0x5f   :  { %p382_p0 = scmp.ne.s32.totalorder %s229_s16, 0 }
  0x61   :  { %233 = shalt.err (%p382_p0)  }
  0x62   :  { %235 = vsyncmov [#allocation3 + $0x3] }
  0x65   :  { %s236_s0 = vpop.sfrf %235 }
  0x66   :  { %p383_p1 = scmp.ne.s32.totalorder %s236_s0, 0 }
  0x68   :  { %240 = shalt.err (%p383_p1)  }
  0x69   :  { %242 = vsyncmov [#allocation3 + $0x4] }
  0x6c   :  { %s243_s18 = vpop.sfrf %242 }
  0x6d   :  { %p384_p2 = scmp.ne.s32.totalorder %s243_s18, 0 }
  0x6f   :  { %247 = shalt.err (%p384_p2)  }
  0x70   :  { %249 = vsyncmov [#allocation3 + $0x5] }
  0x73   :  { %s250_s1 = vpop.sfrf %249 }
  0x74   :  { %p385_p3 = scmp.ne.s32.totalorder %s250_s1, 0 }
  0x76   :  { %254 = shalt.err (%p385_p3)  }
  0x77   :  { %256 = vsyncmov [#allocation3 + $0x6] }
  0x7a   :  { %s257_s2 = vpop.sfrf %256 }
  0x7b   :  { %p386_p4 = scmp.ne.s32.totalorder %s257_s2, 0 }
  0x7d   :  { %261 = shalt.err (%p386_p4)  }
  0x7e   :  { %263 = vsyncmov [#allocation3 + $0x7] }
  0x81   :  { %s264_s3 = vpop.sfrf %263 }
  0x82   :  { %p387_p5 = scmp.ne.s32.totalorder %s264_s3, 0 }
  0x84   :  { %268 = shalt.err (%p387_p5)  }
  0x85   :  { %270 = vsyncmov [#allocation3 + $0x8] }
  0x88   :  { %s271_s17 = vpop.sfrf %270 }
  0x89   :  { %p388_p6 = scmp.ne.s32.totalorder %s271_s17, 0 }
  0x8b   :  { %275 = shalt.err (%p388_p6)  }
  0x8c   :  { %277 = vsyncmov [#allocation3 + $0x9] }
  0x8f   :  { %s278_s19 = vpop.sfrf %277 }
  0x90   :  { %p389_p7 = scmp.ne.s32.totalorder %s278_s19, 0 }
  0x92   :  { %282 = shalt.err (%p389_p7)  }
  0x93   :  { %284 = vsyncmov [#allocation3 + $0xa] }
  0x96   :  { %s285_s20 = vpop.sfrf %284 }
  0x97   :  { %p390_p8 = scmp.ne.s32.totalorder %s285_s20, 0 }
  0x99   :  { %289 = shalt.err (%p390_p8)  }
  0x9a   :  { %291 = vsyncmov [#allocation3 + $0xb] }
  0x9d   :  { %s292_s21 = vpop.sfrf %291 }
  0x9e   :  { %p391_p9 = scmp.ne.s32.totalorder %s292_s21, 0 }
  0xa0   :  { %296 = shalt.err (%p391_p9)  }
  0xa1   :  { %298 = vsyncmov [#allocation3 + $0xc] }
  0xa4   :  { %s299_s22 = vpop.sfrf %298 }
  0xa5   :  { %p392_p10 = scmp.ne.s32.totalorder %s299_s22, 0 }
  0xa7   :  { %303 = shalt.err (%p392_p10)  }
  0xa8   :  { %305 = vsyncmov [#allocation3 + $0xd] }
  0xab   :  { %s306_s23 = vpop.sfrf %305 }
  0xac   :  { %p393_p11 = scmp.ne.s32.totalorder %s306_s23, 0 }
  0xae   :  { %310 = shalt.err (%p393_p11)  }
  0xaf   :  { %312 = vsyncmov [#allocation3 + $0xe] }
  0xb2   :  { %s313_s24 = vpop.sfrf %312 }
  0xb3   :  { %p394_p12 = scmp.ne.s32.totalorder %s313_s24, 0 }
  0xb5   :  { %317 = shalt.err (%p394_p12)  }
  0xb6   :  { %319 = vsyncmov [#allocation3 + $0xf] }
  0xb9   :  { %s320_s25 = vpop.sfrf %319 }
  0xba   :  { %p395_p13 = scmp.ne.s32.totalorder %s320_s25, 0 }
  0xbc   :  { %324 = shalt.err (%p395_p13)  }

// kernel: clip_forward.4
= control target key start
LH: loop header
LB: loop body
LE: loop exit
PB: predicated region body
PF: predicated region fallthrough
CT: control target
= control target key end

     0   :  { %vm57_vm0 = vcmask 523264   ;;  %v2631_v36 = vmov 0   ;;  %s2634_s24 = smov 64   ;;  %vm2635_vm1 = vmmov 0   ;;  %vm406_vm2 = vcmask 130048   ;;  %s2636_s25 = smov 96   ;;  %s3442_s0 = inlined_call_operand.vmem [shape: f32[2,16,64], index: 0, kind: input, shape index: {}]   ;;  %s3443_s13 = inlined_call_operand.vmem [shape: f32[1,64], index: 13, kind: input, shape index: {}]   ;;  %s3444_s14 = inlined_call_operand.vmem [shape: f32[1,64], index: 14, kind: input, shape index: {}]   ;;  %s3445_s3 = inlined_call_operand.vmem [shape: bf16[64,192], index: 3, kind: input, shape index: {}]   ;;  %s3446_s1 = inlined_call_operand.vmem [shape: f32[1,64], index: 1, kind: input, shape index: {}]   ;;  %s3447_s2 = inlined_call_operand.vmem [shape: f32[1,64], index: 2, kind: input, shape index: {}]   ;;  %s3448_s4 = inlined_call_operand.vmem [shape: f32[1,192], index: 4, kind: input, shape index: {}]   ;;  %s3449_s5 = inlined_call_operand.vmem [shape: bf16[64,64], index: 5, kind: input, shape index: {}]   ;;  %s3450_s6 = inlined_call_operand.vmem [shape: f32[1,64], index: 6, kind: input, shape index: {}]   ;;  %s3451_s9 = inlined_call_operand.vmem [shape: bf16[64,256], index: 9, kind: input, shape index: {}]   ;;  %s3452_s7 = inlined_call_operand.vmem [shape: f32[1,64], index: 7, kind: input, shape index: {}]   ;;  %s3453_s8 = inlined_call_operand.vmem [shape: f32[1,64], index: 8, kind: input, shape index: {}]   ;;  %s3454_s11 = inlined_call_operand.vmem [shape: bf16[256,64], index: 11, kind: input, shape index: {}]   ;;  %s3455_s10 = inlined_call_operand.vmem [shape: f32[1,256], index: 10, kind: input, shape index: {}]   ;;  %s3456_s12 = inlined_call_operand.vmem [shape: f32[1,64], index: 12, kind: input, shape index: {}]   ;;  %s3457_s15 = inlined_call_operand.vmem [shape: f32[2,16,64], index: 15, kind: output, shape index: {}]  }
   0x1   :  { %v51_v0 = vld [vmem:[%s3442_s0] sm:$0xff]  ;;  %v53_v1 = vld [vmem:[%s3442_s0 + $0x10] sm:$0xff]  ;;  %v52_v2 = vld [vmem:[%s3442_s0 + $0x8] sm:$0xff]  ;;  %231 = vmatprep.mubr.bf16.mxu1 %v2631_v36  ;;  %s2637_s26 = smov 80   ;;  %s2638_s27 = smov 16   ;;  %vm1366_vm5 = vcmask 261120  }
   0x2   :  { %v58_v3 = vsel %vm57_vm0, %v51_v0, 0.0  ;;  %v64_v4 = vsel %vm57_vm0, %v53_v1, 0.0  ;;  %v54_v5 = vld [vmem:[%s3442_s0 + $0x18] sm:$0xff]  ;;  %v61_v6 = vsel %vm57_vm0, %v52_v2, 0.0  ;;  %v2471_v28 = vld [vmem:[%s3445_s3 + $0x4] ss:$8 sps:$4 sm:$0xff]  }
   0x3   :  { %59 = vadd.xlane.f32.xlu0 %v58_v3  ;;  %65 = vadd.xlane.f32.xlu1 %v64_v4  ;;  %v67_v7 = vsel %vm57_vm0, %v54_v5, 0.0  ;;  %v2473_v29 = vld [vmem:[%s3445_s3] ss:$8 sps:$4 sm:$0xff]   ;;  %v2474_v30 = vld [vmem:[%s3445_s3 + $0x14] ss:$8 sps:$4 sm:$0xff]   ;;  %s2639_s17 = smov 32  }
   0x4   :  { %199 = vmatprep.subr.bf16.mxu1 %v2471_v28  ;;  %v2476_v31 = vld [vmem:[%s3445_s3 + $0x10] ss:$8 sps:$4 sm:$0xff]   ;;  %v2477_v32 = vld [vmem:[%s3445_s3 + $0x24] ss:$8 sps:$4 sm:$0xff]   ;;  %v2479_v33 = vld [vmem:[%s3445_s3 + $0x20] ss:$8 sps:$4 sm:$0xff]  }
   0x5   :  { %200 = vmatpush1.bf16.msra.mxu1 %v2473_v29  ;;  %v2480_v34 = vld [vmem:[%s3445_s3 + $0x34] ss:$8 sps:$4 sm:$0xff]   ;;  %v2482_v35 = vld [vmem:[%s3445_s3 + $0x30] ss:$8 sps:$4 sm:$0xff]   ;;  %v1935_v51 = vld [vmem:[%s3446_s1] ss:$0 sm:$0xff] }
   0x6   :  { %201 = vmatprep.subr.bf16.mxu1 %v2474_v30  ;;  %v1936_v56 = vld [vmem:[%s3447_s2] ss:$0 sm:$0xff]  ;;  %s2640_s20 = smov 48   ;;  %vm1371_vm6 = vcmask 392192  }
   0x7   :  { %62 = vadd.xlane.f32.xlu0 %v61_v6  ;;  %68 = vadd.xlane.f32.xlu1 %v67_v7 }
   0x9   :  { %202 = vmatpush1.bf16.msra.mxu1 %v2476_v31 }
   0xa   :  { %203 = vmatprep.subr.bf16.mxu1 %v2477_v32 }
   0xd   :  { %204 = vmatpush1.bf16.msra.mxu1 %v2479_v33 }
   0xe   :  { %205 = vmatprep.subr.bf16.mxu1 %v2480_v34 }
  0x11   :  { %206 = vmatpush1.bf16.msra.mxu1 %v2482_v35 }
  0x90   :  { %v60_v8 = vpop.xlane.xlu0 %59  ;;  %v66_v9 = vpop.xlane.xlu1 %65 }
  0x91   :  { %v71_v10 = vmul.f32 0.015625, %v60_v8  ;;  %v73_v11 = vmul.f32 0.015625, %v66_v9  ;;  %v141_v8 = vld [vmem:[%s3448_s4] sm:$0x3]  ;;  %v2632_v9 = vmov 0.0   ;;  %s2633_s4 = smov 112  }
  0x92   :  { %2121 = vmatprep.subr.bf16.mxu1 %v2632_v9  ;;  %2141 = vmatprep.subr.bf16.mxu0 %v2632_v9 }
  0x93   :  { %v75_v12 = vsub.f32 %v51_v0, %v71_v10  ;;  %v2737_v13 = vsub.f32 %v53_v1, %v73_v11  ;;  %2157 = vmatprep.mubr.msk.bf16.mxu0 %vm2635_vm1, %v2632_v9 }
  0x94   :  { %v63_v14 = vpop.xlane.xlu0 %62  ;;  %v69_v15 = vpop.xlane.xlu1 %68 }
  0x95   :  { %v72_v16 = vmul.f32 0.015625, %v63_v14  ;;  %v74_v17 = vmul.f32 0.015625, %v69_v15  ;;  %v79_v18 = vmul.f32 %v75_v12, %v75_v12  ;;  %v81_v19 = vmul.f32 %v2737_v13, %v2737_v13 }
  0x97   :  { %v76_v20 = vsub.f32 %v52_v2, %v72_v16  ;;  %v78_v21 = vsub.f32 %v54_v5, %v74_v17  ;;  %v83_v22 = vsel %vm57_vm0, %v79_v18, 0.0  ;;  %v89_v23 = vsel %vm57_vm0, %v81_v19, 0.0 }
  0x98   :  { %84 = vadd.xlane.f32.xlu0 %v83_v22  ;;  %v143_v5 = vlaneseq }
  0x99   :  { %v80_v24 = vmul.f32 %v76_v20, %v76_v20  ;;  %v82_v25 = vmul.f32 %v78_v21, %v78_v21 }
  0x9a   :  { %v2781_v6 = vshrl.u32 %v143_v5, 7 }
  0x9b   :  { %v86_v26 = vsel %vm57_vm0, %v80_v24, 0.0  ;;  %v92_v27 = vsel %vm57_vm0, %v82_v25, 0.0 }
  0x9c   :  { %90 = vadd.xlane.f32.xlu0 %v89_v23  ;;  %87 = vadd.xlane.f32.xlu1 %v86_v26  ;;  %v145_v7 = vsub.s32 0, %v2781_v6  ;;  %v149_v10 = vsub.s32 1, %v2781_v6 }
  0x9e   :  { %v146_v11 = vrot.slane %v141_v8, %v145_v7 }
  0xa0   :  { %93 = vadd.xlane.f32.xlu1 %v92_v27 }
 0x125   :  { %v85_v37 = vpop.xlane.xlu0 %84 }
 0x126   :  { %v95_v38 = vmul.f32 0.015625, %v85_v37 }
 0x128   :  { %v99_v39 = vadd.f32 1e-05, %v95_v38 }
 0x129   :  { %v88_v40 = vpop.xlane.xlu1 %87  ;;  %v91_v41 = vpop.xlane.xlu0 %90 }
 0x12a   :  { %2515 = vrsqrt.f32 %v99_v39  ;;  %v96_v42 = vmul.f32 0.015625, %v88_v40  ;;  %v97_v43 = vmul.f32 0.015625, %v91_v41 }
 0x12c   :  { %v100_v44 = vadd.f32 1e-05, %v96_v42  ;;  %v101_v45 = vadd.f32 1e-05, %v97_v43 }
 0x12d   :  { %v94_v46 = vpop.xlane.xlu1 %93 }
 0x12e   :  { %2517 = vrsqrt.f32 %v100_v44  ;;  %v98_v47 = vmul.f32 0.015625, %v94_v46 }
 0x12f   :  { %2519 = vrsqrt.f32 %v101_v45 }
 0x130   :  { %v102_v48 = vadd.f32 1e-05, %v98_v47 }
 0x132   :  { %2521 = vrsqrt.f32 %v102_v48 }
 0x134   :  { %v2516_v49 = vpop.eup %2515 }
 0x135   :  { %v107_v50 = vmul.f32 %v2516_v49, %v75_v12 }
 0x137   :  { %v117_v54 = vmul.f32 %v1935_v51, %v107_v50 }
 0x138   :  { %v2518_v52 = vpop.eup %2517 }
 0x139   :  { %v108_v53 = vmul.f32 %v2518_v52, %v76_v20  ;;  %v2520_v55 = vpop.eup %2519  ;;  %v127_v61 = vadd.f32 %v1936_v56, %v117_v54 }
 0x13a   :  { %v109_v59 = vmul.f32 %v2520_v55, %v2737_v13  ;;  %v150_v13 = vrot.slane %v141_v8, %v149_v10 }
 0x13b   :  { %v118_v57 = vmul.f32 %v1935_v51, %v108_v53 }
 0x13c   :  { %v2522_v58 = vpop.eup %2521  ;;  %v119_v1 = vmul.f32 %v1935_v51, %v109_v59 }
 0x13d   :  { %v110_v60 = vmul.f32 %v2522_v58, %v78_v21  ;;  %v128_v62 = vadd.f32 %v1936_v56, %v118_v57 }
 0x13e   :  { %v129_v3 = vadd.f32 %v1936_v56, %v119_v1 }
 0x13f   :  { %v131_v63 = vpack.c.bf16 %v128_v62, %v127_v61  ;;  %v120_v0 = vmul.f32 %v1935_v51, %v110_v60 }
 0x141   :  { %1945 = vmatmul.mubr.msk.bf16.vlgmr.msra.gmra.mrb[0].mxu1 %vm57_vm0, %v131_v63  ;;  %v130_v2 = vadd.f32 %v1936_v56, %v120_v0 }
 0x142   :  { %241 = vmatprep.mubr.bf16.mxu1 %v2631_v36 }
 0x143   :  { %v132_v4 = vpack.c.bf16 %v130_v2, %v129_v3 }
 0x149   :  { %1946 = vmatmul.mubr.msk.bf16.gmra.mrb[4].mxu1 %vm57_vm0, %v132_v4 }
 0x14a   :  { %2137 = vmatprep.mubr.msk.bf16.mxu1 %vm2635_vm1, %v2632_v9 }
 0x214   :  { %v233_v12 = vpop.f32.mrb[0].mxu1 }
 0x215   :  { %v234_v14 = vadd.f32 %v233_v12, %v146_v11  ;;  %v235_v15 = vpop.f32.mrb[1].mxu1 }
 0x216   :  { %v237_v16 = vpop.f32.mrb[2].mxu1  ;;  %v2794_v19 = vadd.f32 %v235_v15, %v150_v13 }
 0x217   :  { %v238_v17 = vadd.f32 %v237_v16, %v146_v11  ;;  %v239_v18 = vpop.f32.mrb[3].mxu1  ;;  %v2798_v21 = vmul.f32 0.25, %v234_v14 }
 0x218   :  { %v2796_v20 = vadd.f32 %v239_v18, %v150_v13 }
 0x219   :  { %v2800_v22 = vpack.i.bf16 %v238_v17, %v234_v14  ;;  %v344_v23 = vpack.c.bf16 %v238_v17, %v234_v14  ;;  %v2802_v24 = vmul.f32 0.25, %v238_v17 }
 0x21a   :  { %v392_v25 = vpack.c.bf16 %v2796_v20, %v2794_v19  ;;  %v2808_v26 = vpack.i.bf16 %v2796_v20, %v2794_v19 }
 0x21b   :  { %2352 = vrot.lane.b32.xlu1 %v2800_v22, %s2633_s4  ;;  %402 = vrot.lane.b32.xlu0 %v344_v23, %s2634_s24  ;;  %v2815_v27 = vpack.i.bf16 %v2802_v24, %v2798_v21  ;;  %v296_v28 = vpack.c.bf16 %v2802_v24, %v2798_v21 }
 0x21c   :  { %v243_v29 = vpop.f32.mrb[4].mxu1 }
 0x21d   :  { %v244_v30 = vadd.f32 %v243_v29, %v146_v11  ;;  %v245_v31 = vpop.f32.mrb[5].mxu1 }
 0x21e   :  { %v2819_v32 = vadd.f32 %v245_v31, %v150_v13  ;;  %v247_v33 = vpop.f32.mrb[6].mxu1 }
 0x21f   :  { %v248_v34 = vadd.f32 %v247_v33, %v146_v11  ;;  %v249_v35 = vpop.f32.mrb[7].mxu1  ;;  %404 = vrot.lane.b32.xlu0 %v2631_v36, %s2634_s24  ;;  %v2825_v38 = vmul.f32 0.25, %v244_v30 }
 0x220   :  { %v2823_v37 = vadd.f32 %v249_v35, %v150_v13 }
 0x221   :  { %v345_v39 = vpack.c.bf16 %v248_v34, %v244_v30  ;;  %v2827_v40 = vpack.i.bf16 %v248_v34, %v244_v30  ;;  %v2829_v41 = vmul.f32 0.25, %v248_v34 }
 0x222   :  { %v2833_v42 = vpack.i.bf16 %v2823_v37, %v2819_v32  ;;  %v393_v43 = vpack.c.bf16 %v2823_v37, %v2819_v32 }
 0x223   :  { %458 = vrot.lane.b32.xlu1 %v345_v39, %s2634_s24  ;;  %v2840_v44 = vpack.i.bf16 %v2829_v41, %v2825_v38  ;;  %v297_v45 = vpack.c.bf16 %v2829_v41, %v2825_v38 }
 0x227   :  { %2357 = vrot.lane.b32.xlu1 %v2827_v40, %s2633_s4 }
 0x28d   :  { %v2353_v46 = vpop.permute.xlu1 %2352  ;;  %v403_v47 = vpop.permute.xlu0 %402 }
 0x28e   :  { %v2355_v48 = vunpack.i.h.bf16 %v2353_v46  ;;  %v2354_v49 = vunpack.i.l.bf16 %v2353_v46  ;;  %v411_v50 = vsel %vm406_vm2, %v403_v47, 0 }
 0x28f   :  { %2122 = vmatpush3.bf16.xpose.msra.mxu1 %v411_v50 }
 0x290   :  { %v346_v51 = vpack.c.bf16 %v2355_v48, %v2354_v49  ;;  %2123 = vmatprep.subr.bf16.mxu1 %v2632_v9 }
 0x291   :  { %v405_v52 = vpop.permute.xlu0 %404 }
 0x292   :  { %508 = vrot.lane.b32.xlu1 %v346_v51, %s2634_s24  ;;  %v2854_v53 = vsel %vm406_vm2, %v405_v52, 0  ;;  %v809_v52 = vadd.s32 8, %v2781_v6 }
 0x295   :  { %v459_v54 = vpop.permute.xlu1 %458 }
 0x296   :  { %2362 = vrot.lane.b32.xlu1 %v2800_v22, %s2636_s25  ;;  %v464_v55 = vsel %vm406_vm2, %v459_v54, 0 }
 0x297   :  { %2124 = vmatpush3.bf16.xpose.msra.mxu1 %v2854_v53  ;;  %2142 = vmatpush3.bf16.xpose.msra.mxu0 %v464_v55 }
 0x298   :  { %2143 = vmatprep.subr.bf16.mxu0 %v2632_v9  ;;  %2125 = vmatprep.subr.bf16.mxu1 %v2632_v9 }
 0x299   :  { %v2358_v56 = vpop.permute.xlu1 %2357 }
 0x29a   :  { %v2360_v57 = vunpack.i.h.bf16 %v2358_v56  ;;  %v2359_v58 = vunpack.i.l.bf16 %v2358_v56  ;;  %2372 = vrot.lane.b32.xlu1 %v2815_v27, %s2633_s4 }
 0x29c   :  { %v347_v59 = vpack.c.bf16 %v2360_v57, %v2359_v58 }
 0x29e   :  { %558 = vrot.lane.b32.xlu0 %v347_v59, %s2634_s24 }
 0x29f   :  { %2126 = vmatpush3.bf16.xpose.msra.mxu1 %v2854_v53  ;;  %2144 = vmatpush3.bf16.xpose.msra.mxu0 %v2854_v53 }
 0x2a0   :  { %2127 = vmatprep.subr.bf16.mxu1 %v2632_v9  ;;  %2145 = vmatprep.subr.bf16.mxu0 %v2632_v9 }
 0x2a2   :  { %2367 = vrot.lane.b32.xlu0 %v2827_v40, %s2636_s25 }
 0x2a6   :  { %2377 = vrot.lane.b32.xlu0 %v2840_v44, %s2633_s4 }
 0x2a7   :  { %2128 = vmatpush3.bf16.xpose.msra.mxu1 %v2854_v53  ;;  %2146 = vmatpush3.bf16.xpose.msra.mxu0 %v2854_v53 }
 0x2a8   :  { %2129 = vmatprep.subr.bf16.mxu1 %v2632_v9  ;;  %2147 = vmatprep.subr.bf16.mxu0 %v2632_v9 }
 0x2af   :  { %2130 = vmatpush3.bf16.xpose.msra.mxu1 %v2854_v53  ;;  %2148 = vmatpush3.bf16.xpose.msra.mxu0 %v2854_v53 }
 0x2b0   :  { %2131 = vmatprep.subr.bf16.mxu1 %v2632_v9  ;;  %2149 = vmatprep.subr.bf16.mxu0 %v2632_v9 }
 0x2b7   :  { %2132 = vmatpush3.bf16.xpose.msra.mxu1 %v2854_v53  ;;  %2150 = vmatpush3.bf16.xpose.msra.mxu0 %v2854_v53 }
 0x2b8   :  { %2133 = vmatprep.subr.bf16.mxu1 %v2632_v9  ;;  %2151 = vmatprep.subr.bf16.mxu0 %v2632_v9 }
 0x2bf   :  { %2134 = vmatpush3.bf16.xpose.msra.mxu1 %v2854_v53  ;;  %2152 = vmatpush3.bf16.xpose.msra.mxu0 %v2854_v53 }
 0x2c0   :  { %2135 = vmatprep.subr.bf16.mxu1 %v2632_v9  ;;  %2153 = vmatprep.subr.bf16.mxu0 %v2632_v9 }
 0x2c7   :  { %2136 = vmatpush3.bf16.xpose.msra.mxu1 %v2854_v53  ;;  %2154 = vmatpush3.bf16.xpose.msra.mxu0 %v2854_v53 }
 0x2c8   :  { %2155 = vmatprep.subr.bf16.mxu0 %v2632_v9  ;;  %2161 = vmatprep.subr.bf16.mxu1 %v2632_v9 }
 0x2ce   :  { %2138 = vmatmul.mubr.msk.bf16.vlgmr.msra.gmra.mrb[8].mxu1 %vm406_vm2, %v296_v28 }
 0x2cf   :  { %2156 = vmatpush3.bf16.xpose.msra.mxu0 %v2854_v53  ;;  %2177 = vmatprep.mubr.msk.bf16.mxu1 %vm2635_vm1, %v2632_v9 }
 0x2d0   :  { %2181 = vmatprep.subr.bf16.mxu0 %v2632_v9 }
 0x2d6   :  { %2158 = vmatmul.mubr.msk.bf16.vlgmr.msra.gmra.mrb[0].mxu0 %vm406_vm2, %v297_v45 }
 0x2d7   :  { %2197 = vmatprep.mubr.msk.bf16.mxu0 %vm2635_vm1, %v2632_v9 }
 0x304   :  { %v509_v60 = vpop.permute.xlu1 %508 }
 0x305   :  { %v514_v61 = vsel %vm406_vm2, %v509_v60, 0 }
 0x306   :  { %2162 = vmatpush3.bf16.xpose.msra.mxu1 %v514_v61 }
 0x307   :  { %2163 = vmatprep.subr.bf16.mxu1 %v2632_v9 }
 0x308   :  { %v2363_v62 = vpop.permute.xlu1 %2362 }
 0x309   :  { %v2365_v63 = vunpack.i.h.bf16 %v2363_v62  ;;  %v2364_v0 = vunpack.i.l.bf16 %v2363_v62 }
 0x30b   :  { %v348_v1 = vpack.c.bf16 %v2365_v63, %v2364_v0 }
 0x30c   :  { %v2373_v13 = vpop.permute.xlu1 %2372 }
 0x30d   :  { %608 = vrot.lane.b32.xlu1 %v348_v1, %s2634_s24  ;;  %v2375_v14 = vunpack.i.h.bf16 %v2373_v13  ;;  %v2374_v15 = vunpack.i.l.bf16 %v2373_v13 }
 0x30e   :  { %2164 = vmatpush3.bf16.xpose.msra.mxu1 %v2854_v53 }
 0x30f   :  { %2165 = vmatprep.subr.bf16.mxu1 %v2632_v9  ;;  %v298_v16 = vpack.c.bf16 %v2375_v14, %v2374_v15 }
 0x310   :  { %v559_v2 = vpop.permute.xlu0 %558 }
 0x311   :  { %v564_v3 = vsel %vm406_vm2, %v559_v2, 0  ;;  %2382 = vrot.lane.b32.xlu1 %v2800_v22, %s2637_s26 }
 0x312   :  { %2182 = vmatpush3.bf16.xpose.msra.mxu0 %v564_v3 }
 0x313   :  { %2183 = vmatprep.subr.bf16.mxu0 %v2632_v9 }
 0x314   :  { %v2368_v4 = vpop.permute.xlu0 %2367 }
 0x315   :  { %v2370_v8 = vunpack.i.h.bf16 %v2368_v4  ;;  %v2369_v11 = vunpack.i.l.bf16 %v2368_v4  ;;  %2392 = vrot.lane.b32.xlu1 %v2815_v27, %s2636_s25 }
 0x316   :  { %2166 = vmatpush3.bf16.xpose.msra.mxu1 %v2854_v53 }
 0x317   :  { %v349_v12 = vpack.c.bf16 %v2370_v8, %v2369_v11  ;;  %2167 = vmatprep.subr.bf16.mxu1 %v2632_v9 }
 0x318   :  { %v2378_v17 = vpop.permute.xlu0 %2377 }
 0x319   :  { %658 = vrot.lane.b32.xlu0 %v349_v12, %s2634_s24  ;;  %v2380_v18 = vunpack.i.h.bf16 %v2378_v17  ;;  %v2379_v21 = vunpack.i.l.bf16 %v2378_v17 }
 0x31a   :  { %2184 = vmatpush3.bf16.xpose.msra.mxu0 %v2854_v53 }
 0x31b   :  { %2185 = vmatprep.subr.bf16.mxu0 %v2632_v9  ;;  %v299_v22 = vpack.c.bf16 %v2380_v18, %v2379_v21 }
 0x31d   :  { %2387 = vrot.lane.b32.xlu0 %v2827_v40, %s2637_s26 }
 0x31e   :  { %2168 = vmatpush3.bf16.xpose.msra.mxu1 %v2854_v53 }
 0x31f   :  { %2169 = vmatprep.subr.bf16.mxu1 %v2632_v9 }
 0x321   :  { %2397 = vrot.lane.b32.xlu0 %v2840_v44, %s2636_s25 }
 0x322   :  { %2186 = vmatpush3.bf16.xpose.msra.mxu0 %v2854_v53 }
 0x323   :  { %2187 = vmatprep.subr.bf16.mxu0 %v2632_v9 }
 0x326   :  { %2170 = vmatpush3.bf16.xpose.msra.mxu1 %v2854_v53 }
 0x327   :  { %2171 = vmatprep.subr.bf16.mxu1 %v2632_v9 }
 0x32a   :  { %2188 = vmatpush3.bf16.xpose.msra.mxu0 %v2854_v53 }
 0x32b   :  { %2189 = vmatprep.subr.bf16.mxu0 %v2632_v9 }
 0x32e   :  { %2172 = vmatpush3.bf16.xpose.msra.mxu1 %v2854_v53 }
 0x32f   :  { %2173 = vmatprep.subr.bf16.mxu1 %v2632_v9 }
 0x332   :  { %2190 = vmatpush3.bf16.xpose.msra.mxu0 %v2854_v53 }
 0x333   :  { %2191 = vmatprep.subr.bf16.mxu0 %v2632_v9 }
 0x336   :  { %2174 = vmatpush3.bf16.xpose.msra.mxu1 %v2854_v53 }
 0x337   :  { %2175 = vmatprep.subr.bf16.mxu1 %v2632_v9 }
 0x33a   :  { %2192 = vmatpush3.bf16.xpose.msra.mxu0 %v2854_v53 }
 0x33b   :  { %2193 = vmatprep.subr.bf16.mxu0 %v2632_v9 }
 0x33e   :  { %2176 = vmatpush3.bf16.xpose.msra.mxu1 %v2854_v53 }
 0x33f   :  { %2201 = vmatprep.subr.bf16.mxu1 %v2632_v9 }
 0x342   :  { %2194 = vmatpush3.bf16.xpose.msra.mxu0 %v2854_v53 }
 0x343   :  { %2195 = vmatprep.subr.bf16.mxu0 %v2632_v9 }
 0x345   :  { %2178 = vmatmul.mubr.msk.bf16.vlgmr.msra.gmra.mrb[12].mxu1 %vm406_vm2, %v298_v16 }
 0x346   :  { %2217 = vmatprep.mubr.msk.bf16.mxu1 %vm2635_vm1, %v2632_v9 }
 0x34a   :  { %2196 = vmatpush3.bf16.xpose.msra.mxu0 %v2854_v53 }
 0x34b   :  { %2221 = vmatprep.subr.bf16.mxu0 %v2632_v9 }
 0x351   :  { %2198 = vmatmul.mubr.msk.bf16.vlgmr.msra.gmra.mrb[4].mxu0 %vm406_vm2, %v299_v22 }
 0x352   :  { %2237 = vmatprep.mubr.msk.bf16.mxu0 %vm2635_vm1, %v2632_v9 }
 0x37f   :  { %v609_v23 = vpop.permute.xlu1 %608 }
 0x380   :  { %v614_v24 = vsel %vm406_vm2, %v609_v23, 0 }
 0x381   :  { %2202 = vmatpush3.bf16.xpose.msra.mxu1 %v614_v24 }
 0x382   :  { %2203 = vmatprep.subr.bf16.mxu1 %v2632_v9 }
 0x383   :  { %v2383_v28 = vpop.permute.xlu1 %2382 }
 0x384   :  { %v2385_v29 = vunpack.i.h.bf16 %v2383_v28  ;;  %v2384_v30 = vunpack.i.l.bf16 %v2383_v28 }
 0x386   :  { %v350_v31 = vpack.c.bf16 %v2385_v29, %v2384_v30 }
 0x387   :  { %v2393_v56 = vpop.permute.xlu1 %2392 }
 0x388   :  { %708 = vrot.lane.b32.xlu1 %v350_v31, %s2634_s24  ;;  %v2395_v57 = vunpack.i.h.bf16 %v2393_v56  ;;  %v2394_v58 = vunpack.i.l.bf16 %v2393_v56 }
 0x389   :  { %2204 = vmatpush3.bf16.xpose.msra.mxu1 %v2854_v53 }
 0x38a   :  { %2205 = vmatprep.subr.bf16.mxu1 %v2632_v9  ;;  %v300_v60 = vpack.c.bf16 %v2395_v57, %v2394_v58 }
 0x38b   :  { %v659_v33 = vpop.permute.xlu0 %658 }
 0x38c   :  { %v664_v34 = vsel %vm406_vm2, %v659_v33, 0  ;;  %2402 = vrot.lane.b32.xlu1 %v2815_v27, %s2637_s26 }
 0x38d   :  { %2222 = vmatpush3.bf16.xpose.msra.mxu0 %v664_v34 }
 0x38e   :  { %2223 = vmatprep.subr.bf16.mxu0 %v2632_v9 }
 0x38f   :  { %v2388_v35 = vpop.permute.xlu0 %2387 }
 0x390   :  { %v2390_v38 = vunpack.i.h.bf16 %v2388_v35  ;;  %v2389_v39 = vunpack.i.l.bf16 %v2388_v35 }
 0x391   :  { %2206 = vmatpush3.bf16.xpose.msra.mxu1 %v2854_v53 }
 0x392   :  { %v351_v40 = vpack.c.bf16 %v2390_v38, %v2389_v39  ;;  %2207 = vmatprep.subr.bf16.mxu1 %v2632_v9 }
 0x393   :  { %v2398_v62 = vpop.permute.xlu0 %2397 }
 0x394   :  { %758 = vrot.lane.b32.xlu0 %v351_v40, %s2634_s24  ;;  %v2400_v63 = vunpack.i.h.bf16 %v2398_v62  ;;  %v2399_v0 = vunpack.i.l.bf16 %v2398_v62 }
 0x395   :  { %2224 = vmatpush3.bf16.xpose.msra.mxu0 %v2854_v53 }
 0x396   :  { %2225 = vmatprep.subr.bf16.mxu0 %v2632_v9  ;;  %v301_v1 = vpack.c.bf16 %v2400_v63, %v2399_v0 }
 0x398   :  { %2407 = vrot.lane.b32.xlu0 %v2840_v44, %s2637_s26  ;;  %v811_v44 = vand.u32 127, %v143_v5 }
 0x399   :  { %2208 = vmatpush3.bf16.xpose.msra.mxu1 %v2854_v53 }
 0x39a   :  { %2209 = vmatprep.subr.bf16.mxu1 %v2632_v9  ;;  %vm2980_vm3 = vcmp.le.s32.totalorder %v811_v44, %v2781_v6  ;;  %vm2994_vm4 = vcmp.le.s32.totalorder %v811_v44, %v809_v52 }
 0x39d   :  { %2226 = vmatpush3.bf16.xpose.msra.mxu0 %v2854_v53 }
 0x39e   :  { %2227 = vmatprep.subr.bf16.mxu0 %v2632_v9 }
 0x3a1   :  { %v450_v27 = vpop.f32.mrb[8].mxu1  ;;  %2210 = vmatpush3.bf16.xpose.msra.mxu1 %v2854_v53 }
 0x3a2   :  { %v2139_v41 = vpop.f32.mrb[9].mxu1  ;;  %2211 = vmatprep.subr.bf16.mxu1 %v2632_v9  ;;  %v2988_v5 = vsel %vm2980_vm3, %v450_v27, -1e+30 }
 0x3a3   :  { %v453_v45 = vpop.f32.mrb[10].mxu1 }
 0x3a4   :  { %v2140_v46 = vpop.f32.mrb[11].mxu1  ;;  %v3001_v55 = vsel %vm2994_vm4, %v453_v45, -1e+30 }
 0x3a5   :  { %2228 = vmatpush3.bf16.xpose.msra.mxu0 %v2854_v53 }
 0x3a6   :  { %2229 = vmatprep.subr.bf16.mxu0 %v2632_v9 }
 0x3a9   :  { %v500_v47 = vpop.f32.mrb[0].mxu0  ;;  %2212 = vmatpush3.bf16.xpose.msra.mxu1 %v2854_v53 }
 0x3aa   :  { %v2159_v48 = vpop.f32.mrb[1].mxu0  ;;  %2213 = vmatprep.subr.bf16.mxu1 %v2632_v9  ;;  %v3008_v59 = vsel %vm2980_vm3, %v500_v47, -1e+30 }
 0x3ab   :  { %v503_v49 = vpop.f32.mrb[2].mxu0 }
 0x3ac   :  { %v2160_v50 = vpop.f32.mrb[3].mxu0  ;;  %v3015_v61 = vsel %vm2994_vm4, %v503_v49, -1e+30 }
 0x3ad   :  { %2230 = vmatpush3.bf16.xpose.msra.mxu0 %v2854_v53 }
 0x3ae   :  { %2231 = vmatprep.subr.bf16.mxu0 %v2632_v9 }
 0x3b0   :  { %834 = vmax.xlane.f32.xlu1 %v2988_v5 }
 0x3b1   :  { %2214 = vmatpush3.bf16.xpose.msra.mxu1 %v2854_v53 }
 0x3b2   :  { %2215 = vmatprep.subr.bf16.mxu1 %v2632_v9 }
 0x3b5   :  { %2232 = vmatpush3.bf16.xpose.msra.mxu0 %v2854_v53 }
 0x3b6   :  { %2233 = vmatprep.subr.bf16.mxu0 %v2632_v9 }
 0x3b7   :  { %836 = vmax.xlane.f32.xlu0 %v3001_v55 }
 0x3b9   :  { %2216 = vmatpush3.bf16.xpose.msra.mxu1 %v2854_v53 }
 0x3ba   :  { %2241 = vmatprep.subr.bf16.mxu1 %v2632_v9 }
 0x3bb   :  { %838 = vmax.xlane.f32.xlu0 %v3008_v59 }
 0x3bd   :  { %2234 = vmatpush3.bf16.xpose.msra.mxu0 %v2854_v53 }
 0x3be   :  { %2235 = vmatprep.subr.bf16.mxu0 %v2632_v9 }
 0x3bf   :  { %840 = vmax.xlane.f32.xlu0 %v3015_v61 }
 0x3c0   :  { %2218 = vmatmul.mubr.msk.bf16.vlgmr.msra.gmra.mrb[16].mxu1 %vm406_vm2, %v300_v60 }
 0x3c1   :  { %2257 = vmatprep.mubr.msk.bf16.mxu1 %vm2635_vm1, %v2632_v9 }
 0x3c5   :  { %2236 = vmatpush3.bf16.xpose.msra.mxu0 %v2854_v53 }
 0x3c6   :  { %2261 = vmatprep.subr.bf16.mxu0 %v2632_v9 }
 0x3cc   :  { %2238 = vmatmul.mubr.msk.bf16.vlgmr.msra.gmra.mrb[8].mxu0 %vm406_vm2, %v301_v1 }
 0x3cd   :  { %2277 = vmatprep.mubr.msk.bf16.mxu0 %vm2635_vm1, %v2632_v9 }
 0x3fa   :  { %v709_v2 = vpop.permute.xlu1 %708 }
 0x3fb   :  { %v714_v3 = vsel %vm406_vm2, %v709_v2, 0 }
 0x3fc   :  { %2242 = vmatpush3.bf16.xpose.msra.mxu1 %v714_v3 }
 0x3fd   :  { %2243 = vmatprep.subr.bf16.mxu1 %v2632_v9 }
 0x3fe   :  { %v2403_v28 = vpop.permute.xlu1 %2402 }
 0x3ff   :  { %v2405_v29 = vunpack.i.h.bf16 %v2403_v28  ;;  %v2404_v30 = vunpack.i.l.bf16 %v2403_v28 }
 0x401   :  { %v302_v31 = vpack.c.bf16 %v2405_v29, %v2404_v30 }
 0x404   :  { %2244 = vmatpush3.bf16.xpose.msra.mxu1 %v2854_v53 }
 0x405   :  { %2245 = vmatprep.subr.bf16.mxu1 %v2632_v9 }
 0x406   :  { %v759_v4 = vpop.permute.xlu0 %758 }
 0x407   :  { %v764_v8 = vsel %vm406_vm2, %v759_v4, 0 }
 0x408   :  { %2262 = vmatpush3.bf16.xpose.msra.mxu0 %v764_v8 }
 0x409   :  { %2263 = vmatprep.subr.bf16.mxu0 %v2632_v9 }
 0x40a   :  { %v2408_v34 = vpop.permute.xlu0 %2407 }
 0x40b   :  { %v2410_v39 = vunpack.i.h.bf16 %v2408_v34  ;;  %v2409_v40 = vunpack.i.l.bf16 %v2408_v34 }
 0x40c   :  { %2246 = vmatpush3.bf16.xpose.msra.mxu1 %v2854_v53 }
 0x40d   :  { %2247 = vmatprep.subr.bf16.mxu1 %v2632_v9  ;;  %v303_v27 = vpack.c.bf16 %v2410_v39, %v2409_v40 }
 0x410   :  { %2264 = vmatpush3.bf16.xpose.msra.mxu0 %v2854_v53 }
 0x411   :  { %2265 = vmatprep.subr.bf16.mxu0 %v2632_v9 }
 0x414   :  { %2248 = vmatpush3.bf16.xpose.msra.mxu1 %v2854_v53 }
 0x415   :  { %2249 = vmatprep.subr.bf16.mxu1 %v2632_v9 }
 0x418   :  { %v550_v11 = vpop.f32.mrb[12].mxu1  ;;  %2266 = vmatpush3.bf16.xpose.msra.mxu0 %v2854_v53 }
 0x419   :  { %v2179_v12 = vpop.f32.mrb[13].mxu1  ;;  %v3042_v13 = vsel %vm2980_vm3, %v550_v11, -1e+30  ;;  %2267 = vmatprep.subr.bf16.mxu0 %v2632_v9 }
 0x41a   :  { %842 = vmax.xlane.f32.xlu1 %v3042_v13  ;;  %v553_v14 = vpop.f32.mrb[14].mxu1 }
 0x41b   :  { %v2180_v15 = vpop.f32.mrb[15].mxu1  ;;  %v3048_v16 = vsel %vm2994_vm4, %v553_v14, -1e+30 }
 0x41c   :  { %2250 = vmatpush3.bf16.xpose.msra.mxu1 %v2854_v53  ;;  %844 = vmax.xlane.f32.xlu0 %v3048_v16 }
 0x41d   :  { %2251 = vmatprep.subr.bf16.mxu1 %v2632_v9 }
 0x420   :  { %2268 = vmatpush3.bf16.xpose.msra.mxu0 %v2854_v53 }
 0x421   :  { %2269 = vmatprep.subr.bf16.mxu0 %v2632_v9 }
 0x424   :  { %v600_v17 = vpop.f32.mrb[4].mxu0  ;;  %2252 = vmatpush3.bf16.xpose.msra.mxu1 %v2854_v53 }
 0x425   :  { %v2199_v18 = vpop.f32.mrb[5].mxu0  ;;  %v3058_v21 = vsel %vm2980_vm3, %v600_v17, -1e+30  ;;  %2253 = vmatprep.subr.bf16.mxu1 %v2632_v9 }
 0x426   :  { %846 = vmax.xlane.f32.xlu1 %v3058_v21  ;;  %v603_v22 = vpop.f32.mrb[6].mxu0 }
 0x427   :  { %v2200_v23 = vpop.f32.mrb[7].mxu0  ;;  %v3064_v24 = vsel %vm2994_vm4, %v603_v22, -1e+30 }
 0x428   :  { %848 = vmax.xlane.f32.xlu0 %v3064_v24  ;;  %2270 = vmatpush3.bf16.xpose.msra.mxu0 %v2854_v53 }
 0x429   :  { %2271 = vmatprep.subr.bf16.mxu0 %v2632_v9 }
 0x42c   :  { %2254 = vmatpush3.bf16.xpose.msra.mxu1 %v2854_v53 }
 0x42d   :  { %2255 = vmatprep.subr.bf16.mxu1 %v2632_v9 }
 0x430   :  { %2272 = vmatpush3.bf16.xpose.msra.mxu0 %v2854_v53 }
 0x431   :  { %2273 = vmatprep.subr.bf16.mxu0 %v2632_v9 }
 0x434   :  { %2256 = vmatpush3.bf16.xpose.msra.mxu1 %v2854_v53 }
 0x435   :  { %2281 = vmatprep.subr.bf16.mxu1 %v2632_v9 }
 0x438   :  { %2274 = vmatpush3.bf16.xpose.msra.mxu0 %v2854_v53 }
 0x439   :  { %2275 = vmatprep.subr.bf16.mxu0 %v2632_v9 }
 0x43b   :  { %2258 = vmatmul.mubr.msk.bf16.vlgmr.msra.gmra.mrb[20].mxu1 %vm406_vm2, %v302_v31 }
 0x43c   :  { %2282 = vmatpush3.bf16.msra.mxu1 %v392_v25  ;;  %2283 = vmatprep.mubr.msk.bf16.mxu1 %vm2635_vm1, %v2632_v9 }
 0x43d   :  { %v835_v33 = vpop.xlane.xlu1 %834  ;;  %2287 = vmatprep.subr.bf16.mxu1 %v2632_v9 }
 0x43e   :  { %v866_v35 = vsub.f32 %v2988_v5, %v835_v33 }
 0x440   :  { %v882_v38 = vmul.f32 1.442695, %v866_v35  ;;  %2276 = vmatpush3.bf16.xpose.msra.mxu0 %v2854_v53 }
 0x441   :  { %2293 = vmatprep.subr.bf16.mxu0 %v2632_v9 }
 0x442   :  { %2523 = vpow2.f32 %v882_v38 }
 0x444   :  { %v837_v52 = vpop.xlane.xlu0 %836 }
 0x445   :  { %v867_v60 = vsub.f32 %v3001_v55, %v837_v52 }
 0x447   :  { %2278 = vmatmul.mubr.msk.bf16.vlgmr.msra.gmra.mrb[12].mxu0 %vm406_vm2, %v303_v27 }
 0x448   :  { %2295 = vmatprep.mubr.msk.bf16.mxu0 %vm2635_vm1, %v2632_v9  ;;  %v839_v56 = vpop.xlane.xlu0 %838 }
 0x449   :  { %v868_v57 = vsub.f32 %v3008_v59, %v839_v56  ;;  %v884_v59 = vmul.f32 1.442695, %v867_v60 }
 0x44b   :  { %v886_v2 = vmul.f32 1.442695, %v868_v57 }
 0x44c   :  { %v3090_v19 = vpop.eup %2523  ;;  %v841_v0 = vpop.xlane.xlu0 %840 }
 0x44d   :  { %914 = vadd.xlane.f32.xlu1 %v3090_v19  ;;  %v869_v55 = vsub.f32 %v3015_v61, %v841_v0  ;;  %2525 = vpow2.f32 %v886_v2 }
 0x44e   :  { %2527 = vpow2.f32 %v884_v59 }
 0x44f   :  { %v888_v8 = vmul.f32 1.442695, %v869_v55 }
 0x451   :  { %2529 = vpow2.f32 %v888_v8 }
 0x457   :  { %v3136_v61 = vpop.eup %2525 }
 0x458   :  { %v3139_v22 = vpop.eup %2527 }
 0x45b   :  { %v3142_v51 = vpop.eup %2529 }
 0x493   :  { %v650_v20 = vpop.f32.mrb[16].mxu1 }
 0x494   :  { %v2219_v25 = vpop.f32.mrb[17].mxu1  ;;  %v3095_v53 = vsel %vm2980_vm3, %v650_v20, -1e+30 }
 0x495   :  { %v653_v41 = vpop.f32.mrb[18].mxu1  ;;  %850 = vmax.xlane.f32.xlu1 %v3095_v53 }
 0x496   :  { %v2220_v45 = vpop.f32.mrb[19].mxu1  ;;  %v3100_v46 = vsel %vm2994_vm4, %v653_v41, -1e+30 }
 0x497   :  { %852 = vmax.xlane.f32.xlu0 %v3100_v46 }
 0x49f   :  { %v700_v44 = vpop.f32.mrb[8].mxu0 }
 0x4a0   :  { %v2239_v47 = vpop.f32.mrb[9].mxu0  ;;  %v3105_v48 = vsel %vm2980_vm3, %v700_v44, -1e+30 }
 0x4a1   :  { %854 = vmax.xlane.f32.xlu1 %v3105_v48  ;;  %v703_v49 = vpop.f32.mrb[10].mxu0 }
 0x4a2   :  { %v2240_v50 = vpop.f32.mrb[11].mxu0  ;;  %v3110_v5 = vsel %vm2994_vm4, %v703_v49, -1e+30 }
 0x4a3   :  { %856 = vmax.xlane.f32.xlu0 %v3110_v5 }
 0x4a7   :  { %v843_v54 = vpop.xlane.xlu1 %842 }
 0x4a8   :  { %v870_v31 = vsub.f32 %v3042_v13, %v843_v54 }
 0x4a9   :  { %v845_v23 = vpop.xlane.xlu0 %844 }
 0x4aa   :  { %v871_v29 = vsub.f32 %v3048_v16, %v845_v23  ;;  %v890_v39 = vmul.f32 1.442695, %v870_v31 }
 0x4ac   :  { %v892_v34 = vmul.f32 1.442695, %v871_v29 }
 0x4ae   :  { %2531 = vpow2.f32 %v892_v34 }
 0x4af   :  { %2533 = vpow2.f32 %v890_v39 }
 0x4b3   :  { %v847_v28 = vpop.xlane.xlu1 %846 }
 0x4b4   :  { %v872_v40 = vsub.f32 %v3058_v21, %v847_v28 }
 0x4b5   :  { %v849_v30 = vpop.xlane.xlu0 %848 }
 0x4b6   :  { %v873_v35 = vsub.f32 %v3064_v24, %v849_v30  ;;  %v894_v45 = vmul.f32 1.442695, %v872_v40 }
 0x4b8   :  { %v896_v20 = vmul.f32 1.442695, %v873_v35  ;;  %v3161_v50 = vpop.eup %2531 }
 0x4b9   :  { %v3164_v52 = vpop.eup %2533 }
 0x4ba   :  { %2535 = vpow2.f32 %v896_v20 }
 0x4bb   :  { %2537 = vpow2.f32 %v894_v45 }
 0x4da   :  { %v915_v33 = vpop.xlane.xlu1 %914 }
 0x50e   :  { %v750_v58 = vpop.f32.mrb[20].mxu1 }
 0x50f   :  { %v2259_v62 = vpop.f32.mrb[21].mxu1  ;;  %v3117_v63 = vsel %vm2980_vm3, %v750_v58, -1e+30 }
 0x510   :  { %v753_v1 = vpop.f32.mrb[22].mxu1  ;;  %858 = vmax.xlane.f32.xlu1 %v3117_v63 }
 0x511   :  { %v2260_v3 = vpop.f32.mrb[23].mxu1  ;;  %v3122_v4 = vsel %vm2994_vm4, %v753_v1, -1e+30 }
 0x512   :  { %860 = vmax.xlane.f32.xlu0 %v3122_v4 }
 0x51a   :  { %v800_v11 = vpop.f32.mrb[12].mxu0 }
 0x51b   :  { %v2279_v12 = vpop.f32.mrb[13].mxu0  ;;  %v3128_v14 = vsel %vm2980_vm3, %v800_v11, -1e+30 }
 0x51c   :  { %862 = vmax.xlane.f32.xlu1 %v3128_v14  ;;  %v803_v15 = vpop.f32.mrb[14].mxu0 }
 0x51d   :  { %v2280_v17 = vpop.f32.mrb[15].mxu0  ;;  %v3133_v18 = vsel %vm2994_vm4, %v803_v15, -1e+30 }
 0x51e   :  { %864 = vmax.xlane.f32.xlu0 %v3133_v18 }
 0x520   :  { %918 = vadd.xlane.f32.xlu1 %v3136_v61 }
 0x522   :  { %916 = vadd.xlane.f32.xlu0 %v3139_v22  ;;  %v851_v27 = vpop.xlane.xlu1 %850 }
 0x523   :  { %v874_v16 = vsub.f32 %v3095_v53, %v851_v27  ;;  %v3167_v53 = vpop.eup %2535 }
 0x524   :  { %v853_v38 = vpop.xlane.xlu0 %852 }
 0x525   :  { %v875_v25 = vsub.f32 %v3100_v46, %v853_v38  ;;  %v898_v24 = vmul.f32 1.442695, %v874_v16 }
 0x526   :  { %920 = vadd.xlane.f32.xlu0 %v3142_v51 }
 0x527   :  { %v900_v13 = vmul.f32 1.442695, %v875_v25 }
 0x529   :  { %2539 = vpow2.f32 %v900_v13 }
 0x52a   :  { %2541 = vpow2.f32 %v898_v24 }
 0x52e   :  { %v855_v44 = vpop.xlane.xlu1 %854 }
 0x52f   :  { %v876_v49 = vsub.f32 %v3105_v48, %v855_v44 }
 0x530   :  { %v857_v41 = vpop.xlane.xlu0 %856 }
 0x531   :  { %2412 = vrot.lane.b32.xlu1 %v2808_v26, %s2633_s4  ;;  %v877_v47 = vsub.f32 %v3110_v5, %v857_v41  ;;  %v902_v46 = vmul.f32 1.442695, %v876_v49  ;;  %v3170_v5 = vpop.eup %2537 }
 0x533   :  { %v904_v21 = vmul.f32 1.442695, %v877_v47  ;;  %v3173_v48 = vpop.eup %2539 }
 0x534   :  { %v3176_v56 = vpop.eup %2541 }
 0x535   :  { %2422 = vrot.lane.b32.xlu1 %v2808_v26, %s2636_s25  ;;  %2543 = vpow2.f32 %v904_v21 }
 0x536   :  { %2545 = vpow2.f32 %v902_v46 }
 0x539   :  { %2427 = vrot.lane.b32.xlu1 %v2833_v42, %s2636_s25 }
 0x53c   :  { %2417 = vrot.lane.b32.xlu0 %v2833_v42, %s2633_s4 }
 0x53f   :  { %v3179_v57 = vpop.eup %2543 }
 0x540   :  { %v3182_v58 = vpop.eup %2545 }
 0x55b   :  { %924 = vadd.xlane.f32.xlu0 %v3161_v50 }
 0x55d   :  { %922 = vadd.xlane.f32.xlu1 %v3164_v52 }
 0x55f   :  { %928 = vadd.xlane.f32.xlu0 %v3167_v53 }
 0x561   :  { %926 = vadd.xlane.f32.xlu1 %v3170_v5 }
 0x563   :  { %932 = vadd.xlane.f32.xlu0 %v3173_v48 }
 0x565   :  { %930 = vadd.xlane.f32.xlu1 %v3176_v56 }
 0x567   :  { %936 = vadd.xlane.f32.xlu0 %v3179_v57 }
 0x569   :  { %934 = vadd.xlane.f32.xlu1 %v3182_v58 }
 0x59d   :  { %v859_v60 = vpop.xlane.xlu1 %858 }
 0x59e   :  { %v878_v62 = vsub.f32 %v3117_v63, %v859_v60 }
 0x59f   :  { %v861_v0 = vpop.xlane.xlu0 %860 }
 0x5a0   :  { %v906_v1 = vmul.f32 1.442695, %v878_v62  ;;  %v879_v2 = vsub.f32 %v3122_v4, %v861_v0 }
 0x5a2   :  { %2547 = vpow2.f32 %v906_v1  ;;  %v908_v3 = vmul.f32 1.442695, %v879_v2 }
 0x5a4   :  { %2549 = vpow2.f32 %v908_v3 }
 0x5a9   :  { %v863_v59 = vpop.xlane.xlu1 %862 }
 0x5aa   :  { %v880_v55 = vsub.f32 %v3128_v14, %v863_v59 }
 0x5ab   :  { %v865_v8 = vpop.xlane.xlu0 %864 }
 0x5ac   :  { %v3188_v11 = vpop.eup %2547  ;;  %v910_v12 = vmul.f32 1.442695, %v880_v55  ;;  %v881_v15 = vsub.f32 %v3133_v18, %v865_v8 }
 0x5ad   :  { %938 = vadd.xlane.f32.xlu1 %v3188_v11  ;;  %v919_v17 = vpop.xlane.xlu1 %918 }
 0x5ae   :  { %v3192_v63 = vpop.eup %2549  ;;  %2551 = vpow2.f32 %v910_v12  ;;  %v912_v54 = vmul.f32 1.442695, %v881_v15 }
 0x5af   :  { %2553 = vrcp.f32 %v915_v33  ;;  %940 = vadd.xlane.f32.xlu0 %v3192_v63  ;;  %v917_v4 = vpop.xlane.xlu0 %916 }
 0x5b0   :  { %2555 = vpow2.f32 %v912_v54 }
 0x5b1   :  { %2557 = vrcp.f32 %v917_v4  ;;  %v2413_v14 = vpop.permute.xlu1 %2412 }
 0x5b2   :  { %v2415_v23 = vunpack.i.h.bf16 %v2413_v14  ;;  %v2414_v28 = vunpack.i.l.bf16 %v2413_v14 }
 0x5b3   :  { %v921_v29 = vpop.xlane.xlu0 %920 }
 0x5b4   :  { %v394_v30 = vpack.c.bf16 %v2415_v23, %v2414_v28  ;;  %2559 = vrcp.f32 %v921_v29 }
 0x5b5   :  { %2561 = vrcp.f32 %v919_v17  ;;  %v2423_v32 = vpop.permute.xlu1 %2422 }
 0x5b6   :  { %2294 = vmatpush3.bf16.msra.mxu0 %v394_v30  ;;  %v2425_v21 = vunpack.i.h.bf16 %v2423_v32  ;;  %v2424_v46 = vunpack.i.l.bf16 %v2423_v32 }
 0x5b7   :  { %2305 = vmatprep.subr.bf16.mxu0 %v2632_v9  ;;  %v2418_v27 = vpop.permute.xlu0 %2417 }
 0x5b8   :  { %v3196_v18 = vpop.eup %2551  ;;  %v2420_v41 = vunpack.i.h.bf16 %v2418_v27  ;;  %v396_v3 = vpack.c.bf16 %v2425_v21, %v2424_v46 }
 0x5b9   :  { %v2554_v31 = vpop.eup %2553  ;;  %942 = vadd.xlane.f32.xlu1 %v3196_v18  ;;  %v2428_v37 = vpop.permute.xlu1 %2427 }
 0x5ba   :  { %v3199_v33 = vpop.eup %2555  ;;  %v962_v35 = vmul.f32 %v2554_v31, %v3090_v19  ;;  %v2419_v19 = vunpack.i.l.bf16 %v2418_v27  ;;  %v2430_v59 = vunpack.i.h.bf16 %v2428_v37  ;;  %v2429_v55 = vunpack.i.l.bf16 %v2428_v37 }
 0x5bb   :  { %v2558_v34 = vpop.eup %2557  ;;  %944 = vadd.xlane.f32.xlu0 %v3199_v33 }
 0x5bc   :  { %v963_v38 = vmul.f32 %v2558_v34, %v3139_v22  ;;  %v395_v16 = vpack.c.bf16 %v2420_v41, %v2419_v19  ;;  %v397_v17 = vpack.c.bf16 %v2430_v59, %v2429_v55 }
 0x5be   :  { %v978_v39 = vpack.c.bf16 %v963_v38, %v962_v35  ;;  %v2560_v40 = vpop.eup %2559 }
 0x5bf   :  { %v2562_v20 = vpop.eup %2561  ;;  %v965_v25 = vmul.f32 %v2560_v40, %v3142_v51 }
 0x5c0   :  { %2284 = vmatmul.mubr.bf16.vlgmr.msra.gmra.mrb[24].mxu1 %v978_v39  ;;  %v964_v22 = vmul.f32 %v2562_v20, %v3136_v61 }
 0x5c1   :  { %2288 = vmatpush3.bf16.msra.mxu1 %v393_v43  ;;  %2289 = vmatprep.mubr.msk.bf16.mxu1 %vm2635_vm1, %v2632_v9 }
 0x5c2   :  { %2299 = vmatprep.subr.bf16.mxu1 %v2632_v9  ;;  %v979_v45 = vpack.c.bf16 %v965_v25, %v964_v22 }
 0x5c8   :  { %2290 = vmatmul.mubr.bf16.vlgmr.msra.gmra.mrb[28].mxu1 %v979_v45 }
 0x5c9   :  { %2300 = vmatpush3.bf16.msra.mxu1 %v395_v16  ;;  %2301 = vmatprep.mubr.msk.bf16.mxu1 %vm2635_vm1, %v2632_v9 }
 0x5ca   :  { %2432 = vrot.lane.b32.xlu1 %v2808_v26, %s2637_s26  ;;  %2311 = vmatprep.subr.bf16.mxu1 %v2632_v9 }
 0x5d1   :  { %2437 = vrot.lane.b32.xlu0 %v2833_v42, %s2637_s26 }
 0x5e8   :  { %v925_v43 = vpop.xlane.xlu0 %924 }
 0x5e9   :  { %2563 = vrcp.f32 %v925_v43 }
 0x5ea   :  { %v923_v61 = vpop.xlane.xlu1 %922 }
 0x5eb   :  { %2565 = vrcp.f32 %v923_v61 }
 0x5ec   :  { %v929_v51 = vpop.xlane.xlu0 %928 }
 0x5ed   :  { %2567 = vrcp.f32 %v929_v51 }
 0x5ee   :  { %v927_v44 = vpop.xlane.xlu1 %926 }
 0x5ef   :  { %2569 = vrcp.f32 %v927_v44 }
 0x5f0   :  { %v933_v13 = vpop.xlane.xlu0 %932 }
 0x5f1   :  { %2571 = vrcp.f32 %v933_v13 }
 0x5f2   :  { %v931_v47 = vpop.xlane.xlu1 %930 }
 0x5f3   :  { %v2564_v24 = vpop.eup %2563  ;;  %2573 = vrcp.f32 %v931_v47 }
 0x5f4   :  { %v937_v26 = vpop.xlane.xlu0 %936  ;;  %v967_v62 = vmul.f32 %v2564_v24, %v3161_v50 }
 0x5f5   :  { %v2566_v49 = vpop.eup %2565  ;;  %2575 = vrcp.f32 %v937_v26 }
 0x5f6   :  { %v935_v42 = vpop.xlane.xlu1 %934  ;;  %v966_v60 = vmul.f32 %v2566_v49, %v3164_v52 }
 0x5f7   :  { %v2568_v0 = vpop.eup %2567  ;;  %2577 = vrcp.f32 %v935_v42 }
 0x5f8   :  { %v980_v1 = vpack.c.bf16 %v967_v62, %v966_v60  ;;  %v969_v12 = vmul.f32 %v2568_v0, %v3167_v53  ;;  %v2483_v0 = vld [vmem:[%s3449_s5] sm:$0xff]  }
 0x5f9   :  { %v2570_v2 = vpop.eup %2569 }
 0x5fa   :  { %2296 = vmatmul.mubr.bf16.vlgmr.msra.gmra.mrb[16].mxu0 %v980_v1  ;;  %v968_v8 = vmul.f32 %v2570_v2, %v3170_v5  ;;  %v2484_v2 = vld [vmem:[%s3449_s5 + $0x8] sm:$0xff]  }
 0x5fb   :  { %v2572_v15 = vpop.eup %2571  ;;  %2306 = vmatpush3.bf16.msra.mxu0 %v396_v3  ;;  %2307 = vmatprep.mubr.msk.bf16.mxu0 %vm2635_vm1, %v2632_v9 }
 0x5fc   :  { %v981_v52 = vpack.c.bf16 %v969_v12, %v968_v8  ;;  %2317 = vmatprep.subr.bf16.mxu0 %v2632_v9  ;;  %v971_v4 = vmul.f32 %v2572_v15, %v3173_v48 }
 0x5fd   :  { %v2574_v50 = vpop.eup %2573 }
 0x5fe   :  { %2302 = vmatmul.mubr.bf16.vlgmr.msra.gmra.mrb[32].mxu1 %v981_v52  ;;  %v970_v54 = vmul.f32 %v2574_v50, %v3176_v56 }
 0x5ff   :  { %v2576_v14 = vpop.eup %2575  ;;  %2312 = vmatpush3.bf16.msra.mxu1 %v397_v17  ;;  %2313 = vmatprep.mubr.msk.bf16.mxu1 %vm2635_vm1, %v2632_v9 }
 0x600   :  { %v982_v53 = vpack.c.bf16 %v971_v4, %v970_v54  ;;  %2323 = vmatprep.subr.bf16.mxu1 %v2632_v9  ;;  %v973_v28 = vmul.f32 %v2576_v14, %v3179_v57  ;;  %v2485_v54 = vld [vmem:[%s3449_s5 + $0x10] sm:$0xff]   ;;  %v2486_v4 = vld [vmem:[%s3449_s5 + $0x18] sm:$0xff]  }
 0x601   :  { %v2578_v5 = vpop.eup %2577 }
 0x602   :  { %2308 = vmatmul.mubr.bf16.vlgmr.msra.gmra.mrb[20].mxu0 %v982_v53  ;;  %v972_v23 = vmul.f32 %v2578_v5, %v3182_v58 }
 0x603   :  { %2319 = vmatprep.mubr.msk.bf16.mxu0 %vm2635_vm1, %v2632_v9 }
 0x604   :  { %v983_v56 = vpack.c.bf16 %v973_v28, %v972_v23 }
 0x606   :  { %2314 = vmatmul.mubr.bf16.vlgmr.msra.gmra.mrb[36].mxu1 %v983_v56 }
 0x607   :  { %2325 = vmatprep.mubr.msk.bf16.mxu1 %vm2635_vm1, %v2632_v9 }
 0x63a   :  { %v939_v29 = vpop.xlane.xlu1 %938 }
 0x63c   :  { %v941_v48 = vpop.xlane.xlu0 %940 }
 0x63d   :  { %2579 = vrcp.f32 %v941_v48 }
 0x63e   :  { %2581 = vrcp.f32 %v939_v29 }
 0x646   :  { %v943_v30 = vpop.xlane.xlu1 %942 }
 0x647   :  { %2583 = vrcp.f32 %v943_v30  ;;  %v2580_v34 = vpop.eup %2579 }
 0x648   :  { %v945_v31 = vpop.xlane.xlu0 %944  ;;  %v2582_v35 = vpop.eup %2581  ;;  %v975_v40 = vmul.f32 %v2580_v34, %v3192_v63 }
 0x649   :  { %2585 = vrcp.f32 %v945_v31  ;;  %v974_v9 = vmul.f32 %v2582_v35, %v3188_v11 }
 0x64a   :  { %v2433_v58 = vpop.permute.xlu1 %2432 }
 0x64b   :  { %v2435_v57 = vunpack.i.h.bf16 %v2433_v58  ;;  %v2434_v38 = vunpack.i.l.bf16 %v2433_v58  ;;  %v984_v19 = vpack.c.bf16 %v975_v40, %v974_v9 }
 0x64c   :  { %v2438_v39 = vpop.permute.xlu0 %2437 }
 0x64d   :  { %v398_v27 = vpack.c.bf16 %v2435_v57, %v2434_v38  ;;  %v2440_v20 = vunpack.i.h.bf16 %v2438_v39  ;;  %v2439_v25 = vunpack.i.l.bf16 %v2438_v39 }
 0x64f   :  { %v399_v41 = vpack.c.bf16 %v2440_v20, %v2439_v25  ;;  %2318 = vmatpush3.bf16.msra.mxu0 %v398_v27 }
 0x650   :  { %2329 = vmatprep.subr.bf16.mxu0 %v2483_v0 }
 0x651   :  { %v2584_v22 = vpop.eup %2583  ;;  %2324 = vmatpush3.bf16.msra.mxu1 %v399_v41 }
 0x652   :  { %2320 = vmatmul.mubr.bf16.vlgmr.msra.gmra.mrb[24].mxu0 %v984_v19  ;;  %v976_v16 = vmul.f32 %v2584_v22, %v3196_v18 }
 0x653   :  { %v2586_v45 = vpop.eup %2585  ;;  %2330 = vmatpush3.bf16.msra.mxu0 %v2483_v0 }
 0x654   :  { %v977_v32 = vmul.f32 %v2586_v45, %v3199_v33  ;;  %2331 = vmatprep.subr.bf16.mxu0 %v2484_v2 }
 0x656   :  { %v985_v37 = vpack.c.bf16 %v977_v32, %v976_v16 }
 0x657   :  { %2332 = vmatpush3.bf16.msra.mxu0 %v2484_v2 }
 0x658   :  { %2326 = vmatmul.mubr.bf16.vlgmr.msra.gmra.mrb[40].mxu1 %v985_v37  ;;  %2333 = vmatprep.subr.bf16.mxu0 %v2485_v54 }
 0x659   :  { %1650 = vmatprep.mubr.bf16.mxu1 %v2631_v36 }
 0x65b   :  { %2334 = vmatpush3.bf16.msra.mxu0 %v2485_v54 }
 0x65c   :  { %2335 = vmatprep.subr.bf16.mxu0 %v2486_v4 }
 0x65f   :  { %2336 = vmatpush3.bf16.msra.mxu0 %v2486_v4  ;;  %v2630_v4 = vld [vmem:[%s3442_s0 + $0x18] sm:$0xff] }
 0x693   :  { %v3242_v63 = vpop.f32.mrb[24].mxu1 }
 0x694   :  { %v2285_v43 = vpop.f32.mrb[25].mxu1 }
 0x695   :  { %v3244_v61 = vpop.f32.mrb[26].mxu1 }
 0x696   :  { %v2286_v11 = vpop.f32.mrb[27].mxu1 }
 0x69b   :  { %v3246_v51 = vpop.f32.mrb[28].mxu1 }
 0x69c   :  { %v2291_v44 = vpop.f32.mrb[29].mxu1 }
 0x69d   :  { %v3248_v13 = vpop.f32.mrb[30].mxu1 }
 0x69e   :  { %v2292_v47 = vpop.f32.mrb[31].mxu1 }
 0x6cd   :  { %v1102_v24 = vpop.f32.mrb[16].mxu0 }
 0x6ce   :  { %v2297_v18 = vpop.f32.mrb[17].mxu0 }
 0x6cf   :  { %v1105_v26 = vpop.f32.mrb[18].mxu0 }
 0x6d0   :  { %v2441_v33 = vpack.i.bf16 %v1105_v26, %v1102_v24  ;;  %v2298_v49 = vpop.f32.mrb[19].mxu0 }
 0x6d1   :  { %v1143_v21 = vpop.f32.mrb[32].mxu1 }
 0x6d2   :  { %v2303_v46 = vpop.f32.mrb[33].mxu1  ;;  %2442 = vrot.lane.b32.xlu1 %v2441_v33, %s2638_s27 }
 0x6d3   :  { %v1146_v42 = vpop.f32.mrb[34].mxu1 }
 0x6d4   :  { %v2446_v60 = vpack.i.bf16 %v1146_v42, %v1143_v21  ;;  %v2304_v62 = vpop.f32.mrb[35].mxu1 }
 0x6d5   :  { %v1184_v1 = vpop.f32.mrb[20].mxu0 }
 0x6d6   :  { %2447 = vrot.lane.b32.xlu0 %v2446_v60, %s2638_s27  ;;  %v2309_v3 = vpop.f32.mrb[21].mxu0 }
 0x6d7   :  { %v1187_v59 = vpop.f32.mrb[22].mxu0  ;;  %v2627_v3 = vld [vmem:[%s3442_s0] sm:$0xff] }
 0x6d8   :  { %v2451_v55 = vpack.i.bf16 %v1187_v59, %v1184_v1  ;;  %v2310_v8 = vpop.f32.mrb[23].mxu0 }
 0x6d9   :  { %v1225_v12 = vpop.f32.mrb[36].mxu1  ;;  %v2628_v8 = vld [vmem:[%s3442_s0 + $0x8] sm:$0xff] }
 0x6da   :  { %v2315_v15 = vpop.f32.mrb[37].mxu1  ;;  %2452 = vrot.lane.b32.xlu1 %v2451_v55, %s2639_s17 }
 0x6db   :  { %v1228_v52 = vpop.f32.mrb[38].mxu1 }
 0x6dc   :  { %v2456_v50 = vpack.i.bf16 %v1228_v52, %v1225_v12  ;;  %v2316_v17 = vpop.f32.mrb[39].mxu1  ;;  %v2629_v52 = vld [vmem:[%s3442_s0 + $0x10] sm:$0xff] }
 0x6de   :  { %2457 = vrot.lane.b32.xlu0 %v2456_v50, %s2639_s17 }
 0x725   :  { %v1266_v14 = vpop.f32.mrb[24].mxu0 }
 0x726   :  { %v2321_v53 = vpop.f32.mrb[25].mxu0 }
 0x727   :  { %v1269_v5 = vpop.f32.mrb[26].mxu0 }
 0x728   :  { %v2461_v23 = vpack.i.bf16 %v1269_v5, %v1266_v14  ;;  %v2322_v28 = vpop.f32.mrb[27].mxu0 }
 0x72a   :  { %2462 = vrot.lane.b32.xlu1 %v2461_v23, %s2640_s20 }
 0x72b   :  { %v1307_v56 = vpop.f32.mrb[40].mxu1 }
 0x72c   :  { %v2327_v48 = vpop.f32.mrb[41].mxu1 }
 0x72d   :  { %v1310_v29 = vpop.f32.mrb[42].mxu1 }
 0x72e   :  { %v2466_v30 = vpack.i.bf16 %v1310_v29, %v1307_v56  ;;  %v2328_v31 = vpop.f32.mrb[43].mxu1 }
 0x730   :  { %2467 = vrot.lane.b32.xlu0 %v2466_v30, %s2640_s20 }
 0x744   :  { %v2443_v34 = vpop.permute.xlu1 %2442 }
 0x745   :  { %v2445_v35 = vunpack.i.h.bf16 %v2443_v34  ;;  %v2444_v57 = vunpack.i.l.bf16 %v2443_v34 }
 0x747   :  { %v1363_v20 = vsel %vm406_vm2, %v3244_v61, %v2445_v35  ;;  %v1362_v25 = vsel %vm406_vm2, %v3242_v63, %v2444_v57 }
 0x748   :  { %v2448_v38 = vpop.permute.xlu0 %2447 }
 0x749   :  { %v2450_v16 = vunpack.i.h.bf16 %v2448_v38  ;;  %v2449_v32 = vunpack.i.l.bf16 %v2448_v38 }
 0x74b   :  { %v1365_v63 = vsel %vm406_vm2, %v3248_v13, %v2450_v16  ;;  %v1364_v24 = vsel %vm406_vm2, %v3246_v51, %v2449_v32  ;;  %v1955_v13 = vld [vmem:[%s3450_s6] ss:$0 sm:$0xff]  ;;  %v2492_v16 = vld [vmem:[%s3451_s9 + $0x14] ss:$8 sps:$4 sm:$0xff]   ;;  %v2490_v32 = vld [vmem:[%s3451_s9 + $0x10] ss:$8 sps:$4 sm:$0xff]  }
 0x74c   :  { %v2453_v58 = vpop.permute.xlu1 %2452 }
 0x74d   :  { %v2455_v39 = vunpack.i.h.bf16 %v2453_v58  ;;  %v2454_v40 = vunpack.i.l.bf16 %v2453_v58 }
 0x74f   :  { %v1368_v22 = vsel %vm1366_vm5, %v1363_v20, %v2455_v39  ;;  %v1367_v45 = vsel %vm1366_vm5, %v1362_v25, %v2454_v40 }
 0x750   :  { %v2458_v9 = vpop.permute.xlu0 %2457 }
 0x751   :  { %v2460_v11 = vunpack.i.h.bf16 %v2458_v9  ;;  %v2459_v44 = vunpack.i.l.bf16 %v2458_v9 }
 0x753   :  { %v1370_v33 = vsel %vm1366_vm5, %v1365_v63, %v2460_v11  ;;  %v1369_v49 = vsel %vm1366_vm5, %v1364_v24, %v2459_v44  ;;  %v2498_v11 = vld [vmem:[%s3451_s9 + $0x34] ss:$8 sps:$4 sm:$0xff]   ;;  %v2496_v44 = vld [vmem:[%s3451_s9 + $0x30] ss:$8 sps:$4 sm:$0xff]  }
 0x79c   :  { %v2463_v27 = vpop.permute.xlu1 %2462 }
 0x79d   :  { %v2465_v41 = vunpack.i.h.bf16 %v2463_v27  ;;  %v2464_v19 = vunpack.i.l.bf16 %v2463_v27 }
 0x79f   :  { %v1373_v37 = vsel %vm1371_vm6, %v1368_v22, %v2465_v41  ;;  %v1372_v43 = vsel %vm1371_vm6, %v1367_v45, %v2464_v19  ;;  %v2489_v22 = vld [vmem:[%s3451_s9 + $0x4] ss:$8 sps:$4 sm:$0xff]   ;;  %v2487_v45 = vld [vmem:[%s3451_s9] ss:$8 sps:$4 sm:$0xff]  }
 0x7a0   :  { %v1376_v47 = vpack.c.bf16 %v1373_v37, %v1372_v43  ;;  %1618 = vmatprep.subr.bf16.mxu1 %v2489_v22  ;;  %v2495_v37 = vld [vmem:[%s3451_s9 + $0x24] ss:$8 sps:$4 sm:$0xff]   ;;  %v2493_v43 = vld [vmem:[%s3451_s9 + $0x20] ss:$8 sps:$4 sm:$0xff]  }
 0x7a1   :  { %1619 = vmatpush1.bf16.msra.mxu1 %v2487_v45 }
 0x7a2   :  { %v2468_v61 = vpop.permute.xlu0 %2467  ;;  %2337 = vmatprep.mubr.msk.bf16.mxu0 %vm57_vm0, %v1376_v47  ;;  %1620 = vmatprep.subr.bf16.mxu1 %v2492_v16 }
 0x7a3   :  { %v2470_v18 = vunpack.i.h.bf16 %v2468_v61  ;;  %v2469_v26 = vunpack.i.l.bf16 %v2468_v61 }
 0x7a5   :  { %v1375_v21 = vsel %vm1371_vm6, %v1370_v33, %v2470_v18  ;;  %v1374_v46 = vsel %vm1371_vm6, %v1369_v49, %v2469_v26  ;;  %1621 = vmatpush1.bf16.msra.mxu1 %v2490_v32 }
 0x7a6   :  { %v1377_v42 = vpack.c.bf16 %v1375_v21, %v1374_v46  ;;  %1622 = vmatprep.subr.bf16.mxu1 %v2495_v37 }
 0x7a8   :  { %2338 = vmatmul.mubr.msk.bf16.vlgmr.msra.gmra.mrb[28].mxu0 %vm57_vm0, %v1377_v42 }
 0x7a9   :  { %1623 = vmatpush1.bf16.msra.mxu1 %v2493_v43 }
 0x7aa   :  { %1624 = vmatprep.subr.bf16.mxu1 %v2498_v11 }
 0x7ad   :  { %1625 = vmatpush1.bf16.msra.mxu1 %v2496_v44 }
 0x87b   :  { %v2339_v60 = vpop.f32.mrb[28].mxu0 }
 0x87c   :  { %v1457_v62 = vpop.f32.mrb[29].mxu0  ;;  %v1466_v2 = vadd.f32 %v2339_v60, %v1955_v13 }
 0x87d   :  { %v1458_v51 = vadd.f32 %v1955_v13, %v1457_v62  ;;  %v2340_v0 = vpop.f32.mrb[30].mxu0  ;;  %v1962_v62 = vld [vmem:[%s3452_s7] ss:$0 sm:$0xff] }
 0x87e   :  { %v1460_v1 = vpop.f32.mrb[31].mxu0  ;;  %v3298_v50 = vadd.f32 %v2629_v52, %v1466_v2  ;;  %v1469_v17 = vadd.f32 %v2340_v0, %v1955_v13 }
 0x87f   :  { %v3286_v59 = vadd.f32 %v2627_v3, %v1458_v51  ;;  %v1461_v55 = vadd.f32 %v1955_v13, %v1460_v1  ;;  %v1963_v3 = vld [vmem:[%s3453_s8] ss:$0 sm:$0xff] }
 0x880   :  { %v3305_v14 = vadd.f32 %v2630_v4, %v1469_v17  ;;  %v1484_v53 = vsel %vm57_vm0, %v3298_v50, 0.0 }
 0x881   :  { %v3291_v12 = vadd.f32 %v2628_v8, %v1461_v55  ;;  %v1478_v15 = vsel %vm57_vm0, %v3286_v59, 0.0 }
 0x882   :  { %1479 = vadd.xlane.f32.xlu1 %v1478_v15  ;;  %v1487_v5 = vsel %vm57_vm0, %v3305_v14, 0.0 }
 0x883   :  { %v1481_v54 = vsel %vm57_vm0, %v3291_v12, 0.0 }
 0x884   :  { %1482 = vadd.xlane.f32.xlu0 %v1481_v54 }
 0x888   :  { %1485 = vadd.xlane.f32.xlu0 %v1484_v53 }
 0x88c   :  { %1488 = vadd.xlane.f32.xlu0 %v1487_v5 }
 0x90f   :  { %v1480_v23 = vpop.xlane.xlu1 %1479 }
 0x910   :  { %v1490_v28 = vmul.f32 0.015625, %v1480_v23 }
 0x911   :  { %v1483_v56 = vpop.xlane.xlu0 %1482 }
 0x912   :  { %v1494_v48 = vsub.f32 %v3286_v59, %v1490_v28  ;;  %v1491_v29 = vmul.f32 0.015625, %v1483_v56 }
 0x914   :  { %v1495_v30 = vsub.f32 %v3291_v12, %v1491_v29  ;;  %v1498_v31 = vmul.f32 %v1494_v48, %v1494_v48  ;;  %v2499_v29 = vld [vmem:[%s3454_s11 + $0x40] sm:$0xff]  }
 0x915   :  { %v1486_v34 = vpop.xlane.xlu0 %1485  ;;  %2093 = vmatprep.subr.bf16.mxu0 %v2499_v29 }
 0x916   :  { %v1492_v58 = vmul.f32 0.015625, %v1486_v34  ;;  %v1502_v35 = vsel %vm57_vm0, %v1498_v31, 0.0  ;;  %v1499_v57 = vmul.f32 %v1495_v30, %v1495_v30  ;;  %v2502_v31 = vld [vmem:[%s3454_s11 + $0x8] sm:$0xff]   ;;  %v2503_v34 = vld [vmem:[%s3454_s11 + $0x50] sm:$0xff]  }
 0x917   :  { %1503 = vadd.xlane.f32.xlu1 %v1502_v35  ;;  %v2505_v35 = vld [vmem:[%s3454_s11 + $0x58] sm:$0xff]  }
 0x918   :  { %v1496_v38 = vsub.f32 %v3298_v50, %v1492_v58  ;;  %v1505_v39 = vsel %vm57_vm0, %v1499_v57, 0.0  ;;  %v2504_v58 = vld [vmem:[%s3454_s11 + $0x10] sm:$0xff]   ;;  %v2506_v57 = vld [vmem:[%s3454_s11 + $0x18] sm:$0xff]  }
 0x919   :  { %1506 = vadd.xlane.f32.xlu0 %v1505_v39  ;;  %v1489_v40 = vpop.xlane.xlu0 %1488  ;;  %v2508_v39 = vld [vmem:[%s3454_s11 + $0x20] sm:$0xff]  }
 0x91a   :  { %v1493_v27 = vmul.f32 0.015625, %v1489_v40  ;;  %v1500_v20 = vmul.f32 %v1496_v38, %v1496_v38  ;;  %v2509_v40 = vld [vmem:[%s3454_s11 + $0x68] sm:$0xff]  }
 0x91c   :  { %v1497_v25 = vsub.f32 %v3305_v14, %v1493_v27  ;;  %v1508_v9 = vsel %vm57_vm0, %v1500_v20, 0.0  ;;  %v2510_v27 = vld [vmem:[%s3454_s11 + $0x28] sm:$0xff]   ;;  %v2511_v20 = vld [vmem:[%s3454_s11 + $0x70] sm:$0xff]  }
 0x91d   :  { %1509 = vadd.xlane.f32.xlu1 %v1508_v9  ;;  %v2513_v9 = vld [vmem:[%s3454_s11 + $0x78] sm:$0xff]  }
 0x91e   :  { %v1501_v41 = vmul.f32 %v1497_v25, %v1497_v25 }
 0x920   :  { %v1511_v19 = vsel %vm57_vm0, %v1501_v41, 0.0  ;;  %v2514_v41 = vld [vmem:[%s3454_s11 + $0x38] sm:$0xff]  }
 0x921   :  { %1512 = vadd.xlane.f32.xlu0 %v1511_v19  ;;  %v1560_v19 = vld [vmem:[%s3455_s10] sm:$0x3] }
 0x922   :  { %v1565_v22 = vrot.slane %v1560_v19, %v145_v7  ;;  %v1569_v45 = vrot.slane %v1560_v19, %v149_v10 }
 0x9a4   :  { %v1504_v47 = vpop.xlane.xlu1 %1503 }
 0x9a5   :  { %v1514_v61 = vmul.f32 0.015625, %v1504_v47 }
 0x9a6   :  { %v1507_v63 = vpop.xlane.xlu0 %1506 }
 0x9a7   :  { %v1518_v24 = vadd.f32 1e-05, %v1514_v61  ;;  %v1515_v18 = vmul.f32 0.015625, %v1507_v63 }
 0x9a9   :  { %2587 = vrsqrt.f32 %v1518_v24  ;;  %v1519_v26 = vadd.f32 1e-05, %v1515_v18 }
 0x9aa   :  { %v1510_v33 = vpop.xlane.xlu1 %1509 }
 0x9ab   :  { %2589 = vrsqrt.f32 %v1519_v26  ;;  %v1516_v49 = vmul.f32 0.015625, %v1510_v33 }
 0x9ad   :  { %v1520_v21 = vadd.f32 1e-05, %v1516_v49 }
 0x9ae   :  { %v1513_v46 = vpop.xlane.xlu0 %1512 }
 0x9af   :  { %2591 = vrsqrt.f32 %v1520_v21  ;;  %v1517_v42 = vmul.f32 0.015625, %v1513_v46 }
 0x9b1   :  { %v1521_v13 = vadd.f32 1e-05, %v1517_v42 }
 0x9b3   :  { %v2588_v60 = vpop.eup %2587  ;;  %2593 = vrsqrt.f32 %v1521_v13 }
 0x9b4   :  { %v1526_v51 = vmul.f32 %v2588_v60, %v1494_v48 }
 0x9b5   :  { %v2590_v0 = vpop.eup %2589 }
 0x9b6   :  { %v1536_v1 = vmul.f32 %v1962_v62, %v1526_v51  ;;  %v1527_v2 = vmul.f32 %v2590_v0, %v1495_v30  ;;  %v2500_v30 = vld [vmem:[%s3454_s11] sm:$0xff]  }
 0x9b7   :  { %2094 = vmatpush3.bf16.msra.mxu0 %v2500_v30 }
 0x9b8   :  { %v1537_v55 = vmul.f32 %v1962_v62, %v1527_v2  ;;  %v1546_v52 = vadd.f32 %v1963_v3, %v1536_v1 }
 0x9b9   :  { %v2592_v8 = vpop.eup %2591 }
 0x9ba   :  { %v1528_v15 = vmul.f32 %v2592_v8, %v1496_v38  ;;  %v1547_v17 = vadd.f32 %v1963_v3, %v1537_v55  ;;  %v2507_v38 = vld [vmem:[%s3454_s11 + $0x60] sm:$0xff]  }
 0x9bc   :  { %v1550_v54 = vpack.c.bf16 %v1547_v17, %v1546_v52  ;;  %v1538_v5 = vmul.f32 %v1962_v62, %v1528_v15 }
 0x9bd   :  { %v2594_v4 = vpop.eup %2593 }
 0x9be   :  { %v1529_v53 = vmul.f32 %v2594_v4, %v1497_v25  ;;  %1972 = vmatmul.mubr.msk.bf16.vlgmr.msra.gmra.mrb[44].mxu1 %vm57_vm0, %v1550_v54  ;;  %v1548_v28 = vadd.f32 %v1963_v3, %v1538_v5  ;;  %v2512_v25 = vld [vmem:[%s3454_s11 + $0x30] sm:$0xff]  }
 0x9bf   :  { %1660 = vmatprep.mubr.bf16.mxu1 %v2631_v36  ;;  %v2501_v36 = vld [vmem:[%s3454_s11 + $0x48] sm:$0xff]  }
 0x9c0   :  { %v1539_v23 = vmul.f32 %v1962_v62, %v1529_v53  ;;  %2095 = vmatprep.subr.bf16.mxu0 %v2501_v36 }
 0x9c1   :  { %2096 = vmatpush3.bf16.msra.mxu0 %v2502_v31 }
 0x9c2   :  { %v1549_v56 = vadd.f32 %v1963_v3, %v1539_v23  ;;  %2097 = vmatprep.subr.bf16.mxu0 %v2503_v34 }
 0x9c4   :  { %v1551_v48 = vpack.c.bf16 %v1549_v56, %v1548_v28 }
 0x9c5   :  { %2098 = vmatpush3.bf16.msra.mxu0 %v2504_v58 }
 0x9c6   :  { %1973 = vmatmul.mubr.msk.bf16.gmra.mrb[48].mxu1 %vm57_vm0, %v1551_v48  ;;  %2099 = vmatprep.subr.bf16.mxu0 %v2505_v35 }
 0x9c9   :  { %2100 = vmatpush3.bf16.msra.mxu0 %v2506_v57 }
 0x9ca   :  { %2101 = vmatprep.subr.bf16.mxu0 %v2507_v38 }
 0x9cd   :  { %2102 = vmatpush3.bf16.msra.mxu0 %v2508_v39 }
 0x9ce   :  { %2103 = vmatprep.subr.bf16.mxu0 %v2509_v40 }
 0x9d1   :  { %2104 = vmatpush3.bf16.msra.mxu0 %v2510_v27 }
 0x9d2   :  { %2105 = vmatprep.subr.bf16.mxu0 %v2511_v20 }
 0x9d5   :  { %2106 = vmatpush3.bf16.msra.mxu0 %v2512_v25 }
 0x9d6   :  { %2107 = vmatprep.subr.bf16.mxu0 %v2513_v9 }
 0x9d9   :  { %2108 = vmatpush3.bf16.msra.mxu0 %v2514_v41 }
 0xa91   :  { %v1652_v16 = vpop.f32.mrb[44].mxu1 }
 0xa92   :  { %v3407_v32 = vadd.f32 %v1652_v16, %v1565_v22  ;;  %v1654_v37 = vpop.f32.mrb[45].mxu1 }
 0xa93   :  { %v3409_v43 = vadd.f32 %v1654_v37, %v1569_v45  ;;  %v1656_v11 = vpop.f32.mrb[46].mxu1 }
 0xa94   :  { %v1974_v44 = vmul.f32 -1.782, %v3407_v32  ;;  %v3412_v47 = vadd.f32 %v1656_v11, %v1565_v22  ;;  %v1658_v61 = vpop.f32.mrb[47].mxu1 }
 0xa95   :  { %v1975_v63 = vmul.f32 -1.782, %v3409_v43  ;;  %v1659_v24 = vadd.f32 %v1658_v61, %v1569_v45 }
 0xa96   :  { %v1687_v18 = vmul.f32 1.442695, %v1974_v44  ;;  %v1976_v7 = vmul.f32 -1.782, %v3412_v47 }
 0xa97   :  { %v1689_v6 = vmul.f32 1.442695, %v1975_v63  ;;  %v1977_v10 = vmul.f32 -1.782, %v1659_v24 }
 0xa98   :  { %2595 = vpow2.f32 %v1687_v18  ;;  %v1691_v26 = vmul.f32 1.442695, %v1976_v7 }
 0xa99   :  { %2597 = vpow2.f32 %v1689_v6  ;;  %v1693_v33 = vmul.f32 1.442695, %v1977_v10  ;;  %v1662_v49 = vpop.f32.mrb[48].mxu1 }
 0xa9a   :  { %2599 = vpow2.f32 %v1691_v26  ;;  %v1663_v21 = vadd.f32 %v1662_v49, %v1565_v22  ;;  %v1664_v46 = vpop.f32.mrb[49].mxu1 }
 0xa9b   :  { %2601 = vpow2.f32 %v1693_v33  ;;  %v1665_v42 = vadd.f32 %v1664_v46, %v1569_v45  ;;  %v1666_v13 = vpop.f32.mrb[50].mxu1 }
 0xa9c   :  { %v1978_v60 = vmul.f32 -1.782, %v1663_v21  ;;  %v1667_v62 = vadd.f32 %v1666_v13, %v1565_v22  ;;  %v1668_v51 = vpop.f32.mrb[51].mxu1 }
 0xa9d   :  { %v1979_v0 = vmul.f32 -1.782, %v1665_v42  ;;  %v1669_v1 = vadd.f32 %v1668_v51, %v1569_v45 }
 0xa9e   :  { %v1695_v2 = vmul.f32 1.442695, %v1978_v60  ;;  %v1980_v3 = vmul.f32 -1.782, %v1667_v62 }
 0xa9f   :  { %v1697_v55 = vmul.f32 1.442695, %v1979_v0  ;;  %v1981_v8 = vmul.f32 -1.782, %v1669_v1 }
 0xaa0   :  { %2603 = vpow2.f32 %v1695_v2  ;;  %v1699_v15 = vmul.f32 1.442695, %v1980_v3 }
 0xaa1   :  { %2605 = vpow2.f32 %v1697_v55  ;;  %v1701_v52 = vmul.f32 1.442695, %v1981_v8 }
 0xaa2   :  { %v2596_v17 = vpop.eup %2595  ;;  %2607 = vpow2.f32 %v1699_v15 }
 0xaa3   :  { %v2598_v54 = vpop.eup %2597  ;;  %v1703_v4 = vadd.f32 1.0, %v2596_v17  ;;  %2609 = vpow2.f32 %v1701_v52 }
 0xaa4   :  { %v2600_v53 = vpop.eup %2599  ;;  %v1704_v5 = vadd.f32 1.0, %v2598_v54 }
 0xaa5   :  { %v2602_v23 = vpop.eup %2601  ;;  %2611 = vrcp.f32 %v1703_v4  ;;  %v1705_v28 = vadd.f32 1.0, %v2600_v53 }
 0xaa6   :  { %2613 = vrcp.f32 %v1704_v5  ;;  %v1706_v56 = vadd.f32 1.0, %v2602_v23 }
 0xaa7   :  { %2615 = vrcp.f32 %v1705_v28 }
 0xaa8   :  { %2617 = vrcp.f32 %v1706_v56 }
 0xaaa   :  { %v2604_v48 = vpop.eup %2603 }
 0xaab   :  { %v2606_v29 = vpop.eup %2605  ;;  %v1707_v30 = vadd.f32 1.0, %v2604_v48 }
 0xaac   :  { %v2608_v36 = vpop.eup %2607  ;;  %v1708_v31 = vadd.f32 1.0, %v2606_v29 }
 0xaad   :  { %v2610_v34 = vpop.eup %2609  ;;  %2619 = vrcp.f32 %v1707_v30  ;;  %v1709_v58 = vadd.f32 1.0, %v2608_v36 }
 0xaae   :  { %2621 = vrcp.f32 %v1708_v31  ;;  %v1710_v35 = vadd.f32 1.0, %v2610_v34 }
 0xaaf   :  { %v2612_v57 = vpop.eup %2611  ;;  %2623 = vrcp.f32 %v1709_v58 }
 0xab0   :  { %v2614_v38 = vpop.eup %2613  ;;  %2625 = vrcp.f32 %v1710_v35  ;;  %v1727_v27 = vmul.f32 %v2612_v57, %v3407_v32 }
 0xab1   :  { %v2616_v39 = vpop.eup %2615  ;;  %v1728_v25 = vmul.f32 %v2614_v38, %v3409_v43  ;;  %v1982_v43 = vld [vmem:[%s3456_s12] ss:$0 sm:$0xff] }
 0xab2   :  { %v2618_v40 = vpop.eup %2617  ;;  %v1729_v20 = vmul.f32 %v2616_v39, %v3412_v47 }
 0xab3   :  { %v1730_v9 = vmul.f32 %v2618_v40, %v1659_v24 }
 0xab4   :  { %v1735_v41 = vpack.c.bf16 %v1729_v20, %v1727_v27 }
 0xab5   :  { %v1736_v19 = vpack.c.bf16 %v1730_v9, %v1728_v25 }
 0xab7   :  { %v2620_v22 = vpop.eup %2619  ;;  %1906 = vmatprep.mubr.bf16.mxu0 %v1736_v19 }
 0xab8   :  { %v2622_v45 = vpop.eup %2621  ;;  %1907 = vmatmul.mubr.bf16.vlgmr.msra.gmra.mrb[32].mxu0 %v1735_v41  ;;  %v1731_v11 = vmul.f32 %v2620_v22, %v1663_v21 }
 0xab9   :  { %v2624_v16 = vpop.eup %2623  ;;  %v1732_v61 = vmul.f32 %v2622_v45, %v1665_v42 }
 0xaba   :  { %v2626_v37 = vpop.eup %2625  ;;  %v1733_v44 = vmul.f32 %v2624_v16, %v1667_v62 }
 0xabb   :  { %v1734_v63 = vmul.f32 %v2626_v37, %v1669_v1 }
 0xabc   :  { %v1737_v18 = vpack.c.bf16 %v1733_v44, %v1731_v11 }
 0xabd   :  { %v1738_v7 = vpack.c.bf16 %v1734_v63, %v1732_v61 }
 0xabf   :  { %1914 = vmatprep.mubr.bf16.mxu0 %v1738_v7 }
 0xac0   :  { %1915 = vmatmul.mubr.bf16.gmra.mrb[36].mxu0 %v1737_v18 }
 0xb8b   :  { %v2109_v32 = vpop.f32.mrb[32].mxu0 }
 0xb8c   :  { %v2110_v47 = vpop.f32.mrb[33].mxu0 }
 0xb8d   :  { %v2111_v24 = vadd.f32 %v2110_v47, %v2109_v32  ;;  %v2112_v6 = vpop.f32.mrb[34].mxu0 }
 0xb8e   :  { %v2113_v10 = vpop.f32.mrb[35].mxu0 }
 0xb8f   :  { %v1909_v26 = vadd.f32 %v2111_v24, %v1982_v43  ;;  %v2114_v33 = vadd.f32 %v2113_v10, %v2112_v6 }
 0xb91   :  { %v1923_v49 = vadd.f32 %v1909_v26, %v3286_v59  ;;  %v1912_v21 = vadd.f32 %v2114_v33, %v1982_v43 }
 0xb93   :  { %1927 = vst.msk [vmem:[%s3457_s15] sm:$0xff] %vm57_vm0, %v1923_v49  ;;  %v1924_v46 = vadd.f32 %v1912_v21, %v3291_v12  ;;  %v2115_v42 = vpop.f32.mrb[36].mxu0 }
 0xb94   :  { %v2116_v13 = vpop.f32.mrb[37].mxu0 }
 0xb95   :  { %1928 = vst.msk [vmem:[%s3457_s15 + $0x8] sm:$0xff] %vm57_vm0, %v1924_v46  ;;  %v2117_v60 = vadd.f32 %v2116_v13, %v2115_v42  ;;  %v2118_v62 = vpop.f32.mrb[38].mxu0 }
 0xb96   :  { %v2119_v51 = vpop.f32.mrb[39].mxu0 }
 0xb97   :  { %v1917_v0 = vadd.f32 %v2117_v60, %v1982_v43  ;;  %v2120_v59 = vadd.f32 %v2119_v51, %v2118_v62 }
 0xb99   :  { %v1925_v1 = vadd.f32 %v1917_v0, %v3298_v50  ;;  %v1920_v2 = vadd.f32 %v2120_v59, %v1982_v43 }
 0xb9b   :  { %1929 = vst.msk [vmem:[%s3457_s15 + $0x10] sm:$0xff] %vm57_vm0, %v1925_v1  ;;  %v1926_v12 = vadd.f32 %v1920_v2, %v3305_v14 }
 0xb9d   :  { %1930 = vst.msk [vmem:[%s3457_s15 + $0x18] sm:$0xff] %vm57_vm0, %v1926_v12 }

// kernel: clip_forward.5
= control target key start
LH: loop header
LB: loop body
LE: loop exit
PB: predicated region body
PF: predicated region fallthrough
CT: control target
= control target key end

     0   :  { %vm58_vm0 = vcmask 523264   ;;  %s3583_s0 = inlined_call_operand.vmem [shape: f32[2,16,64], index: 0, kind: input, shape index: {}]   ;;  %s3584_s1 = inlined_call_operand.vmem [shape: f32[1,64], index: 1, kind: input, shape index: {}]   ;;  %s3585_s2 = inlined_call_operand.vmem [shape: f32[1,64], index: 2, kind: input, shape index: {}]   ;;  %s3586_s3 = inlined_call_operand.vmem [shape: bf16[64,192], index: 3, kind: input, shape index: {}]   ;;  %s3587_s4 = inlined_call_operand.vmem [shape: f32[1,192], index: 4, kind: input, shape index: {}]   ;;  %s3588_s5 = inlined_call_operand.vmem [shape: bf16[64,64], index: 5, kind: input, shape index: {}]   ;;  %s3589_s6 = inlined_call_operand.vmem [shape: f32[1,64], index: 6, kind: input, shape index: {}]   ;;  %s3590_s7 = inlined_call_operand.vmem [shape: f32[1,64], index: 7, kind: input, shape index: {}]   ;;  %s3591_s8 = inlined_call_operand.vmem [shape: f32[1,64], index: 8, kind: input, shape index: {}]   ;;  %s3592_s9 = inlined_call_operand.vmem [shape: bf16[64,256], index: 9, kind: input, shape index: {}]   ;;  %s3593_s10 = inlined_call_operand.vmem [shape: f32[1,256], index: 10, kind: input, shape index: {}]   ;;  %s3594_s11 = inlined_call_operand.vmem [shape: bf16[256,64], index: 11, kind: input, shape index: {}]   ;;  %s3595_s12 = inlined_call_operand.vmem [shape: f32[1,64], index: 12, kind: input, shape index: {}]   ;;  %s3596_s13 = inlined_call_operand.vmem [shape: f32[1,64], index: 13, kind: input, shape index: {}]   ;;  %s3597_s14 = inlined_call_operand.vmem [shape: f32[1,64], index: 14, kind: input, shape index: {}]   ;;  %s3598_s15 = inlined_call_operand.hbm [shape: f32[2,16,64], index: 15, kind: output, shape index: {}]  }
   0x1   :  { %v52_v0 = vld [vmem:[%s3583_s0] sm:$0xff]  ;;  %v54_v1 = vld [vmem:[%s3583_s0 + $0x10] sm:$0xff]  ;;  %v53_v2 = vld [vmem:[%s3583_s0 + $0x8] sm:$0xff] }
   0x2   :  { %v59_v3 = vsel %vm58_vm0, %v52_v0, 0.0  ;;  %v65_v4 = vsel %vm58_vm0, %v54_v1, 0.0  ;;  %v55_v5 = vld [vmem:[%s3583_s0 + $0x18] sm:$0xff]  ;;  %v62_v6 = vsel %vm58_vm0, %v53_v2, 0.0 }
   0x3   :  { %60 = vadd.xlane.f32.xlu0 %v59_v3  ;;  %66 = vadd.xlane.f32.xlu1 %v65_v4  ;;  %v68_v7 = vsel %vm58_vm0, %v55_v5, 0.0 }
   0x7   :  { %63 = vadd.xlane.f32.xlu0 %v62_v6  ;;  %69 = vadd.xlane.f32.xlu1 %v68_v7 }
   0x8   :  { %20 = vsyncpa [#allocation3], 0  ;;  %v2563_v28 = vld [vmem:[%s3586_s3 + $0x4] ss:$8 sps:$4 sm:$0xff]   ;;  %v2565_v29 = vld [vmem:[%s3586_s3] ss:$8 sps:$4 sm:$0xff]  }
   0x9   :  { %200 = vmatprep.subr.bf16.mxu1 %v2563_v28  ;;  %v2566_v30 = vld [vmem:[%s3586_s3 + $0x14] ss:$8 sps:$4 sm:$0xff]   ;;  %v2568_v31 = vld [vmem:[%s3586_s3 + $0x10] ss:$8 sps:$4 sm:$0xff]   ;;  %v2569_v32 = vld [vmem:[%s3586_s3 + $0x24] ss:$8 sps:$4 sm:$0xff]  }
   0xa   :  { %201 = vmatpush1.bf16.msra.mxu1 %v2565_v29  ;;  %v2571_v33 = vld [vmem:[%s3586_s3 + $0x20] ss:$8 sps:$4 sm:$0xff]   ;;  %v2572_v34 = vld [vmem:[%s3586_s3 + $0x34] ss:$8 sps:$4 sm:$0xff]   ;;  %v2574_v35 = vld [vmem:[%s3586_s3 + $0x30] ss:$8 sps:$4 sm:$0xff]  }
   0xb   :  { %202 = vmatprep.subr.bf16.mxu1 %v2566_v30  ;;  %v2755_v36 = vmov 0   ;;  %v2022_v51 = vld [vmem:[%s3584_s1] ss:$0 sm:$0xff]  ;;  %s2758_s30 = smov 64   ;;  %vm2759_vm1 = vmmov 0   ;;  %vm407_vm2 = vcmask 130048  }
   0xc   :  { %232 = vmatprep.mubr.bf16.mxu1 %v2755_v36  ;;  %v2023_v56 = vld [vmem:[%s3585_s2] ss:$0 sm:$0xff]  ;;  %s2760_s16 = smov 96   ;;  %s2761_s17 = smov 80   ;;  %vm1367_vm5 = vcmask 261120   ;;  %vm1372_vm6 = vcmask 392192  }
   0xd   :  { %s2762_s18 = smov 16   ;;  %s2763_s23 = smov 32  }
   0xe   :  { %203 = vmatpush1.bf16.msra.mxu1 %v2568_v31  ;;  %s2764_s27 = smov 48  }
   0xf   :  { %204 = vmatprep.subr.bf16.mxu1 %v2569_v32 }
  0x12   :  { %205 = vmatpush1.bf16.msra.mxu1 %v2571_v33 }
  0x13   :  { %206 = vmatprep.subr.bf16.mxu1 %v2572_v34 }
  0x16   :  { %207 = vmatpush1.bf16.msra.mxu1 %v2574_v35 }
  0x90   :  { %v61_v8 = vpop.xlane.xlu0 %60  ;;  %v67_v9 = vpop.xlane.xlu1 %66 }
  0x91   :  { %v72_v10 = vmul.f32 0.015625, %v61_v8  ;;  %v74_v11 = vmul.f32 0.015625, %v67_v9  ;;  %v142_v8 = vld [vmem:[%s3587_s4] sm:$0x3]  ;;  %v2756_v9 = vmov 0.0   ;;  %s2757_s4 = smov 112  }
  0x92   :  { %2210 = vmatprep.subr.bf16.mxu1 %v2756_v9  ;;  %2230 = vmatprep.subr.bf16.mxu0 %v2756_v9 }
  0x93   :  { %v76_v12 = vsub.f32 %v52_v0, %v72_v10  ;;  %v2864_v13 = vsub.f32 %v54_v1, %v74_v11  ;;  %2246 = vmatprep.mubr.msk.bf16.mxu0 %vm2759_vm1, %v2756_v9 }
  0x94   :  { %v64_v14 = vpop.xlane.xlu0 %63  ;;  %v70_v15 = vpop.xlane.xlu1 %69 }
  0x95   :  { %v73_v16 = vmul.f32 0.015625, %v64_v14  ;;  %v75_v17 = vmul.f32 0.015625, %v70_v15  ;;  %v80_v18 = vmul.f32 %v76_v12, %v76_v12  ;;  %v82_v19 = vmul.f32 %v2864_v13, %v2864_v13 }
  0x97   :  { %v77_v20 = vsub.f32 %v53_v2, %v73_v16  ;;  %v79_v21 = vsub.f32 %v55_v5, %v75_v17  ;;  %v84_v22 = vsel %vm58_vm0, %v80_v18, 0.0  ;;  %v90_v23 = vsel %vm58_vm0, %v82_v19, 0.0 }
  0x98   :  { %85 = vadd.xlane.f32.xlu0 %v84_v22  ;;  %v144_v5 = vlaneseq }
  0x99   :  { %v81_v24 = vmul.f32 %v77_v20, %v77_v20  ;;  %v83_v25 = vmul.f32 %v79_v21, %v79_v21 }
  0x9a   :  { %v2908_v6 = vshrl.u32 %v144_v5, 7 }
  0x9b   :  { %v87_v26 = vsel %vm58_vm0, %v81_v24, 0.0  ;;  %v93_v27 = vsel %vm58_vm0, %v83_v25, 0.0 }
  0x9c   :  { %91 = vadd.xlane.f32.xlu0 %v90_v23  ;;  %88 = vadd.xlane.f32.xlu1 %v87_v26  ;;  %v146_v7 = vsub.s32 0, %v2908_v6  ;;  %v150_v10 = vsub.s32 1, %v2908_v6 }
  0x9e   :  { %v147_v11 = vrot.slane %v142_v8, %v146_v7 }
  0xa0   :  { %94 = vadd.xlane.f32.xlu1 %v93_v27 }
 0x125   :  { %v86_v37 = vpop.xlane.xlu0 %85 }
 0x126   :  { %v96_v38 = vmul.f32 0.015625, %v86_v37 }
 0x128   :  { %v100_v39 = vadd.f32 1e-05, %v96_v38 }
 0x129   :  { %v89_v40 = vpop.xlane.xlu1 %88  ;;  %v92_v41 = vpop.xlane.xlu0 %91 }
 0x12a   :  { %2607 = vrsqrt.f32 %v100_v39  ;;  %v97_v42 = vmul.f32 0.015625, %v89_v40  ;;  %v98_v43 = vmul.f32 0.015625, %v92_v41 }
 0x12c   :  { %v101_v44 = vadd.f32 1e-05, %v97_v42  ;;  %v102_v45 = vadd.f32 1e-05, %v98_v43 }
 0x12d   :  { %v95_v46 = vpop.xlane.xlu1 %94 }
 0x12e   :  { %2609 = vrsqrt.f32 %v101_v44  ;;  %v99_v47 = vmul.f32 0.015625, %v95_v46 }
 0x12f   :  { %2611 = vrsqrt.f32 %v102_v45 }
 0x130   :  { %v103_v48 = vadd.f32 1e-05, %v99_v47 }
 0x132   :  { %2613 = vrsqrt.f32 %v103_v48 }
 0x134   :  { %v2608_v49 = vpop.eup %2607 }
 0x135   :  { %v108_v50 = vmul.f32 %v2608_v49, %v76_v12 }
 0x137   :  { %v118_v54 = vmul.f32 %v2022_v51, %v108_v50 }
 0x138   :  { %v2610_v52 = vpop.eup %2609 }
 0x139   :  { %v109_v53 = vmul.f32 %v2610_v52, %v77_v20  ;;  %v2612_v55 = vpop.eup %2611  ;;  %v128_v61 = vadd.f32 %v2023_v56, %v118_v54 }
 0x13a   :  { %v110_v59 = vmul.f32 %v2612_v55, %v2864_v13  ;;  %v151_v13 = vrot.slane %v142_v8, %v150_v10 }
 0x13b   :  { %v119_v57 = vmul.f32 %v2022_v51, %v109_v53 }
 0x13c   :  { %v2614_v58 = vpop.eup %2613  ;;  %v120_v1 = vmul.f32 %v2022_v51, %v110_v59 }
 0x13d   :  { %v111_v60 = vmul.f32 %v2614_v58, %v79_v21  ;;  %v129_v62 = vadd.f32 %v2023_v56, %v119_v57 }
 0x13e   :  { %v130_v3 = vadd.f32 %v2023_v56, %v120_v1 }
 0x13f   :  { %v132_v63 = vpack.c.bf16 %v129_v62, %v128_v61  ;;  %v121_v0 = vmul.f32 %v2022_v51, %v111_v60 }
 0x141   :  { %2032 = vmatmul.mubr.msk.bf16.vlgmr.msra.gmra.mrb[0].mxu1 %vm58_vm0, %v132_v63  ;;  %v131_v2 = vadd.f32 %v2023_v56, %v121_v0 }
 0x142   :  { %242 = vmatprep.mubr.bf16.mxu1 %v2755_v36 }
 0x143   :  { %v133_v4 = vpack.c.bf16 %v131_v2, %v130_v3 }
 0x149   :  { %2033 = vmatmul.mubr.msk.bf16.gmra.mrb[4].mxu1 %vm58_vm0, %v133_v4 }
 0x14a   :  { %2226 = vmatprep.mubr.msk.bf16.mxu1 %vm2759_vm1, %v2756_v9 }
 0x214   :  { %v234_v12 = vpop.f32.mrb[0].mxu1 }
 0x215   :  { %v235_v14 = vadd.f32 %v234_v12, %v147_v11  ;;  %v236_v15 = vpop.f32.mrb[1].mxu1 }
 0x216   :  { %v238_v16 = vpop.f32.mrb[2].mxu1  ;;  %v2921_v19 = vadd.f32 %v236_v15, %v151_v13 }
 0x217   :  { %v239_v17 = vadd.f32 %v238_v16, %v147_v11  ;;  %v240_v18 = vpop.f32.mrb[3].mxu1  ;;  %v2925_v21 = vmul.f32 0.25, %v235_v14 }
 0x218   :  { %v2923_v20 = vadd.f32 %v240_v18, %v151_v13 }
 0x219   :  { %v2927_v22 = vpack.i.bf16 %v239_v17, %v235_v14  ;;  %v345_v23 = vpack.c.bf16 %v239_v17, %v235_v14  ;;  %v2929_v24 = vmul.f32 0.25, %v239_v17 }
 0x21a   :  { %v393_v25 = vpack.c.bf16 %v2923_v20, %v2921_v19  ;;  %v2935_v26 = vpack.i.bf16 %v2923_v20, %v2921_v19 }
 0x21b   :  { %2444 = vrot.lane.b32.xlu1 %v2927_v22, %s2757_s4  ;;  %403 = vrot.lane.b32.xlu0 %v345_v23, %s2758_s30  ;;  %v2942_v27 = vpack.i.bf16 %v2929_v24, %v2925_v21  ;;  %v297_v28 = vpack.c.bf16 %v2929_v24, %v2925_v21 }
 0x21c   :  { %v244_v29 = vpop.f32.mrb[4].mxu1 }
 0x21d   :  { %v245_v30 = vadd.f32 %v244_v29, %v147_v11  ;;  %v246_v31 = vpop.f32.mrb[5].mxu1 }
 0x21e   :  { %v2946_v32 = vadd.f32 %v246_v31, %v151_v13  ;;  %v248_v33 = vpop.f32.mrb[6].mxu1 }
 0x21f   :  { %v249_v34 = vadd.f32 %v248_v33, %v147_v11  ;;  %v250_v35 = vpop.f32.mrb[7].mxu1  ;;  %405 = vrot.lane.b32.xlu0 %v2755_v36, %s2758_s30  ;;  %v2952_v38 = vmul.f32 0.25, %v245_v30 }
 0x220   :  { %v2950_v37 = vadd.f32 %v250_v35, %v151_v13 }
 0x221   :  { %v346_v39 = vpack.c.bf16 %v249_v34, %v245_v30  ;;  %v2954_v40 = vpack.i.bf16 %v249_v34, %v245_v30  ;;  %v2956_v41 = vmul.f32 0.25, %v249_v34 }
 0x222   :  { %v2960_v42 = vpack.i.bf16 %v2950_v37, %v2946_v32  ;;  %v394_v43 = vpack.c.bf16 %v2950_v37, %v2946_v32 }
 0x223   :  { %459 = vrot.lane.b32.xlu1 %v346_v39, %s2758_s30  ;;  %v2967_v44 = vpack.i.bf16 %v2956_v41, %v2952_v38  ;;  %v298_v45 = vpack.c.bf16 %v2956_v41, %v2952_v38 }
 0x227   :  { %2449 = vrot.lane.b32.xlu1 %v2954_v40, %s2757_s4 }
 0x28d   :  { %v2445_v46 = vpop.permute.xlu1 %2444  ;;  %v404_v47 = vpop.permute.xlu0 %403 }
 0x28e   :  { %v2447_v48 = vunpack.i.h.bf16 %v2445_v46  ;;  %v2446_v49 = vunpack.i.l.bf16 %v2445_v46  ;;  %v412_v50 = vsel %vm407_vm2, %v404_v47, 0 }
 0x28f   :  { %2211 = vmatpush3.bf16.xpose.msra.mxu1 %v412_v50 }
 0x290   :  { %v347_v51 = vpack.c.bf16 %v2447_v48, %v2446_v49  ;;  %2212 = vmatprep.subr.bf16.mxu1 %v2756_v9 }
 0x291   :  { %v406_v52 = vpop.permute.xlu0 %405 }
 0x292   :  { %509 = vrot.lane.b32.xlu1 %v347_v51, %s2758_s30  ;;  %v2981_v53 = vsel %vm407_vm2, %v406_v52, 0  ;;  %v810_v52 = vadd.s32 8, %v2908_v6 }
 0x295   :  { %v460_v54 = vpop.permute.xlu1 %459 }
 0x296   :  { %2454 = vrot.lane.b32.xlu1 %v2927_v22, %s2760_s16  ;;  %v465_v55 = vsel %vm407_vm2, %v460_v54, 0 }
 0x297   :  { %2213 = vmatpush3.bf16.xpose.msra.mxu1 %v2981_v53  ;;  %2231 = vmatpush3.bf16.xpose.msra.mxu0 %v465_v55 }
 0x298   :  { %2232 = vmatprep.subr.bf16.mxu0 %v2756_v9  ;;  %2214 = vmatprep.subr.bf16.mxu1 %v2756_v9 }
 0x299   :  { %v2450_v56 = vpop.permute.xlu1 %2449 }
 0x29a   :  { %v2452_v57 = vunpack.i.h.bf16 %v2450_v56  ;;  %v2451_v58 = vunpack.i.l.bf16 %v2450_v56  ;;  %2464 = vrot.lane.b32.xlu1 %v2942_v27, %s2757_s4 }
 0x29c   :  { %v348_v59 = vpack.c.bf16 %v2452_v57, %v2451_v58 }
 0x29e   :  { %559 = vrot.lane.b32.xlu0 %v348_v59, %s2758_s30 }
 0x29f   :  { %2215 = vmatpush3.bf16.xpose.msra.mxu1 %v2981_v53  ;;  %2233 = vmatpush3.bf16.xpose.msra.mxu0 %v2981_v53 }
 0x2a0   :  { %2216 = vmatprep.subr.bf16.mxu1 %v2756_v9  ;;  %2234 = vmatprep.subr.bf16.mxu0 %v2756_v9 }
 0x2a2   :  { %2459 = vrot.lane.b32.xlu0 %v2954_v40, %s2760_s16 }
 0x2a6   :  { %2469 = vrot.lane.b32.xlu0 %v2967_v44, %s2757_s4 }
 0x2a7   :  { %2217 = vmatpush3.bf16.xpose.msra.mxu1 %v2981_v53  ;;  %2235 = vmatpush3.bf16.xpose.msra.mxu0 %v2981_v53 }
 0x2a8   :  { %2218 = vmatprep.subr.bf16.mxu1 %v2756_v9  ;;  %2236 = vmatprep.subr.bf16.mxu0 %v2756_v9 }
 0x2af   :  { %2219 = vmatpush3.bf16.xpose.msra.mxu1 %v2981_v53  ;;  %2237 = vmatpush3.bf16.xpose.msra.mxu0 %v2981_v53 }
 0x2b0   :  { %2220 = vmatprep.subr.bf16.mxu1 %v2756_v9  ;;  %2238 = vmatprep.subr.bf16.mxu0 %v2756_v9 }
 0x2b7   :  { %2221 = vmatpush3.bf16.xpose.msra.mxu1 %v2981_v53  ;;  %2239 = vmatpush3.bf16.xpose.msra.mxu0 %v2981_v53 }
 0x2b8   :  { %2222 = vmatprep.subr.bf16.mxu1 %v2756_v9  ;;  %2240 = vmatprep.subr.bf16.mxu0 %v2756_v9 }
 0x2bf   :  { %2223 = vmatpush3.bf16.xpose.msra.mxu1 %v2981_v53  ;;  %2241 = vmatpush3.bf16.xpose.msra.mxu0 %v2981_v53 }
 0x2c0   :  { %2224 = vmatprep.subr.bf16.mxu1 %v2756_v9  ;;  %2242 = vmatprep.subr.bf16.mxu0 %v2756_v9 }
 0x2c7   :  { %2225 = vmatpush3.bf16.xpose.msra.mxu1 %v2981_v53  ;;  %2243 = vmatpush3.bf16.xpose.msra.mxu0 %v2981_v53 }
 0x2c8   :  { %2244 = vmatprep.subr.bf16.mxu0 %v2756_v9  ;;  %2250 = vmatprep.subr.bf16.mxu1 %v2756_v9 }
 0x2ce   :  { %2227 = vmatmul.mubr.msk.bf16.vlgmr.msra.gmra.mrb[8].mxu1 %vm407_vm2, %v297_v28 }
 0x2cf   :  { %2245 = vmatpush3.bf16.xpose.msra.mxu0 %v2981_v53  ;;  %2266 = vmatprep.mubr.msk.bf16.mxu1 %vm2759_vm1, %v2756_v9 }
 0x2d0   :  { %2270 = vmatprep.subr.bf16.mxu0 %v2756_v9 }
 0x2d6   :  { %2247 = vmatmul.mubr.msk.bf16.vlgmr.msra.gmra.mrb[0].mxu0 %vm407_vm2, %v298_v45 }
 0x2d7   :  { %2286 = vmatprep.mubr.msk.bf16.mxu0 %vm2759_vm1, %v2756_v9 }
 0x304   :  { %v510_v60 = vpop.permute.xlu1 %509 }
 0x305   :  { %v515_v61 = vsel %vm407_vm2, %v510_v60, 0 }
 0x306   :  { %2251 = vmatpush3.bf16.xpose.msra.mxu1 %v515_v61 }
 0x307   :  { %2252 = vmatprep.subr.bf16.mxu1 %v2756_v9 }
 0x308   :  { %v2455_v62 = vpop.permute.xlu1 %2454 }
 0x309   :  { %v2457_v63 = vunpack.i.h.bf16 %v2455_v62  ;;  %v2456_v0 = vunpack.i.l.bf16 %v2455_v62 }
 0x30b   :  { %v349_v1 = vpack.c.bf16 %v2457_v63, %v2456_v0 }
 0x30c   :  { %v2465_v13 = vpop.permute.xlu1 %2464 }
 0x30d   :  { %609 = vrot.lane.b32.xlu1 %v349_v1, %s2758_s30  ;;  %v2467_v14 = vunpack.i.h.bf16 %v2465_v13  ;;  %v2466_v15 = vunpack.i.l.bf16 %v2465_v13 }
 0x30e   :  { %2253 = vmatpush3.bf16.xpose.msra.mxu1 %v2981_v53 }
 0x30f   :  { %2254 = vmatprep.subr.bf16.mxu1 %v2756_v9  ;;  %v299_v16 = vpack.c.bf16 %v2467_v14, %v2466_v15 }
 0x310   :  { %v560_v2 = vpop.permute.xlu0 %559 }
 0x311   :  { %v565_v3 = vsel %vm407_vm2, %v560_v2, 0  ;;  %2474 = vrot.lane.b32.xlu1 %v2927_v22, %s2761_s17 }
 0x312   :  { %2271 = vmatpush3.bf16.xpose.msra.mxu0 %v565_v3 }
 0x313   :  { %2272 = vmatprep.subr.bf16.mxu0 %v2756_v9 }
 0x314   :  { %v2460_v4 = vpop.permute.xlu0 %2459 }
 0x315   :  { %v2462_v8 = vunpack.i.h.bf16 %v2460_v4  ;;  %v2461_v11 = vunpack.i.l.bf16 %v2460_v4  ;;  %2484 = vrot.lane.b32.xlu1 %v2942_v27, %s2760_s16 }
 0x316   :  { %2255 = vmatpush3.bf16.xpose.msra.mxu1 %v2981_v53 }
 0x317   :  { %v350_v12 = vpack.c.bf16 %v2462_v8, %v2461_v11  ;;  %2256 = vmatprep.subr.bf16.mxu1 %v2756_v9 }
 0x318   :  { %v2470_v17 = vpop.permute.xlu0 %2469 }
 0x319   :  { %659 = vrot.lane.b32.xlu0 %v350_v12, %s2758_s30  ;;  %v2472_v18 = vunpack.i.h.bf16 %v2470_v17  ;;  %v2471_v21 = vunpack.i.l.bf16 %v2470_v17 }
 0x31a   :  { %2273 = vmatpush3.bf16.xpose.msra.mxu0 %v2981_v53 }
 0x31b   :  { %2274 = vmatprep.subr.bf16.mxu0 %v2756_v9  ;;  %v300_v22 = vpack.c.bf16 %v2472_v18, %v2471_v21 }
 0x31d   :  { %2479 = vrot.lane.b32.xlu0 %v2954_v40, %s2761_s17 }
 0x31e   :  { %2257 = vmatpush3.bf16.xpose.msra.mxu1 %v2981_v53 }
 0x31f   :  { %2258 = vmatprep.subr.bf16.mxu1 %v2756_v9 }
 0x321   :  { %2489 = vrot.lane.b32.xlu0 %v2967_v44, %s2760_s16 }
 0x322   :  { %2275 = vmatpush3.bf16.xpose.msra.mxu0 %v2981_v53 }
 0x323   :  { %2276 = vmatprep.subr.bf16.mxu0 %v2756_v9 }
 0x326   :  { %2259 = vmatpush3.bf16.xpose.msra.mxu1 %v2981_v53 }
 0x327   :  { %2260 = vmatprep.subr.bf16.mxu1 %v2756_v9 }
 0x32a   :  { %2277 = vmatpush3.bf16.xpose.msra.mxu0 %v2981_v53 }
 0x32b   :  { %2278 = vmatprep.subr.bf16.mxu0 %v2756_v9 }
 0x32e   :  { %2261 = vmatpush3.bf16.xpose.msra.mxu1 %v2981_v53 }
 0x32f   :  { %2262 = vmatprep.subr.bf16.mxu1 %v2756_v9 }
 0x332   :  { %2279 = vmatpush3.bf16.xpose.msra.mxu0 %v2981_v53 }
 0x333   :  { %2280 = vmatprep.subr.bf16.mxu0 %v2756_v9 }
 0x336   :  { %2263 = vmatpush3.bf16.xpose.msra.mxu1 %v2981_v53 }
 0x337   :  { %2264 = vmatprep.subr.bf16.mxu1 %v2756_v9 }
 0x33a   :  { %2281 = vmatpush3.bf16.xpose.msra.mxu0 %v2981_v53 }
 0x33b   :  { %2282 = vmatprep.subr.bf16.mxu0 %v2756_v9 }
 0x33e   :  { %2265 = vmatpush3.bf16.xpose.msra.mxu1 %v2981_v53 }
 0x33f   :  { %2290 = vmatprep.subr.bf16.mxu1 %v2756_v9 }
 0x342   :  { %2283 = vmatpush3.bf16.xpose.msra.mxu0 %v2981_v53 }
 0x343   :  { %2284 = vmatprep.subr.bf16.mxu0 %v2756_v9 }
 0x345   :  { %2267 = vmatmul.mubr.msk.bf16.vlgmr.msra.gmra.mrb[12].mxu1 %vm407_vm2, %v299_v16 }
 0x346   :  { %2306 = vmatprep.mubr.msk.bf16.mxu1 %vm2759_vm1, %v2756_v9 }
 0x34a   :  { %2285 = vmatpush3.bf16.xpose.msra.mxu0 %v2981_v53 }
 0x34b   :  { %2310 = vmatprep.subr.bf16.mxu0 %v2756_v9 }
 0x351   :  { %2287 = vmatmul.mubr.msk.bf16.vlgmr.msra.gmra.mrb[4].mxu0 %vm407_vm2, %v300_v22 }
 0x352   :  { %2326 = vmatprep.mubr.msk.bf16.mxu0 %vm2759_vm1, %v2756_v9 }
 0x37f   :  { %v610_v23 = vpop.permute.xlu1 %609 }
 0x380   :  { %v615_v24 = vsel %vm407_vm2, %v610_v23, 0 }
 0x381   :  { %2291 = vmatpush3.bf16.xpose.msra.mxu1 %v615_v24 }
 0x382   :  { %2292 = vmatprep.subr.bf16.mxu1 %v2756_v9 }
 0x383   :  { %v2475_v28 = vpop.permute.xlu1 %2474 }
 0x384   :  { %v2477_v29 = vunpack.i.h.bf16 %v2475_v28  ;;  %v2476_v30 = vunpack.i.l.bf16 %v2475_v28 }
 0x386   :  { %v351_v31 = vpack.c.bf16 %v2477_v29, %v2476_v30 }
 0x387   :  { %v2485_v56 = vpop.permute.xlu1 %2484 }
 0x388   :  { %709 = vrot.lane.b32.xlu1 %v351_v31, %s2758_s30  ;;  %v2487_v57 = vunpack.i.h.bf16 %v2485_v56  ;;  %v2486_v58 = vunpack.i.l.bf16 %v2485_v56 }
 0x389   :  { %2293 = vmatpush3.bf16.xpose.msra.mxu1 %v2981_v53 }
 0x38a   :  { %2294 = vmatprep.subr.bf16.mxu1 %v2756_v9  ;;  %v301_v60 = vpack.c.bf16 %v2487_v57, %v2486_v58 }
 0x38b   :  { %v660_v33 = vpop.permute.xlu0 %659 }
 0x38c   :  { %v665_v34 = vsel %vm407_vm2, %v660_v33, 0  ;;  %2494 = vrot.lane.b32.xlu1 %v2942_v27, %s2761_s17 }
 0x38d   :  { %2311 = vmatpush3.bf16.xpose.msra.mxu0 %v665_v34 }
 0x38e   :  { %2312 = vmatprep.subr.bf16.mxu0 %v2756_v9 }
 0x38f   :  { %v2480_v35 = vpop.permute.xlu0 %2479 }
 0x390   :  { %v2482_v38 = vunpack.i.h.bf16 %v2480_v35  ;;  %v2481_v39 = vunpack.i.l.bf16 %v2480_v35 }
 0x391   :  { %2295 = vmatpush3.bf16.xpose.msra.mxu1 %v2981_v53 }
 0x392   :  { %v352_v40 = vpack.c.bf16 %v2482_v38, %v2481_v39  ;;  %2296 = vmatprep.subr.bf16.mxu1 %v2756_v9 }
 0x393   :  { %v2490_v62 = vpop.permute.xlu0 %2489 }
 0x394   :  { %759 = vrot.lane.b32.xlu0 %v352_v40, %s2758_s30  ;;  %v2492_v63 = vunpack.i.h.bf16 %v2490_v62  ;;  %v2491_v0 = vunpack.i.l.bf16 %v2490_v62 }
 0x395   :  { %2313 = vmatpush3.bf16.xpose.msra.mxu0 %v2981_v53 }
 0x396   :  { %2314 = vmatprep.subr.bf16.mxu0 %v2756_v9  ;;  %v302_v1 = vpack.c.bf16 %v2492_v63, %v2491_v0 }
 0x398   :  { %2499 = vrot.lane.b32.xlu0 %v2967_v44, %s2761_s17  ;;  %v812_v44 = vand.u32 127, %v144_v5 }
 0x399   :  { %2297 = vmatpush3.bf16.xpose.msra.mxu1 %v2981_v53 }
 0x39a   :  { %2298 = vmatprep.subr.bf16.mxu1 %v2756_v9  ;;  %vm3107_vm3 = vcmp.le.s32.totalorder %v812_v44, %v2908_v6  ;;  %vm3121_vm4 = vcmp.le.s32.totalorder %v812_v44, %v810_v52 }
 0x39d   :  { %2315 = vmatpush3.bf16.xpose.msra.mxu0 %v2981_v53 }
 0x39e   :  { %2316 = vmatprep.subr.bf16.mxu0 %v2756_v9 }
 0x3a1   :  { %v451_v27 = vpop.f32.mrb[8].mxu1  ;;  %2299 = vmatpush3.bf16.xpose.msra.mxu1 %v2981_v53 }
 0x3a2   :  { %v2228_v41 = vpop.f32.mrb[9].mxu1  ;;  %2300 = vmatprep.subr.bf16.mxu1 %v2756_v9  ;;  %v3115_v5 = vsel %vm3107_vm3, %v451_v27, -1e+30 }
 0x3a3   :  { %v454_v45 = vpop.f32.mrb[10].mxu1 }
 0x3a4   :  { %v2229_v46 = vpop.f32.mrb[11].mxu1  ;;  %v3128_v55 = vsel %vm3121_vm4, %v454_v45, -1e+30 }
 0x3a5   :  { %2317 = vmatpush3.bf16.xpose.msra.mxu0 %v2981_v53 }
 0x3a6   :  { %2318 = vmatprep.subr.bf16.mxu0 %v2756_v9 }
 0x3a9   :  { %v501_v47 = vpop.f32.mrb[0].mxu0  ;;  %2301 = vmatpush3.bf16.xpose.msra.mxu1 %v2981_v53 }
 0x3aa   :  { %v2248_v48 = vpop.f32.mrb[1].mxu0  ;;  %2302 = vmatprep.subr.bf16.mxu1 %v2756_v9  ;;  %v3135_v59 = vsel %vm3107_vm3, %v501_v47, -1e+30 }
 0x3ab   :  { %v504_v49 = vpop.f32.mrb[2].mxu0 }
 0x3ac   :  { %v2249_v50 = vpop.f32.mrb[3].mxu0  ;;  %v3142_v61 = vsel %vm3121_vm4, %v504_v49, -1e+30 }
 0x3ad   :  { %2319 = vmatpush3.bf16.xpose.msra.mxu0 %v2981_v53 }
 0x3ae   :  { %2320 = vmatprep.subr.bf16.mxu0 %v2756_v9 }
 0x3b0   :  { %835 = vmax.xlane.f32.xlu1 %v3115_v5 }
 0x3b1   :  { %2303 = vmatpush3.bf16.xpose.msra.mxu1 %v2981_v53 }
 0x3b2   :  { %2304 = vmatprep.subr.bf16.mxu1 %v2756_v9 }
 0x3b5   :  { %2321 = vmatpush3.bf16.xpose.msra.mxu0 %v2981_v53 }
 0x3b6   :  { %2322 = vmatprep.subr.bf16.mxu0 %v2756_v9 }
 0x3b7   :  { %837 = vmax.xlane.f32.xlu0 %v3128_v55 }
 0x3b9   :  { %2305 = vmatpush3.bf16.xpose.msra.mxu1 %v2981_v53 }
 0x3ba   :  { %2330 = vmatprep.subr.bf16.mxu1 %v2756_v9 }
 0x3bb   :  { %839 = vmax.xlane.f32.xlu0 %v3135_v59 }
 0x3bd   :  { %2323 = vmatpush3.bf16.xpose.msra.mxu0 %v2981_v53 }
 0x3be   :  { %2324 = vmatprep.subr.bf16.mxu0 %v2756_v9 }
 0x3bf   :  { %841 = vmax.xlane.f32.xlu0 %v3142_v61 }
 0x3c0   :  { %2307 = vmatmul.mubr.msk.bf16.vlgmr.msra.gmra.mrb[16].mxu1 %vm407_vm2, %v301_v60 }
 0x3c1   :  { %2346 = vmatprep.mubr.msk.bf16.mxu1 %vm2759_vm1, %v2756_v9 }
 0x3c5   :  { %2325 = vmatpush3.bf16.xpose.msra.mxu0 %v2981_v53 }
 0x3c6   :  { %2350 = vmatprep.subr.bf16.mxu0 %v2756_v9 }
 0x3cc   :  { %2327 = vmatmul.mubr.msk.bf16.vlgmr.msra.gmra.mrb[8].mxu0 %vm407_vm2, %v302_v1 }
 0x3cd   :  { %2366 = vmatprep.mubr.msk.bf16.mxu0 %vm2759_vm1, %v2756_v9 }
 0x3fa   :  { %v710_v2 = vpop.permute.xlu1 %709 }
 0x3fb   :  { %v715_v3 = vsel %vm407_vm2, %v710_v2, 0 }
 0x3fc   :  { %2331 = vmatpush3.bf16.xpose.msra.mxu1 %v715_v3 }
 0x3fd   :  { %2332 = vmatprep.subr.bf16.mxu1 %v2756_v9 }
 0x3fe   :  { %v2495_v28 = vpop.permute.xlu1 %2494 }
 0x3ff   :  { %v2497_v29 = vunpack.i.h.bf16 %v2495_v28  ;;  %v2496_v30 = vunpack.i.l.bf16 %v2495_v28 }
 0x401   :  { %v303_v31 = vpack.c.bf16 %v2497_v29, %v2496_v30 }
 0x404   :  { %2333 = vmatpush3.bf16.xpose.msra.mxu1 %v2981_v53 }
 0x405   :  { %2334 = vmatprep.subr.bf16.mxu1 %v2756_v9 }
 0x406   :  { %v760_v4 = vpop.permute.xlu0 %759 }
 0x407   :  { %v765_v8 = vsel %vm407_vm2, %v760_v4, 0 }
 0x408   :  { %2351 = vmatpush3.bf16.xpose.msra.mxu0 %v765_v8 }
 0x409   :  { %2352 = vmatprep.subr.bf16.mxu0 %v2756_v9 }
 0x40a   :  { %v2500_v34 = vpop.permute.xlu0 %2499 }
 0x40b   :  { %v2502_v39 = vunpack.i.h.bf16 %v2500_v34  ;;  %v2501_v40 = vunpack.i.l.bf16 %v2500_v34 }
 0x40c   :  { %2335 = vmatpush3.bf16.xpose.msra.mxu1 %v2981_v53 }
 0x40d   :  { %2336 = vmatprep.subr.bf16.mxu1 %v2756_v9  ;;  %v304_v27 = vpack.c.bf16 %v2502_v39, %v2501_v40 }
 0x410   :  { %2353 = vmatpush3.bf16.xpose.msra.mxu0 %v2981_v53 }
 0x411   :  { %2354 = vmatprep.subr.bf16.mxu0 %v2756_v9 }
 0x414   :  { %2337 = vmatpush3.bf16.xpose.msra.mxu1 %v2981_v53 }
 0x415   :  { %2338 = vmatprep.subr.bf16.mxu1 %v2756_v9 }
 0x418   :  { %v551_v11 = vpop.f32.mrb[12].mxu1  ;;  %2355 = vmatpush3.bf16.xpose.msra.mxu0 %v2981_v53 }
 0x419   :  { %v2268_v12 = vpop.f32.mrb[13].mxu1  ;;  %v3169_v13 = vsel %vm3107_vm3, %v551_v11, -1e+30  ;;  %2356 = vmatprep.subr.bf16.mxu0 %v2756_v9 }
 0x41a   :  { %843 = vmax.xlane.f32.xlu1 %v3169_v13  ;;  %v554_v14 = vpop.f32.mrb[14].mxu1 }
 0x41b   :  { %v2269_v15 = vpop.f32.mrb[15].mxu1  ;;  %v3175_v16 = vsel %vm3121_vm4, %v554_v14, -1e+30 }
 0x41c   :  { %2339 = vmatpush3.bf16.xpose.msra.mxu1 %v2981_v53  ;;  %845 = vmax.xlane.f32.xlu0 %v3175_v16 }
 0x41d   :  { %2340 = vmatprep.subr.bf16.mxu1 %v2756_v9 }
 0x420   :  { %2357 = vmatpush3.bf16.xpose.msra.mxu0 %v2981_v53 }
 0x421   :  { %2358 = vmatprep.subr.bf16.mxu0 %v2756_v9 }
 0x424   :  { %v601_v17 = vpop.f32.mrb[4].mxu0  ;;  %2341 = vmatpush3.bf16.xpose.msra.mxu1 %v2981_v53 }
 0x425   :  { %v2288_v18 = vpop.f32.mrb[5].mxu0  ;;  %v3185_v21 = vsel %vm3107_vm3, %v601_v17, -1e+30  ;;  %2342 = vmatprep.subr.bf16.mxu1 %v2756_v9 }
 0x426   :  { %847 = vmax.xlane.f32.xlu1 %v3185_v21  ;;  %v604_v22 = vpop.f32.mrb[6].mxu0 }
 0x427   :  { %v2289_v23 = vpop.f32.mrb[7].mxu0  ;;  %v3191_v24 = vsel %vm3121_vm4, %v604_v22, -1e+30 }
 0x428   :  { %849 = vmax.xlane.f32.xlu0 %v3191_v24  ;;  %2359 = vmatpush3.bf16.xpose.msra.mxu0 %v2981_v53 }
 0x429   :  { %2360 = vmatprep.subr.bf16.mxu0 %v2756_v9 }
 0x42c   :  { %2343 = vmatpush3.bf16.xpose.msra.mxu1 %v2981_v53 }
 0x42d   :  { %2344 = vmatprep.subr.bf16.mxu1 %v2756_v9 }
 0x430   :  { %2361 = vmatpush3.bf16.xpose.msra.mxu0 %v2981_v53 }
 0x431   :  { %2362 = vmatprep.subr.bf16.mxu0 %v2756_v9 }
 0x434   :  { %2345 = vmatpush3.bf16.xpose.msra.mxu1 %v2981_v53 }
 0x435   :  { %2370 = vmatprep.subr.bf16.mxu1 %v2756_v9 }
 0x438   :  { %2363 = vmatpush3.bf16.xpose.msra.mxu0 %v2981_v53 }
 0x439   :  { %2364 = vmatprep.subr.bf16.mxu0 %v2756_v9 }
 0x43b   :  { %2347 = vmatmul.mubr.msk.bf16.vlgmr.msra.gmra.mrb[20].mxu1 %vm407_vm2, %v303_v31 }
 0x43c   :  { %2371 = vmatpush3.bf16.msra.mxu1 %v393_v25  ;;  %2372 = vmatprep.mubr.msk.bf16.mxu1 %vm2759_vm1, %v2756_v9 }
 0x43d   :  { %v836_v33 = vpop.xlane.xlu1 %835  ;;  %2376 = vmatprep.subr.bf16.mxu1 %v2756_v9 }
 0x43e   :  { %v867_v35 = vsub.f32 %v3115_v5, %v836_v33 }
 0x440   :  { %v883_v38 = vmul.f32 1.442695, %v867_v35  ;;  %2365 = vmatpush3.bf16.xpose.msra.mxu0 %v2981_v53 }
 0x441   :  { %2382 = vmatprep.subr.bf16.mxu0 %v2756_v9 }
 0x442   :  { %2615 = vpow2.f32 %v883_v38 }
 0x444   :  { %v838_v52 = vpop.xlane.xlu0 %837 }
 0x445   :  { %v868_v60 = vsub.f32 %v3128_v55, %v838_v52 }
 0x447   :  { %2367 = vmatmul.mubr.msk.bf16.vlgmr.msra.gmra.mrb[12].mxu0 %vm407_vm2, %v304_v27 }
 0x448   :  { %2384 = vmatprep.mubr.msk.bf16.mxu0 %vm2759_vm1, %v2756_v9  ;;  %v840_v56 = vpop.xlane.xlu0 %839 }
 0x449   :  { %v869_v57 = vsub.f32 %v3135_v59, %v840_v56  ;;  %v885_v59 = vmul.f32 1.442695, %v868_v60 }
 0x44b   :  { %v887_v2 = vmul.f32 1.442695, %v869_v57 }
 0x44c   :  { %v3217_v19 = vpop.eup %2615  ;;  %v842_v0 = vpop.xlane.xlu0 %841 }
 0x44d   :  { %915 = vadd.xlane.f32.xlu1 %v3217_v19  ;;  %v870_v55 = vsub.f32 %v3142_v61, %v842_v0  ;;  %2617 = vpow2.f32 %v887_v2 }
 0x44e   :  { %2619 = vpow2.f32 %v885_v59 }
 0x44f   :  { %v889_v8 = vmul.f32 1.442695, %v870_v55 }
 0x451   :  { %2621 = vpow2.f32 %v889_v8 }
 0x457   :  { %v3263_v61 = vpop.eup %2617 }
 0x458   :  { %v3266_v22 = vpop.eup %2619 }
 0x45b   :  { %v3269_v51 = vpop.eup %2621 }
 0x493   :  { %v651_v20 = vpop.f32.mrb[16].mxu1 }
 0x494   :  { %v2308_v25 = vpop.f32.mrb[17].mxu1  ;;  %v3222_v53 = vsel %vm3107_vm3, %v651_v20, -1e+30 }
 0x495   :  { %v654_v41 = vpop.f32.mrb[18].mxu1  ;;  %851 = vmax.xlane.f32.xlu1 %v3222_v53 }
 0x496   :  { %v2309_v45 = vpop.f32.mrb[19].mxu1  ;;  %v3227_v46 = vsel %vm3121_vm4, %v654_v41, -1e+30 }
 0x497   :  { %853 = vmax.xlane.f32.xlu0 %v3227_v46 }
 0x49f   :  { %v701_v44 = vpop.f32.mrb[8].mxu0 }
 0x4a0   :  { %v2328_v47 = vpop.f32.mrb[9].mxu0  ;;  %v3232_v48 = vsel %vm3107_vm3, %v701_v44, -1e+30 }
 0x4a1   :  { %855 = vmax.xlane.f32.xlu1 %v3232_v48  ;;  %v704_v49 = vpop.f32.mrb[10].mxu0 }
 0x4a2   :  { %v2329_v50 = vpop.f32.mrb[11].mxu0  ;;  %v3237_v5 = vsel %vm3121_vm4, %v704_v49, -1e+30 }
 0x4a3   :  { %857 = vmax.xlane.f32.xlu0 %v3237_v5 }
 0x4a7   :  { %v844_v54 = vpop.xlane.xlu1 %843 }
 0x4a8   :  { %v871_v31 = vsub.f32 %v3169_v13, %v844_v54 }
 0x4a9   :  { %v846_v23 = vpop.xlane.xlu0 %845 }
 0x4aa   :  { %v872_v29 = vsub.f32 %v3175_v16, %v846_v23  ;;  %v891_v39 = vmul.f32 1.442695, %v871_v31 }
 0x4ac   :  { %v893_v34 = vmul.f32 1.442695, %v872_v29 }
 0x4ae   :  { %2623 = vpow2.f32 %v893_v34 }
 0x4af   :  { %2625 = vpow2.f32 %v891_v39 }
 0x4b3   :  { %v848_v28 = vpop.xlane.xlu1 %847 }
 0x4b4   :  { %v873_v40 = vsub.f32 %v3185_v21, %v848_v28 }
 0x4b5   :  { %v850_v30 = vpop.xlane.xlu0 %849 }
 0x4b6   :  { %v874_v35 = vsub.f32 %v3191_v24, %v850_v30  ;;  %v895_v45 = vmul.f32 1.442695, %v873_v40 }
 0x4b8   :  { %v897_v20 = vmul.f32 1.442695, %v874_v35  ;;  %v3288_v50 = vpop.eup %2623 }
 0x4b9   :  { %v3291_v52 = vpop.eup %2625 }
 0x4ba   :  { %2627 = vpow2.f32 %v897_v20 }
 0x4bb   :  { %2629 = vpow2.f32 %v895_v45 }
 0x4da   :  { %v916_v33 = vpop.xlane.xlu1 %915 }
 0x50e   :  { %v751_v58 = vpop.f32.mrb[20].mxu1 }
 0x50f   :  { %v2348_v62 = vpop.f32.mrb[21].mxu1  ;;  %v3244_v63 = vsel %vm3107_vm3, %v751_v58, -1e+30 }
 0x510   :  { %v754_v1 = vpop.f32.mrb[22].mxu1  ;;  %859 = vmax.xlane.f32.xlu1 %v3244_v63 }
 0x511   :  { %v2349_v3 = vpop.f32.mrb[23].mxu1  ;;  %v3249_v4 = vsel %vm3121_vm4, %v754_v1, -1e+30 }
 0x512   :  { %861 = vmax.xlane.f32.xlu0 %v3249_v4 }
 0x51a   :  { %v801_v11 = vpop.f32.mrb[12].mxu0 }
 0x51b   :  { %v2368_v12 = vpop.f32.mrb[13].mxu0  ;;  %v3255_v14 = vsel %vm3107_vm3, %v801_v11, -1e+30 }
 0x51c   :  { %863 = vmax.xlane.f32.xlu1 %v3255_v14  ;;  %v804_v15 = vpop.f32.mrb[14].mxu0 }
 0x51d   :  { %v2369_v17 = vpop.f32.mrb[15].mxu0  ;;  %v3260_v18 = vsel %vm3121_vm4, %v804_v15, -1e+30 }
 0x51e   :  { %865 = vmax.xlane.f32.xlu0 %v3260_v18 }
 0x520   :  { %919 = vadd.xlane.f32.xlu1 %v3263_v61 }
 0x522   :  { %917 = vadd.xlane.f32.xlu0 %v3266_v22  ;;  %v852_v27 = vpop.xlane.xlu1 %851 }
 0x523   :  { %v875_v16 = vsub.f32 %v3222_v53, %v852_v27  ;;  %v3294_v53 = vpop.eup %2627 }
 0x524   :  { %v854_v38 = vpop.xlane.xlu0 %853 }
 0x525   :  { %v876_v25 = vsub.f32 %v3227_v46, %v854_v38  ;;  %v899_v24 = vmul.f32 1.442695, %v875_v16 }
 0x526   :  { %921 = vadd.xlane.f32.xlu0 %v3269_v51 }
 0x527   :  { %v901_v13 = vmul.f32 1.442695, %v876_v25 }
 0x529   :  { %2631 = vpow2.f32 %v901_v13 }
 0x52a   :  { %2633 = vpow2.f32 %v899_v24 }
 0x52e   :  { %v856_v44 = vpop.xlane.xlu1 %855 }
 0x52f   :  { %v877_v49 = vsub.f32 %v3232_v48, %v856_v44 }
 0x530   :  { %v858_v41 = vpop.xlane.xlu0 %857 }
 0x531   :  { %2504 = vrot.lane.b32.xlu1 %v2935_v26, %s2757_s4  ;;  %v878_v47 = vsub.f32 %v3237_v5, %v858_v41  ;;  %v903_v46 = vmul.f32 1.442695, %v877_v49  ;;  %v3297_v5 = vpop.eup %2629 }
 0x533   :  { %v905_v21 = vmul.f32 1.442695, %v878_v47  ;;  %v3300_v48 = vpop.eup %2631 }
 0x534   :  { %v3303_v56 = vpop.eup %2633 }
 0x535   :  { %2514 = vrot.lane.b32.xlu1 %v2935_v26, %s2760_s16  ;;  %2635 = vpow2.f32 %v905_v21 }
 0x536   :  { %2637 = vpow2.f32 %v903_v46 }
 0x539   :  { %2519 = vrot.lane.b32.xlu1 %v2960_v42, %s2760_s16 }
 0x53c   :  { %2509 = vrot.lane.b32.xlu0 %v2960_v42, %s2757_s4 }
 0x53f   :  { %v3306_v57 = vpop.eup %2635 }
 0x540   :  { %v3309_v58 = vpop.eup %2637 }
 0x55b   :  { %925 = vadd.xlane.f32.xlu0 %v3288_v50 }
 0x55d   :  { %923 = vadd.xlane.f32.xlu1 %v3291_v52 }
 0x55f   :  { %929 = vadd.xlane.f32.xlu0 %v3294_v53 }
 0x561   :  { %927 = vadd.xlane.f32.xlu1 %v3297_v5 }
 0x563   :  { %933 = vadd.xlane.f32.xlu0 %v3300_v48 }
 0x565   :  { %931 = vadd.xlane.f32.xlu1 %v3303_v56 }
 0x567   :  { %937 = vadd.xlane.f32.xlu0 %v3306_v57 }
 0x569   :  { %935 = vadd.xlane.f32.xlu1 %v3309_v58 }
 0x59d   :  { %v860_v60 = vpop.xlane.xlu1 %859 }
 0x59e   :  { %v879_v62 = vsub.f32 %v3244_v63, %v860_v60 }
 0x59f   :  { %v862_v0 = vpop.xlane.xlu0 %861 }
 0x5a0   :  { %v907_v1 = vmul.f32 1.442695, %v879_v62  ;;  %v880_v2 = vsub.f32 %v3249_v4, %v862_v0 }
 0x5a2   :  { %2639 = vpow2.f32 %v907_v1  ;;  %v909_v3 = vmul.f32 1.442695, %v880_v2 }
 0x5a4   :  { %2641 = vpow2.f32 %v909_v3 }
 0x5a9   :  { %v864_v59 = vpop.xlane.xlu1 %863 }
 0x5aa   :  { %v881_v55 = vsub.f32 %v3255_v14, %v864_v59 }
 0x5ab   :  { %v866_v8 = vpop.xlane.xlu0 %865 }
 0x5ac   :  { %v3315_v11 = vpop.eup %2639  ;;  %v911_v12 = vmul.f32 1.442695, %v881_v55  ;;  %v882_v15 = vsub.f32 %v3260_v18, %v866_v8 }
 0x5ad   :  { %939 = vadd.xlane.f32.xlu1 %v3315_v11  ;;  %v920_v17 = vpop.xlane.xlu1 %919 }
 0x5ae   :  { %v3319_v63 = vpop.eup %2641  ;;  %2643 = vpow2.f32 %v911_v12  ;;  %v913_v54 = vmul.f32 1.442695, %v882_v15 }
 0x5af   :  { %2645 = vrcp.f32 %v916_v33  ;;  %941 = vadd.xlane.f32.xlu0 %v3319_v63  ;;  %v918_v4 = vpop.xlane.xlu0 %917 }
 0x5b0   :  { %2647 = vpow2.f32 %v913_v54 }
 0x5b1   :  { %2649 = vrcp.f32 %v918_v4  ;;  %v2505_v14 = vpop.permute.xlu1 %2504 }
 0x5b2   :  { %v2507_v23 = vunpack.i.h.bf16 %v2505_v14  ;;  %v2506_v28 = vunpack.i.l.bf16 %v2505_v14 }
 0x5b3   :  { %v922_v29 = vpop.xlane.xlu0 %921 }
 0x5b4   :  { %v395_v30 = vpack.c.bf16 %v2507_v23, %v2506_v28  ;;  %2651 = vrcp.f32 %v922_v29 }
 0x5b5   :  { %2653 = vrcp.f32 %v920_v17  ;;  %v2515_v32 = vpop.permute.xlu1 %2514 }
 0x5b6   :  { %2383 = vmatpush3.bf16.msra.mxu0 %v395_v30  ;;  %v2517_v21 = vunpack.i.h.bf16 %v2515_v32  ;;  %v2516_v46 = vunpack.i.l.bf16 %v2515_v32 }
 0x5b7   :  { %2394 = vmatprep.subr.bf16.mxu0 %v2756_v9  ;;  %v2510_v27 = vpop.permute.xlu0 %2509 }
 0x5b8   :  { %v3323_v18 = vpop.eup %2643  ;;  %v2512_v41 = vunpack.i.h.bf16 %v2510_v27  ;;  %v397_v3 = vpack.c.bf16 %v2517_v21, %v2516_v46 }
 0x5b9   :  { %v2646_v31 = vpop.eup %2645  ;;  %943 = vadd.xlane.f32.xlu1 %v3323_v18  ;;  %v2520_v37 = vpop.permute.xlu1 %2519 }
 0x5ba   :  { %v3326_v33 = vpop.eup %2647  ;;  %v963_v35 = vmul.f32 %v2646_v31, %v3217_v19  ;;  %v2511_v19 = vunpack.i.l.bf16 %v2510_v27  ;;  %v2522_v59 = vunpack.i.h.bf16 %v2520_v37  ;;  %v2521_v55 = vunpack.i.l.bf16 %v2520_v37 }
 0x5bb   :  { %v2650_v34 = vpop.eup %2649  ;;  %945 = vadd.xlane.f32.xlu0 %v3326_v33 }
 0x5bc   :  { %v964_v38 = vmul.f32 %v2650_v34, %v3266_v22  ;;  %v396_v16 = vpack.c.bf16 %v2512_v41, %v2511_v19  ;;  %v398_v17 = vpack.c.bf16 %v2522_v59, %v2521_v55 }
 0x5be   :  { %v979_v39 = vpack.c.bf16 %v964_v38, %v963_v35  ;;  %v2652_v40 = vpop.eup %2651 }
 0x5bf   :  { %v2654_v20 = vpop.eup %2653  ;;  %v966_v25 = vmul.f32 %v2652_v40, %v3269_v51 }
 0x5c0   :  { %2373 = vmatmul.mubr.bf16.vlgmr.msra.gmra.mrb[24].mxu1 %v979_v39  ;;  %v965_v22 = vmul.f32 %v2654_v20, %v3263_v61 }
 0x5c1   :  { %2377 = vmatpush3.bf16.msra.mxu1 %v394_v43  ;;  %2378 = vmatprep.mubr.msk.bf16.mxu1 %vm2759_vm1, %v2756_v9 }
 0x5c2   :  { %2388 = vmatprep.subr.bf16.mxu1 %v2756_v9  ;;  %v980_v45 = vpack.c.bf16 %v966_v25, %v965_v22 }
 0x5c8   :  { %2379 = vmatmul.mubr.bf16.vlgmr.msra.gmra.mrb[28].mxu1 %v980_v45 }
 0x5c9   :  { %2389 = vmatpush3.bf16.msra.mxu1 %v396_v16  ;;  %2390 = vmatprep.mubr.msk.bf16.mxu1 %vm2759_vm1, %v2756_v9 }
 0x5ca   :  { %2524 = vrot.lane.b32.xlu1 %v2935_v26, %s2761_s17  ;;  %2400 = vmatprep.subr.bf16.mxu1 %v2756_v9 }
 0x5d1   :  { %2529 = vrot.lane.b32.xlu0 %v2960_v42, %s2761_s17 }
 0x5e8   :  { %v926_v43 = vpop.xlane.xlu0 %925 }
 0x5e9   :  { %2655 = vrcp.f32 %v926_v43 }
 0x5ea   :  { %v924_v61 = vpop.xlane.xlu1 %923 }
 0x5eb   :  { %2657 = vrcp.f32 %v924_v61 }
 0x5ec   :  { %v930_v51 = vpop.xlane.xlu0 %929 }
 0x5ed   :  { %2659 = vrcp.f32 %v930_v51 }
 0x5ee   :  { %v928_v44 = vpop.xlane.xlu1 %927 }
 0x5ef   :  { %2661 = vrcp.f32 %v928_v44 }
 0x5f0   :  { %v934_v13 = vpop.xlane.xlu0 %933 }
 0x5f1   :  { %2663 = vrcp.f32 %v934_v13 }
 0x5f2   :  { %v932_v47 = vpop.xlane.xlu1 %931 }
 0x5f3   :  { %v2656_v24 = vpop.eup %2655  ;;  %2665 = vrcp.f32 %v932_v47 }
 0x5f4   :  { %v938_v26 = vpop.xlane.xlu0 %937  ;;  %v968_v62 = vmul.f32 %v2656_v24, %v3288_v50 }
 0x5f5   :  { %v2658_v49 = vpop.eup %2657  ;;  %2667 = vrcp.f32 %v938_v26 }
 0x5f6   :  { %v936_v42 = vpop.xlane.xlu1 %935  ;;  %v967_v60 = vmul.f32 %v2658_v49, %v3291_v52 }
 0x5f7   :  { %v2660_v0 = vpop.eup %2659  ;;  %2669 = vrcp.f32 %v936_v42 }
 0x5f8   :  { %v981_v1 = vpack.c.bf16 %v968_v62, %v967_v60  ;;  %v970_v12 = vmul.f32 %v2660_v0, %v3294_v53  ;;  %v2575_v60 = vld [vmem:[%s3588_s5] sm:$0xff]   ;;  %v2576_v62 = vld [vmem:[%s3588_s5 + $0x8] sm:$0xff]  }
 0x5f9   :  { %v2662_v2 = vpop.eup %2661 }
 0x5fa   :  { %2385 = vmatmul.mubr.bf16.vlgmr.msra.gmra.mrb[16].mxu0 %v981_v1  ;;  %v969_v8 = vmul.f32 %v2662_v2, %v3297_v5 }
 0x5fb   :  { %v2664_v15 = vpop.eup %2663  ;;  %2395 = vmatpush3.bf16.msra.mxu0 %v397_v3  ;;  %2396 = vmatprep.mubr.msk.bf16.mxu0 %vm2759_vm1, %v2756_v9 }
 0x5fc   :  { %v982_v52 = vpack.c.bf16 %v970_v12, %v969_v8  ;;  %2406 = vmatprep.subr.bf16.mxu0 %v2756_v9  ;;  %v972_v4 = vmul.f32 %v2664_v15, %v3300_v48 }
 0x5fd   :  { %v2666_v50 = vpop.eup %2665 }
 0x5fe   :  { %2391 = vmatmul.mubr.bf16.vlgmr.msra.gmra.mrb[32].mxu1 %v982_v52  ;;  %v971_v54 = vmul.f32 %v2666_v50, %v3303_v56 }
 0x5ff   :  { %v2668_v14 = vpop.eup %2667  ;;  %2401 = vmatpush3.bf16.msra.mxu1 %v398_v17  ;;  %2402 = vmatprep.mubr.msk.bf16.mxu1 %vm2759_vm1, %v2756_v9 }
 0x600   :  { %v983_v53 = vpack.c.bf16 %v972_v4, %v971_v54  ;;  %2412 = vmatprep.subr.bf16.mxu1 %v2756_v9  ;;  %v974_v28 = vmul.f32 %v2668_v14, %v3306_v57  ;;  %v2577_v54 = vld [vmem:[%s3588_s5 + $0x10] sm:$0xff]   ;;  %v2578_v4 = vld [vmem:[%s3588_s5 + $0x18] sm:$0xff]  }
 0x601   :  { %v2670_v5 = vpop.eup %2669 }
 0x602   :  { %2397 = vmatmul.mubr.bf16.vlgmr.msra.gmra.mrb[20].mxu0 %v983_v53  ;;  %v973_v23 = vmul.f32 %v2670_v5, %v3309_v58 }
 0x603   :  { %2408 = vmatprep.mubr.msk.bf16.mxu0 %vm2759_vm1, %v2756_v9 }
 0x604   :  { %v984_v56 = vpack.c.bf16 %v974_v28, %v973_v23 }
 0x606   :  { %2403 = vmatmul.mubr.bf16.vlgmr.msra.gmra.mrb[36].mxu1 %v984_v56 }
 0x607   :  { %2414 = vmatprep.mubr.msk.bf16.mxu1 %vm2759_vm1, %v2756_v9 }
 0x63a   :  { %v940_v29 = vpop.xlane.xlu1 %939 }
 0x63c   :  { %v942_v48 = vpop.xlane.xlu0 %941 }
 0x63d   :  { %2671 = vrcp.f32 %v942_v48 }
 0x63e   :  { %2673 = vrcp.f32 %v940_v29 }
 0x646   :  { %v944_v30 = vpop.xlane.xlu1 %943 }
 0x647   :  { %2675 = vrcp.f32 %v944_v30  ;;  %v2672_v34 = vpop.eup %2671 }
 0x648   :  { %v946_v31 = vpop.xlane.xlu0 %945  ;;  %v2674_v35 = vpop.eup %2673  ;;  %v976_v40 = vmul.f32 %v2672_v34, %v3319_v63 }
 0x649   :  { %2677 = vrcp.f32 %v946_v31  ;;  %v975_v9 = vmul.f32 %v2674_v35, %v3315_v11 }
 0x64a   :  { %v2525_v58 = vpop.permute.xlu1 %2524 }
 0x64b   :  { %v2527_v57 = vunpack.i.h.bf16 %v2525_v58  ;;  %v2526_v38 = vunpack.i.l.bf16 %v2525_v58  ;;  %v985_v19 = vpack.c.bf16 %v976_v40, %v975_v9 }
 0x64c   :  { %v2530_v39 = vpop.permute.xlu0 %2529 }
 0x64d   :  { %v399_v27 = vpack.c.bf16 %v2527_v57, %v2526_v38  ;;  %v2532_v20 = vunpack.i.h.bf16 %v2530_v39  ;;  %v2531_v25 = vunpack.i.l.bf16 %v2530_v39 }
 0x64f   :  { %v400_v41 = vpack.c.bf16 %v2532_v20, %v2531_v25  ;;  %2407 = vmatpush3.bf16.msra.mxu0 %v399_v27 }
 0x650   :  { %2418 = vmatprep.subr.bf16.mxu0 %v2575_v60 }
 0x651   :  { %v2676_v22 = vpop.eup %2675  ;;  %2413 = vmatpush3.bf16.msra.mxu1 %v400_v41 }
 0x652   :  { %2409 = vmatmul.mubr.bf16.vlgmr.msra.gmra.mrb[24].mxu0 %v985_v19  ;;  %v977_v16 = vmul.f32 %v2676_v22, %v3323_v18 }
 0x653   :  { %v2678_v45 = vpop.eup %2677  ;;  %2419 = vmatpush3.bf16.msra.mxu0 %v2575_v60 }
 0x654   :  { %v978_v32 = vmul.f32 %v2678_v45, %v3326_v33  ;;  %2420 = vmatprep.subr.bf16.mxu0 %v2576_v62 }
 0x656   :  { %v986_v37 = vpack.c.bf16 %v978_v32, %v977_v16 }
 0x657   :  { %2421 = vmatpush3.bf16.msra.mxu0 %v2576_v62 }
 0x658   :  { %2415 = vmatmul.mubr.bf16.vlgmr.msra.gmra.mrb[40].mxu1 %v986_v37  ;;  %2422 = vmatprep.subr.bf16.mxu0 %v2577_v54 }
 0x659   :  { %1651 = vmatprep.mubr.bf16.mxu1 %v2755_v36 }
 0x65b   :  { %2423 = vmatpush3.bf16.msra.mxu0 %v2577_v54 }
 0x65c   :  { %2424 = vmatprep.subr.bf16.mxu0 %v2578_v4 }
 0x65f   :  { %2425 = vmatpush3.bf16.msra.mxu0 %v2578_v4  ;;  %v2730_v4 = vld [vmem:[%s3583_s0 + $0x18] sm:$0xff] }
 0x693   :  { %v3369_v63 = vpop.f32.mrb[24].mxu1 }
 0x694   :  { %v2374_v43 = vpop.f32.mrb[25].mxu1 }
 0x695   :  { %v3371_v61 = vpop.f32.mrb[26].mxu1 }
 0x696   :  { %v2375_v11 = vpop.f32.mrb[27].mxu1 }
 0x69b   :  { %v3373_v51 = vpop.f32.mrb[28].mxu1 }
 0x69c   :  { %v2380_v44 = vpop.f32.mrb[29].mxu1 }
 0x69d   :  { %v3375_v13 = vpop.f32.mrb[30].mxu1 }
 0x69e   :  { %v2381_v47 = vpop.f32.mrb[31].mxu1 }
 0x6cd   :  { %v1103_v24 = vpop.f32.mrb[16].mxu0 }
 0x6ce   :  { %v2386_v18 = vpop.f32.mrb[17].mxu0 }
 0x6cf   :  { %v1106_v26 = vpop.f32.mrb[18].mxu0 }
 0x6d0   :  { %v2533_v33 = vpack.i.bf16 %v1106_v26, %v1103_v24  ;;  %v2387_v49 = vpop.f32.mrb[19].mxu0 }
 0x6d1   :  { %v1144_v21 = vpop.f32.mrb[32].mxu1 }
 0x6d2   :  { %v2392_v46 = vpop.f32.mrb[33].mxu1  ;;  %2534 = vrot.lane.b32.xlu1 %v2533_v33, %s2762_s18 }
 0x6d3   :  { %v1147_v42 = vpop.f32.mrb[34].mxu1 }
 0x6d4   :  { %v2538_v0 = vpack.i.bf16 %v1147_v42, %v1144_v21  ;;  %v2393_v1 = vpop.f32.mrb[35].mxu1 }
 0x6d5   :  { %v1185_v2 = vpop.f32.mrb[20].mxu0 }
 0x6d6   :  { %2539 = vrot.lane.b32.xlu0 %v2538_v0, %s2762_s18  ;;  %v2398_v3 = vpop.f32.mrb[21].mxu0 }
 0x6d7   :  { %v1188_v59 = vpop.f32.mrb[22].mxu0  ;;  %v2727_v3 = vld [vmem:[%s3583_s0] sm:$0xff] }
 0x6d8   :  { %v2543_v55 = vpack.i.bf16 %v1188_v59, %v1185_v2  ;;  %v2399_v8 = vpop.f32.mrb[23].mxu0 }
 0x6d9   :  { %v1226_v12 = vpop.f32.mrb[36].mxu1  ;;  %v2728_v8 = vld [vmem:[%s3583_s0 + $0x8] sm:$0xff] }
 0x6da   :  { %v2404_v15 = vpop.f32.mrb[37].mxu1  ;;  %2544 = vrot.lane.b32.xlu1 %v2543_v55, %s2763_s23 }
 0x6db   :  { %v1229_v52 = vpop.f32.mrb[38].mxu1 }
 0x6dc   :  { %v2548_v50 = vpack.i.bf16 %v1229_v52, %v1226_v12  ;;  %v2405_v17 = vpop.f32.mrb[39].mxu1  ;;  %v2729_v52 = vld [vmem:[%s3583_s0 + $0x10] sm:$0xff] }
 0x6de   :  { %2549 = vrot.lane.b32.xlu0 %v2548_v50, %s2763_s23 }
 0x725   :  { %v1267_v14 = vpop.f32.mrb[24].mxu0 }
 0x726   :  { %v2410_v53 = vpop.f32.mrb[25].mxu0 }
 0x727   :  { %v1270_v5 = vpop.f32.mrb[26].mxu0 }
 0x728   :  { %v2553_v23 = vpack.i.bf16 %v1270_v5, %v1267_v14  ;;  %v2411_v28 = vpop.f32.mrb[27].mxu0 }
 0x72a   :  { %2554 = vrot.lane.b32.xlu1 %v2553_v23, %s2764_s27 }
 0x72b   :  { %v1308_v56 = vpop.f32.mrb[40].mxu1 }
 0x72c   :  { %v2416_v48 = vpop.f32.mrb[41].mxu1 }
 0x72d   :  { %v1311_v29 = vpop.f32.mrb[42].mxu1 }
 0x72e   :  { %v2558_v30 = vpack.i.bf16 %v1311_v29, %v1308_v56  ;;  %v2417_v31 = vpop.f32.mrb[43].mxu1 }
 0x730   :  { %2559 = vrot.lane.b32.xlu0 %v2558_v30, %s2764_s27 }
 0x744   :  { %v2535_v34 = vpop.permute.xlu1 %2534 }
 0x745   :  { %v2537_v35 = vunpack.i.h.bf16 %v2535_v34  ;;  %v2536_v57 = vunpack.i.l.bf16 %v2535_v34 }
 0x747   :  { %v1364_v20 = vsel %vm407_vm2, %v3371_v61, %v2537_v35  ;;  %v1363_v25 = vsel %vm407_vm2, %v3369_v63, %v2536_v57 }
 0x748   :  { %v2540_v38 = vpop.permute.xlu0 %2539 }
 0x749   :  { %v2542_v16 = vunpack.i.h.bf16 %v2540_v38  ;;  %v2541_v32 = vunpack.i.l.bf16 %v2540_v38 }
 0x74b   :  { %v1366_v63 = vsel %vm407_vm2, %v3375_v13, %v2542_v16  ;;  %v1365_v24 = vsel %vm407_vm2, %v3373_v51, %v2541_v32  ;;  %v2042_v13 = vld [vmem:[%s3589_s6] ss:$0 sm:$0xff]  ;;  %v2584_v16 = vld [vmem:[%s3592_s9 + $0x14] ss:$8 sps:$4 sm:$0xff]   ;;  %v2582_v32 = vld [vmem:[%s3592_s9 + $0x10] ss:$8 sps:$4 sm:$0xff]  }
 0x74c   :  { %v2545_v58 = vpop.permute.xlu1 %2544 }
 0x74d   :  { %v2547_v39 = vunpack.i.h.bf16 %v2545_v58  ;;  %v2546_v40 = vunpack.i.l.bf16 %v2545_v58 }
 0x74f   :  { %v1369_v22 = vsel %vm1367_vm5, %v1364_v20, %v2547_v39  ;;  %v1368_v45 = vsel %vm1367_vm5, %v1363_v25, %v2546_v40 }
 0x750   :  { %v2550_v9 = vpop.permute.xlu0 %2549 }
 0x751   :  { %v2552_v11 = vunpack.i.h.bf16 %v2550_v9  ;;  %v2551_v44 = vunpack.i.l.bf16 %v2550_v9 }
 0x753   :  { %v1371_v33 = vsel %vm1367_vm5, %v1366_v63, %v2552_v11  ;;  %v1370_v49 = vsel %vm1367_vm5, %v1365_v24, %v2551_v44  ;;  %v2590_v11 = vld [vmem:[%s3592_s9 + $0x34] ss:$8 sps:$4 sm:$0xff]   ;;  %v2588_v44 = vld [vmem:[%s3592_s9 + $0x30] ss:$8 sps:$4 sm:$0xff]  }
 0x79c   :  { %v2555_v27 = vpop.permute.xlu1 %2554 }
 0x79d   :  { %v2557_v41 = vunpack.i.h.bf16 %v2555_v27  ;;  %v2556_v19 = vunpack.i.l.bf16 %v2555_v27 }
 0x79f   :  { %v1374_v37 = vsel %vm1372_vm6, %v1369_v22, %v2557_v41  ;;  %v1373_v43 = vsel %vm1372_vm6, %v1368_v45, %v2556_v19  ;;  %v2581_v22 = vld [vmem:[%s3592_s9 + $0x4] ss:$8 sps:$4 sm:$0xff]   ;;  %v2579_v45 = vld [vmem:[%s3592_s9] ss:$8 sps:$4 sm:$0xff]  }
 0x7a0   :  { %v1377_v47 = vpack.c.bf16 %v1374_v37, %v1373_v43  ;;  %1619 = vmatprep.subr.bf16.mxu1 %v2581_v22  ;;  %v2587_v37 = vld [vmem:[%s3592_s9 + $0x24] ss:$8 sps:$4 sm:$0xff]   ;;  %v2585_v43 = vld [vmem:[%s3592_s9 + $0x20] ss:$8 sps:$4 sm:$0xff]  }
 0x7a1   :  { %1620 = vmatpush1.bf16.msra.mxu1 %v2579_v45 }
 0x7a2   :  { %v2560_v61 = vpop.permute.xlu0 %2559  ;;  %2426 = vmatprep.mubr.msk.bf16.mxu0 %vm58_vm0, %v1377_v47  ;;  %1621 = vmatprep.subr.bf16.mxu1 %v2584_v16 }
 0x7a3   :  { %v2562_v18 = vunpack.i.h.bf16 %v2560_v61  ;;  %v2561_v26 = vunpack.i.l.bf16 %v2560_v61 }
 0x7a5   :  { %v1376_v21 = vsel %vm1372_vm6, %v1371_v33, %v2562_v18  ;;  %v1375_v46 = vsel %vm1372_vm6, %v1370_v49, %v2561_v26  ;;  %1622 = vmatpush1.bf16.msra.mxu1 %v2582_v32 }
 0x7a6   :  { %v1378_v42 = vpack.c.bf16 %v1376_v21, %v1375_v46  ;;  %1623 = vmatprep.subr.bf16.mxu1 %v2587_v37 }
 0x7a8   :  { %2427 = vmatmul.mubr.msk.bf16.vlgmr.msra.gmra.mrb[28].mxu0 %vm58_vm0, %v1378_v42 }
 0x7a9   :  { %1624 = vmatpush1.bf16.msra.mxu1 %v2585_v43 }
 0x7aa   :  { %1625 = vmatprep.subr.bf16.mxu1 %v2590_v11 }
 0x7ad   :  { %1626 = vmatpush1.bf16.msra.mxu1 %v2588_v44 }
 0x87b   :  { %v2428_v60 = vpop.f32.mrb[28].mxu0 }
 0x87c   :  { %v1458_v62 = vpop.f32.mrb[29].mxu0  ;;  %v1467_v2 = vadd.f32 %v2428_v60, %v2042_v13 }
 0x87d   :  { %v1459_v51 = vadd.f32 %v2042_v13, %v1458_v62  ;;  %v2429_v0 = vpop.f32.mrb[30].mxu0  ;;  %v2049_v62 = vld [vmem:[%s3590_s7] ss:$0 sm:$0xff] }
 0x87e   :  { %v1461_v1 = vpop.f32.mrb[31].mxu0  ;;  %v3425_v50 = vadd.f32 %v2729_v52, %v1467_v2  ;;  %v1470_v17 = vadd.f32 %v2429_v0, %v2042_v13 }
 0x87f   :  { %v3413_v59 = vadd.f32 %v2727_v3, %v1459_v51  ;;  %v1462_v55 = vadd.f32 %v2042_v13, %v1461_v1  ;;  %v2050_v3 = vld [vmem:[%s3591_s8] ss:$0 sm:$0xff] }
 0x880   :  { %v3432_v14 = vadd.f32 %v2730_v4, %v1470_v17  ;;  %v1485_v53 = vsel %vm58_vm0, %v3425_v50, 0.0 }
 0x881   :  { %v3418_v12 = vadd.f32 %v2728_v8, %v1462_v55  ;;  %v1479_v15 = vsel %vm58_vm0, %v3413_v59, 0.0 }
 0x882   :  { %1480 = vadd.xlane.f32.xlu1 %v1479_v15  ;;  %v1488_v5 = vsel %vm58_vm0, %v3432_v14, 0.0 }
 0x883   :  { %v1482_v54 = vsel %vm58_vm0, %v3418_v12, 0.0 }
 0x884   :  { %1483 = vadd.xlane.f32.xlu0 %v1482_v54 }
 0x888   :  { %1486 = vadd.xlane.f32.xlu0 %v1485_v53 }
 0x88c   :  { %1489 = vadd.xlane.f32.xlu0 %v1488_v5 }
 0x90f   :  { %v1481_v23 = vpop.xlane.xlu1 %1480 }
 0x910   :  { %v1491_v28 = vmul.f32 0.015625, %v1481_v23 }
 0x911   :  { %v1484_v56 = vpop.xlane.xlu0 %1483 }
 0x912   :  { %v1495_v48 = vsub.f32 %v3413_v59, %v1491_v28  ;;  %v1492_v29 = vmul.f32 0.015625, %v1484_v56 }
 0x914   :  { %v1496_v30 = vsub.f32 %v3418_v12, %v1492_v29  ;;  %v1499_v31 = vmul.f32 %v1495_v48, %v1495_v48  ;;  %v2591_v29 = vld [vmem:[%s3594_s11 + $0x40] sm:$0xff]  }
 0x915   :  { %v1487_v34 = vpop.xlane.xlu0 %1486  ;;  %2182 = vmatprep.subr.bf16.mxu0 %v2591_v29 }
 0x916   :  { %v1493_v58 = vmul.f32 0.015625, %v1487_v34  ;;  %v1503_v35 = vsel %vm58_vm0, %v1499_v31, 0.0  ;;  %v1500_v57 = vmul.f32 %v1496_v30, %v1496_v30  ;;  %v2594_v31 = vld [vmem:[%s3594_s11 + $0x8] sm:$0xff]   ;;  %v2595_v34 = vld [vmem:[%s3594_s11 + $0x50] sm:$0xff]  }
 0x917   :  { %1504 = vadd.xlane.f32.xlu1 %v1503_v35  ;;  %v2597_v35 = vld [vmem:[%s3594_s11 + $0x58] sm:$0xff]  }
 0x918   :  { %v1497_v38 = vsub.f32 %v3425_v50, %v1493_v58  ;;  %v1506_v39 = vsel %vm58_vm0, %v1500_v57, 0.0  ;;  %v2596_v58 = vld [vmem:[%s3594_s11 + $0x10] sm:$0xff]   ;;  %v2598_v57 = vld [vmem:[%s3594_s11 + $0x18] sm:$0xff]  }
 0x919   :  { %1507 = vadd.xlane.f32.xlu0 %v1506_v39  ;;  %v1490_v40 = vpop.xlane.xlu0 %1489  ;;  %v2600_v39 = vld [vmem:[%s3594_s11 + $0x20] sm:$0xff]  }
 0x91a   :  { %v1494_v27 = vmul.f32 0.015625, %v1490_v40  ;;  %v1501_v20 = vmul.f32 %v1497_v38, %v1497_v38  ;;  %v2601_v40 = vld [vmem:[%s3594_s11 + $0x68] sm:$0xff]  }
 0x91c   :  { %v1498_v25 = vsub.f32 %v3432_v14, %v1494_v27  ;;  %v1509_v9 = vsel %vm58_vm0, %v1501_v20, 0.0  ;;  %v2602_v27 = vld [vmem:[%s3594_s11 + $0x28] sm:$0xff]   ;;  %v2603_v20 = vld [vmem:[%s3594_s11 + $0x70] sm:$0xff]  }
 0x91d   :  { %1510 = vadd.xlane.f32.xlu1 %v1509_v9  ;;  %v2605_v9 = vld [vmem:[%s3594_s11 + $0x78] sm:$0xff]  }
 0x91e   :  { %v1502_v41 = vmul.f32 %v1498_v25, %v1498_v25 }
 0x920   :  { %v1512_v19 = vsel %vm58_vm0, %v1502_v41, 0.0  ;;  %v2606_v41 = vld [vmem:[%s3594_s11 + $0x38] sm:$0xff]  }
 0x921   :  { %1513 = vadd.xlane.f32.xlu0 %v1512_v19  ;;  %v1561_v19 = vld [vmem:[%s3593_s10] sm:$0x3] }
 0x922   :  { %v1566_v22 = vrot.slane %v1561_v19, %v146_v7  ;;  %v1570_v45 = vrot.slane %v1561_v19, %v150_v10 }
 0x9a4   :  { %v1505_v47 = vpop.xlane.xlu1 %1504 }
 0x9a5   :  { %v1515_v61 = vmul.f32 0.015625, %v1505_v47 }
 0x9a6   :  { %v1508_v63 = vpop.xlane.xlu0 %1507 }
 0x9a7   :  { %v1519_v24 = vadd.f32 1e-05, %v1515_v61  ;;  %v1516_v18 = vmul.f32 0.015625, %v1508_v63 }
 0x9a9   :  { %2679 = vrsqrt.f32 %v1519_v24  ;;  %v1520_v26 = vadd.f32 1e-05, %v1516_v18 }
 0x9aa   :  { %v1511_v33 = vpop.xlane.xlu1 %1510 }
 0x9ab   :  { %2681 = vrsqrt.f32 %v1520_v26  ;;  %v1517_v49 = vmul.f32 0.015625, %v1511_v33 }
 0x9ad   :  { %v1521_v21 = vadd.f32 1e-05, %v1517_v49 }
 0x9ae   :  { %v1514_v46 = vpop.xlane.xlu0 %1513 }
 0x9af   :  { %2683 = vrsqrt.f32 %v1521_v21  ;;  %v1518_v42 = vmul.f32 0.015625, %v1514_v46 }
 0x9b1   :  { %v1522_v13 = vadd.f32 1e-05, %v1518_v42 }
 0x9b3   :  { %v2680_v60 = vpop.eup %2679  ;;  %2685 = vrsqrt.f32 %v1522_v13 }
 0x9b4   :  { %v1527_v51 = vmul.f32 %v2680_v60, %v1495_v48 }
 0x9b5   :  { %v2682_v0 = vpop.eup %2681 }
 0x9b6   :  { %v1537_v1 = vmul.f32 %v2049_v62, %v1527_v51  ;;  %v1528_v2 = vmul.f32 %v2682_v0, %v1496_v30  ;;  %v2592_v30 = vld [vmem:[%s3594_s11] sm:$0xff]  }
 0x9b7   :  { %2183 = vmatpush3.bf16.msra.mxu0 %v2592_v30 }
 0x9b8   :  { %v1538_v55 = vmul.f32 %v2049_v62, %v1528_v2  ;;  %v1547_v52 = vadd.f32 %v2050_v3, %v1537_v1 }
 0x9b9   :  { %v2684_v8 = vpop.eup %2683 }
 0x9ba   :  { %v1529_v15 = vmul.f32 %v2684_v8, %v1497_v38  ;;  %v1548_v17 = vadd.f32 %v2050_v3, %v1538_v55  ;;  %v2599_v38 = vld [vmem:[%s3594_s11 + $0x60] sm:$0xff]  }
 0x9bc   :  { %v1551_v54 = vpack.c.bf16 %v1548_v17, %v1547_v52  ;;  %v1539_v5 = vmul.f32 %v2049_v62, %v1529_v15 }
 0x9bd   :  { %v2686_v4 = vpop.eup %2685 }
 0x9be   :  { %v1530_v53 = vmul.f32 %v2686_v4, %v1498_v25  ;;  %2059 = vmatmul.mubr.msk.bf16.vlgmr.msra.gmra.mrb[44].mxu1 %vm58_vm0, %v1551_v54  ;;  %v1549_v28 = vadd.f32 %v2050_v3, %v1539_v5  ;;  %v2604_v25 = vld [vmem:[%s3594_s11 + $0x30] sm:$0xff]  }
 0x9bf   :  { %1661 = vmatprep.mubr.bf16.mxu1 %v2755_v36  ;;  %v2593_v36 = vld [vmem:[%s3594_s11 + $0x48] sm:$0xff]  }
 0x9c0   :  { %v1540_v23 = vmul.f32 %v2049_v62, %v1530_v53  ;;  %2184 = vmatprep.subr.bf16.mxu0 %v2593_v36 }
 0x9c1   :  { %2185 = vmatpush3.bf16.msra.mxu0 %v2594_v31 }
 0x9c2   :  { %v1550_v56 = vadd.f32 %v2050_v3, %v1540_v23  ;;  %2186 = vmatprep.subr.bf16.mxu0 %v2595_v34 }
 0x9c4   :  { %v1552_v48 = vpack.c.bf16 %v1550_v56, %v1549_v28 }
 0x9c5   :  { %2187 = vmatpush3.bf16.msra.mxu0 %v2596_v58 }
 0x9c6   :  { %2060 = vmatmul.mubr.msk.bf16.gmra.mrb[48].mxu1 %vm58_vm0, %v1552_v48  ;;  %2188 = vmatprep.subr.bf16.mxu0 %v2597_v35 }
 0x9c9   :  { %2189 = vmatpush3.bf16.msra.mxu0 %v2598_v57 }
 0x9ca   :  { %2190 = vmatprep.subr.bf16.mxu0 %v2599_v38 }
 0x9cd   :  { %2191 = vmatpush3.bf16.msra.mxu0 %v2600_v39 }
 0x9ce   :  { %2192 = vmatprep.subr.bf16.mxu0 %v2601_v40 }
 0x9d1   :  { %2193 = vmatpush3.bf16.msra.mxu0 %v2602_v27 }
 0x9d2   :  { %2194 = vmatprep.subr.bf16.mxu0 %v2603_v20 }
 0x9d5   :  { %2195 = vmatpush3.bf16.msra.mxu0 %v2604_v25 }
 0x9d6   :  { %2196 = vmatprep.subr.bf16.mxu0 %v2605_v9 }
 0x9d9   :  { %2197 = vmatpush3.bf16.msra.mxu0 %v2606_v41 }
 0xa91   :  { %v1653_v16 = vpop.f32.mrb[44].mxu1 }
 0xa92   :  { %v3534_v32 = vadd.f32 %v1653_v16, %v1566_v22  ;;  %v1655_v37 = vpop.f32.mrb[45].mxu1 }
 0xa93   :  { %v3536_v43 = vadd.f32 %v1655_v37, %v1570_v45  ;;  %v1657_v11 = vpop.f32.mrb[46].mxu1 }
 0xa94   :  { %v2061_v44 = vmul.f32 -1.782, %v3534_v32  ;;  %v3539_v47 = vadd.f32 %v1657_v11, %v1566_v22  ;;  %v1659_v61 = vpop.f32.mrb[47].mxu1 }
 0xa95   :  { %v2062_v63 = vmul.f32 -1.782, %v3536_v43  ;;  %v1660_v24 = vadd.f32 %v1659_v61, %v1570_v45 }
 0xa96   :  { %v1688_v18 = vmul.f32 1.442695, %v2061_v44  ;;  %v2063_v7 = vmul.f32 -1.782, %v3539_v47 }
 0xa97   :  { %v1690_v6 = vmul.f32 1.442695, %v2062_v63  ;;  %v2064_v10 = vmul.f32 -1.782, %v1660_v24 }
 0xa98   :  { %2687 = vpow2.f32 %v1688_v18  ;;  %v1692_v26 = vmul.f32 1.442695, %v2063_v7 }
 0xa99   :  { %2689 = vpow2.f32 %v1690_v6  ;;  %v1694_v33 = vmul.f32 1.442695, %v2064_v10  ;;  %v1663_v49 = vpop.f32.mrb[48].mxu1 }
 0xa9a   :  { %2691 = vpow2.f32 %v1692_v26  ;;  %v1664_v21 = vadd.f32 %v1663_v49, %v1566_v22  ;;  %v1665_v46 = vpop.f32.mrb[49].mxu1 }
 0xa9b   :  { %2693 = vpow2.f32 %v1694_v33  ;;  %v1666_v42 = vadd.f32 %v1665_v46, %v1570_v45  ;;  %v1667_v13 = vpop.f32.mrb[50].mxu1 }
 0xa9c   :  { %v2065_v60 = vmul.f32 -1.782, %v1664_v21  ;;  %v1668_v62 = vadd.f32 %v1667_v13, %v1566_v22  ;;  %v1669_v51 = vpop.f32.mrb[51].mxu1 }
 0xa9d   :  { %v2066_v0 = vmul.f32 -1.782, %v1666_v42  ;;  %v1670_v1 = vadd.f32 %v1669_v51, %v1570_v45 }
 0xa9e   :  { %v1696_v2 = vmul.f32 1.442695, %v2065_v60  ;;  %v2067_v3 = vmul.f32 -1.782, %v1668_v62 }
 0xa9f   :  { %v1698_v55 = vmul.f32 1.442695, %v2066_v0  ;;  %v2068_v8 = vmul.f32 -1.782, %v1670_v1 }
 0xaa0   :  { %2695 = vpow2.f32 %v1696_v2  ;;  %v1700_v15 = vmul.f32 1.442695, %v2067_v3 }
 0xaa1   :  { %2697 = vpow2.f32 %v1698_v55  ;;  %v1702_v52 = vmul.f32 1.442695, %v2068_v8 }
 0xaa2   :  { %v2688_v17 = vpop.eup %2687  ;;  %2699 = vpow2.f32 %v1700_v15 }
 0xaa3   :  { %v2690_v54 = vpop.eup %2689  ;;  %v1704_v4 = vadd.f32 1.0, %v2688_v17  ;;  %2701 = vpow2.f32 %v1702_v52 }
 0xaa4   :  { %v2692_v53 = vpop.eup %2691  ;;  %v1705_v5 = vadd.f32 1.0, %v2690_v54 }
 0xaa5   :  { %v2694_v23 = vpop.eup %2693  ;;  %2703 = vrcp.f32 %v1704_v4  ;;  %v1706_v28 = vadd.f32 1.0, %v2692_v53 }
 0xaa6   :  { %2705 = vrcp.f32 %v1705_v5  ;;  %v1707_v56 = vadd.f32 1.0, %v2694_v23 }
 0xaa7   :  { %2707 = vrcp.f32 %v1706_v28 }
 0xaa8   :  { %2709 = vrcp.f32 %v1707_v56 }
 0xaaa   :  { %v2696_v48 = vpop.eup %2695 }
 0xaab   :  { %v2698_v29 = vpop.eup %2697  ;;  %v1708_v30 = vadd.f32 1.0, %v2696_v48 }
 0xaac   :  { %v2700_v36 = vpop.eup %2699  ;;  %v1709_v31 = vadd.f32 1.0, %v2698_v29 }
 0xaad   :  { %v2702_v34 = vpop.eup %2701  ;;  %2711 = vrcp.f32 %v1708_v30  ;;  %v1710_v58 = vadd.f32 1.0, %v2700_v36 }
 0xaae   :  { %2713 = vrcp.f32 %v1709_v31  ;;  %v1711_v35 = vadd.f32 1.0, %v2702_v34 }
 0xaaf   :  { %v2704_v57 = vpop.eup %2703  ;;  %2715 = vrcp.f32 %v1710_v58 }
 0xab0   :  { %v2706_v38 = vpop.eup %2705  ;;  %2717 = vrcp.f32 %v1711_v35  ;;  %v1728_v27 = vmul.f32 %v2704_v57, %v3534_v32 }
 0xab1   :  { %v2708_v39 = vpop.eup %2707  ;;  %v1729_v25 = vmul.f32 %v2706_v38, %v3536_v43  ;;  %v2069_v43 = vld [vmem:[%s3595_s12] ss:$0 sm:$0xff] }
 0xab2   :  { %v2710_v40 = vpop.eup %2709  ;;  %v1730_v20 = vmul.f32 %v2708_v39, %v3539_v47 }
 0xab3   :  { %v1731_v9 = vmul.f32 %v2710_v40, %v1660_v24 }
 0xab4   :  { %v1736_v41 = vpack.c.bf16 %v1730_v20, %v1728_v27 }
 0xab5   :  { %v1737_v19 = vpack.c.bf16 %v1731_v9, %v1729_v25 }
 0xab7   :  { %v2712_v22 = vpop.eup %2711  ;;  %1907 = vmatprep.mubr.bf16.mxu0 %v1737_v19 }
 0xab8   :  { %v2714_v45 = vpop.eup %2713  ;;  %1908 = vmatmul.mubr.bf16.vlgmr.msra.gmra.mrb[32].mxu0 %v1736_v41  ;;  %v1732_v11 = vmul.f32 %v2712_v22, %v1664_v21 }
 0xab9   :  { %v2716_v16 = vpop.eup %2715  ;;  %v1733_v61 = vmul.f32 %v2714_v45, %v1666_v42 }
 0xaba   :  { %v2718_v37 = vpop.eup %2717  ;;  %v1734_v44 = vmul.f32 %v2716_v16, %v1668_v62 }
 0xabb   :  { %v1735_v63 = vmul.f32 %v2718_v37, %v1670_v1 }
 0xabc   :  { %v1738_v18 = vpack.c.bf16 %v1734_v44, %v1732_v11  ;;  %v2086_v11 = vld [vmem:[%s3596_s13] ss:$0 sm:$0xff]  ;;  %s2765_s13 = smov [#allocation2]  }
 0xabd   :  { %v1739_v7 = vpack.c.bf16 %v1735_v63, %v1733_v61  ;;  %v2087_v63 = vld [vmem:[%s3597_s14] ss:$0 sm:$0xff]  ;;  %s2011_s24 = sshll.u32 %s2765_s13, 4  ;;  %s2012_s24 = int_to_ptr.vmem [resolvable:$true] %s2011_s24 }
 0xabe   :  { %s2731_s14 = scalar_lea.vmem %s2012_s24, 512  ;;  %p2736_p1 = scmp.lt.s32.totalorder %s2012_s24, %s2012_s24 }
 0xabf   :  { %1915 = vmatprep.mubr.bf16.mxu0 %v1739_v7  ;;  %p2732_p0 = scmp.ne.s32.totalorder %s2012_s24, %s2731_s14  ;;  %p2737_p2 = scmp.lt.s32.totalorder %s2731_s14, %s2731_s14 }
 0xac0   :  { %1916 = vmatmul.mubr.bf16.gmra.mrb[36].mxu0 %v1738_v18 }
 0xac1   :  { %p2738_p3 = por %p2737_p2, %p2736_p1 }
 0xac3   :  { %p2739_p4 = pnand %p2738_p3, %p2732_p0 }
 0xb8b   :  { %v2198_v32 = vpop.f32.mrb[32].mxu0 }
 0xb8c   :  { %v2199_v47 = vpop.f32.mrb[33].mxu0 }
 0xb8d   :  { %v2200_v24 = vadd.f32 %v2199_v47, %v2198_v32  ;;  %v2201_v6 = vpop.f32.mrb[34].mxu0 }
 0xb8e   :  { %v2202_v10 = vpop.f32.mrb[35].mxu0 }
 0xb8f   :  { %v1910_v26 = vadd.f32 %v2200_v24, %v2069_v43  ;;  %v2203_v33 = vadd.f32 %v2202_v10, %v2201_v6 }
 0xb91   :  { %v1913_v49 = vadd.f32 %v2203_v33, %v2069_v43  ;;  %v1924_v21 = vadd.f32 %v1910_v26, %v3413_v59 }
 0xb93   :  { %v2204_v46 = vpop.f32.mrb[36].mxu0  ;;  %v1930_v42 = vsel %vm58_vm0, %v1924_v21, 0.0  ;;  %v1925_v13 = vadd.f32 %v1913_v49, %v3418_v12 }
 0xb94   :  { %1931 = vadd.xlane.f32.xlu1 %v1930_v42  ;;  %v2205_v60 = vpop.f32.mrb[37].mxu0 }
 0xb95   :  { %v2206_v62 = vadd.f32 %v2205_v60, %v2204_v46  ;;  %v2207_v51 = vpop.f32.mrb[38].mxu0  ;;  %v1933_v0 = vsel %vm58_vm0, %v1925_v13, 0.0 }
 0xb96   :  { %1934 = vadd.xlane.f32.xlu0 %v1933_v0  ;;  %v2208_v1 = vpop.f32.mrb[39].mxu0 }
 0xb97   :  { %v1918_v2 = vadd.f32 %v2206_v62, %v2069_v43  ;;  %v2209_v3 = vadd.f32 %v2208_v1, %v2207_v51 }
 0xb99   :  { %v1921_v55 = vadd.f32 %v2209_v3, %v2069_v43  ;;  %v1926_v8 = vadd.f32 %v1918_v2, %v3425_v50 }
 0xb9b   :  { %v1936_v59 = vsel %vm58_vm0, %v1926_v8, 0.0  ;;  %v1927_v15 = vadd.f32 %v1921_v55, %v3432_v14 }
 0xb9c   :  { %1937 = vadd.xlane.f32.xlu1 %v1936_v59 }
 0xb9d   :  { %v1939_v12 = vsel %vm58_vm0, %v1927_v15, 0.0 }
 0xb9e   :  { %1940 = vadd.xlane.f32.xlu0 %v1939_v12 }
 0xc21   :  { %v1932_v52 = vpop.xlane.xlu1 %1931 }
 0xc22   :  { %v1942_v17 = vmul.f32 0.015625, %v1932_v52 }
 0xc23   :  { %v1935_v54 = vpop.xlane.xlu0 %1934 }
 0xc24   :  { %v1946_v4 = vsub.f32 %v1924_v21, %v1942_v17  ;;  %v1943_v53 = vmul.f32 0.015625, %v1935_v54 }
 0xc26   :  { %v1947_v5 = vsub.f32 %v1925_v13, %v1943_v53  ;;  %v1950_v23 = vmul.f32 %v1946_v4, %v1946_v4 }
 0xc28   :  { %v1954_v28 = vsel %vm58_vm0, %v1950_v23, 0.0  ;;  %v1951_v56 = vmul.f32 %v1947_v5, %v1947_v5 }
 0xc29   :  { %1955 = vadd.xlane.f32.xlu1 %v1954_v28  ;;  %v1938_v50 = vpop.xlane.xlu1 %1937 }
 0xc2a   :  { %v1944_v48 = vmul.f32 0.015625, %v1938_v50  ;;  %v1957_v29 = vsel %vm58_vm0, %v1951_v56, 0.0 }
 0xc2b   :  { %1958 = vadd.xlane.f32.xlu0 %v1957_v29  ;;  %v1941_v14 = vpop.xlane.xlu0 %1940 }
 0xc2c   :  { %v1948_v30 = vsub.f32 %v1926_v8, %v1944_v48  ;;  %v1945_v36 = vmul.f32 0.015625, %v1941_v14 }
 0xc2e   :  { %v1949_v31 = vsub.f32 %v1927_v15, %v1945_v36  ;;  %v1952_v34 = vmul.f32 %v1948_v30, %v1948_v30 }
 0xc30   :  { %v1960_v58 = vsel %vm58_vm0, %v1952_v34, 0.0  ;;  %v1953_v35 = vmul.f32 %v1949_v31, %v1949_v31 }
 0xc31   :  { %1961 = vadd.xlane.f32.xlu1 %v1960_v58 }
 0xc32   :  { %v1963_v57 = vsel %vm58_vm0, %v1953_v35, 0.0 }
 0xc33   :  { %1964 = vadd.xlane.f32.xlu0 %v1963_v57 }
 0xcb6   :  { %v1956_v38 = vpop.xlane.xlu1 %1955 }
 0xcb7   :  { %v1966_v39 = vmul.f32 0.015625, %v1956_v38 }
 0xcb8   :  { %v1959_v40 = vpop.xlane.xlu0 %1958 }
 0xcb9   :  { %v1970_v27 = vadd.f32 1e-05, %v1966_v39  ;;  %v1967_v20 = vmul.f32 0.015625, %v1959_v40 }
 0xcbb   :  { %2719 = vrsqrt.f32 %v1970_v27  ;;  %v1971_v25 = vadd.f32 1e-05, %v1967_v20 }
 0xcbd   :  { %2721 = vrsqrt.f32 %v1971_v25 }
 0xcbe   :  { %v1962_v9 = vpop.xlane.xlu1 %1961 }
 0xcbf   :  { %v1968_v41 = vmul.f32 0.015625, %v1962_v9 }
 0xcc0   :  { %v1965_v19 = vpop.xlane.xlu0 %1964 }
 0xcc1   :  { %v1972_v22 = vadd.f32 1e-05, %v1968_v41  ;;  %v1969_v45 = vmul.f32 0.015625, %v1965_v19 }
 0xcc3   :  { %2723 = vrsqrt.f32 %v1972_v22  ;;  %v1973_v16 = vadd.f32 1e-05, %v1969_v45 }
 0xcc5   :  { %v2720_v37 = vpop.eup %2719  ;;  %2725 = vrsqrt.f32 %v1973_v16 }
 0xcc6   :  { %v1978_v44 = vmul.f32 %v2720_v37, %v1946_v4 }
 0xcc7   :  { %v2722_v61 = vpop.eup %2721 }
 0xcc8   :  { %v1988_v18 = vmul.f32 %v2086_v11, %v1978_v44  ;;  %v1979_v7 = vmul.f32 %v2722_v61, %v1947_v5 }
 0xcca   :  { %v1998_v32 = vadd.f32 %v2087_v63, %v1988_v18  ;;  %v1989_v43 = vmul.f32 %v2086_v11, %v1979_v7 }
 0xccc   :  { %2002 = vst.msk [vmem:[#allocation2] sm:$0xff] %vm58_vm0, %v1998_v32  ;;  %v1999_v47 = vadd.f32 %v2087_v63, %v1989_v43 }
 0xccd   :  { %v2724_v24 = vpop.eup %2723 }
 0xcce   :  { %2003 = vst.msk [vmem:[#allocation2 + $0x8] sm:$0xff] %vm58_vm0, %v1999_v47  ;;  %v1980_v6 = vmul.f32 %v2724_v24, %v1948_v30 }
 0xccf   :  { %v2726_v10 = vpop.eup %2725 }
 0xcd0   :  { %v1990_v26 = vmul.f32 %v2086_v11, %v1980_v6  ;;  %v1981_v33 = vmul.f32 %v2726_v10, %v1949_v31 }
 0xcd2   :  { %v2000_v49 = vadd.f32 %v2087_v63, %v1990_v26  ;;  %v1991_v21 = vmul.f32 %v2086_v11, %v1981_v33 }
 0xcd4   :  { %2004 = vst.msk [vmem:[#allocation2 + $0x10] sm:$0xff] %vm58_vm0, %v2000_v49  ;;  %v2001_v46 = vadd.f32 %v2087_v63, %v1991_v21 }
 0xcd6   :  { %2005 = vst.msk [vmem:[#allocation2 + $0x18] sm:$0xff] %vm58_vm0, %v2001_v46 }
 0xcd7   :  { %2742 = shalt.err (!%p2739_p4)
}
 0xcd8   :  { %s2743_s3 = scalar_lea.hbm %s3598_s15, 512 }
 0xcd9   :  { %p2744_p5 = scmp.ne.s32.totalorder %s3598_s15, %s2743_s3  ;;  %p2747_p6 = scmp.lt.u32.totalorder %s2743_s3, %s3598_s15 }
 0xcdb   :  { %p2749_p7 = pnand %p2747_p6, %p2744_p5 }
 0xcdd   :  { %2752 = shalt.err (!%p2749_p7)
}
 0xcde   :  { %s2766_s1 = smov 128   ;;  %s2767_s2 = smov 8  }
 0xcdf   :  { %2017 = dma.vmem_to_hbm [thread:$0]  %s2012_s24, 512, %s3598_s15, [#allocation3], %s2766_s1, %s2766_s1, %s2767_s2  }
 0xce0   :  { %2753 = dma.done.wait [#allocation3], 512  }
 0xce1   :  { %2754 = vsyncadd [#allocation3], 4294966784 }
 0xce2   :  { %2021 = vsyncpa [#allocation3], 1 }

</bundles_post_ra>
